<compile_context>
chip_gen: v5e
topology: v5e:2x2
jax: 0.10.0
libtpu: 0.0.40
codegen_flags: <defaults>
</compile_context>

<pallas_src>
import functools

import jax
import jax.numpy as jnp
from jax.experimental import pallas as pl
from jax.experimental.pallas import tpu as pltpu

BN_EPS = 1e-5
LRELU_SLOPE = 0.2
LANE = 128               # TPU lane width; channel padding granularity
NCORES = 2               # leading "parallel" axis of the conv stats pass
CONV_BM_CAP = 512        # target row tile (~85% of HBM roofline per measurements)
VMEM_LIMIT = 48 * 1024 * 1024


def _round_up(x, m):
    return (x + m - 1) // m * m


def _cdiv(a, b):
    return -(-a // b)


def _conv_tiling(m):
    """Row tiling for the conv passes: NCORES x jpg blocks of bm rows.
    M is padded with zero rows up to NCORES*jpg*bm; zero rows contribute 0 to
    the BN sums and inv_m uses the true M, so statistics stay exact."""
    per_core = _cdiv(m, NCORES)
    jpg = _cdiv(per_core, CONV_BM_CAP)
    bm = _round_up(_cdiv(per_core, jpg), 16)     # >= bf16 (16,128) min tile
    return bm, jpg, NCORES * jpg * bm


def _pick_kb(featp, cap=2048):
    for kb in (2048, 1024, 512, 256, 128):
        if kb <= cap and featp % kb == 0:
            return kb
    return featp


# ----------------------------- Pallas kernels ------------------------------

def _conv_mm_stats_kernel(p_ref, w_ref, y_ref, s1_ref, s2_ref):
    """Pass 1: bf16 patches @ bf16 weight (f32 MXU accumulation).  The (bm,Cp)
    tile is stored as bf16 (halves the HBM round trip to pass 2); per-channel
    sum / sum-of-squares are taken from the f32 accumulator and accumulated in
    this core's private stats slot across the (arbitrary) j axis."""
    @pl.when(pl.program_id(1) == 0)
    def _():
        s1_ref[...] = jnp.zeros_like(s1_ref)
        s2_ref[...] = jnp.zeros_like(s2_ref)

    y = jnp.dot(p_ref[...], w_ref[...], preferred_element_type=jnp.float32)
    y_ref[...] = y.astype(y_ref.dtype)
    s1_ref[...] += jnp.sum(y, axis=0, keepdims=True)
    s2_ref[...] += jnp.sum(y * y, axis=0, keepdims=True)


def _bn_lrelu_kernel(y_ref, s1_ref, s2_ref, g_ref, b_ref, o_ref, *, inv_m):
    """Pass 2: BatchNorm2d training statistics (biased var = E[y^2]-mu^2,
    eps=1e-5) + LeakyReLU(0.2).  Per-core partial stats are combined here."""
    mu = jnp.sum(s1_ref[...], axis=0) * inv_m            # (1, Cp)
    ex2 = jnp.sum(s2_ref[...], axis=0) * inv_m
    # TODO(synk): a shifted sum-of-squares would be safer against cancellation
    # for trained weights whose channel means are large relative to their std.
    var = ex2 - mu * mu
    scale = g_ref[...] * jax.lax.rsqrt(var + BN_EPS)
    shift = b_ref[...] - mu * scale
    yn = y_ref[...].astype(jnp.float32) * scale + shift
    o_ref[...] = jnp.where(yn >= 0.0, yn, LRELU_SLOPE * yn).astype(o_ref.dtype)


def _heads_sampler_kernel(h_ref, w_ref, b_ref, e_ref, ml_ref, z_ref, acc_ref):
    """Packed mean|logvar Linear heads, K-tiled over the feature axis with an
    f32 VMEM accumulator; bias add + reparameterization on the last K step.
    Lanes [0:HW) of the packed output are the mean head, [HW:2*HW) the logvar
    head (HW is a multiple of 128, so the split is a free vreg-aligned slice)."""
    k = pl.program_id(0)

    @pl.when(k == 0)
    def _():
        acc_ref[...] = jnp.zeros_like(acc_ref)

    acc_ref[...] += jnp.dot(h_ref[...], w_ref[...],
                            preferred_element_type=jnp.float32)

    @pl.when(k == pl.num_programs(0) - 1)
    def _():
        hw = z_ref.shape[-1]
        ml = acc_ref[...] + b_ref[...]
        ml_ref[...] = ml
        z_ref[...] = e_ref[...] * jnp.exp(0.5 * ml[:, hw:]) + ml[:, :hw]


# ----------------------------- layer wrappers -------------------------------

def conv_bn_lrelu(patches, w, gamma, beta):
    """patches (M,Kp) bf16, w (Kp,Cp) bf16, gamma/beta (1,Cp) f32 zero-padded
    past the real Cout -> activations (Mp,Cp) bf16 (caller slices [:M,:Cout])."""
    m, kp = patches.shape
    cp = w.shape[1]
    assert gamma.shape == (1, cp) and beta.shape == (1, cp)
    bm, jpg, mp = _conv_tiling(m)
    if mp != m:
        patches = jnp.pad(patches, ((0, mp - m), (0, 0)))

    # Pass 1: matmul + per-core partial batch statistics.
    # TODO(synk): for very wide layers (weight tile > ~16 MiB) single-buffer the
    # grid-invariant weight (pipeline_mode=pl.Buffered(1)) or add a K grid axis
    # with an f32 accumulator to stay inside v7x's 64 MiB VMEM.
    y, s1, s2 = pl.pallas_call(
        _conv_mm_stats_kernel,
        out_shape=(jax.ShapeDtypeStruct((mp, cp), jnp.bfloat16),
                   jax.ShapeDtypeStruct((NCORES, 1, cp), jnp.float32),
                   jax.ShapeDtypeStruct((NCORES, 1, cp), jnp.float32)),
        grid=(NCORES, jpg),
        in_specs=[pl.BlockSpec((bm, kp), lambda c, j: (c * jpg + j, 0)),
                  pl.BlockSpec((kp, cp), lambda c, j: (0, 0))],
        out_specs=[pl.BlockSpec((bm, cp), lambda c, j: (c * jpg + j, 0)),
                   pl.BlockSpec((None, 1, cp), lambda c, j: (c, 0, 0)),
                   pl.BlockSpec((None, 1, cp), lambda c, j: (c, 0, 0))],
        compiler_params=pltpu.CompilerParams(
            dimension_semantics=("parallel", "arbitrary"),
            vmem_limit_bytes=VMEM_LIMIT),
    )(patches, w)

    # Pass 2: BN + LeakyReLU, fully parallel over row tiles (megacore-friendly).
    return pl.pallas_call(
        functools.partial(_bn_lrelu_kernel, inv_m=1.0 / m),
        out_shape=jax.ShapeDtypeStruct((mp, cp), jnp.bfloat16),
        grid=(NCORES * jpg,),
        in_specs=[pl.BlockSpec((bm, cp), lambda i: (i, 0)),
                  pl.BlockSpec((NCORES, 1, cp), lambda i: (0, 0, 0)),
                  pl.BlockSpec((NCORES, 1, cp), lambda i: (0, 0, 0)),
                  pl.BlockSpec((1, cp), lambda i: (0, 0)),
                  pl.BlockSpec((1, cp), lambda i: (0, 0))],
        out_specs=pl.BlockSpec((bm, cp), lambda i: (i, 0)),
        compiler_params=pltpu.CompilerParams(
            dimension_semantics=("parallel",),
            vmem_limit_bytes=VMEM_LIMIT),
    )(y, s1, s2, gamma, beta)


def heads_and_sample(hidden, w_heads, b_heads, eps_pad):
    """hidden (n,featp) bf16, w_heads (featp,2*HW) bf16, b (1,2*HW) f32,
    eps (n,HW) f32 -> packed mean|logvar (n,2*HW) f32 and z (n,HW) f32."""
    n, featp = hidden.shape
    two_hw = w_heads.shape[1]
    hw = two_hw // 2
    kb = _pick_kb(featp)
    return pl.pallas_call(
        _heads_sampler_kernel,
        out_shape=(jax.ShapeDtypeStruct((n, two_hw), jnp.float32),
                   jax.ShapeDtypeStruct((n, hw), jnp.float32)),
        grid=(featp // kb,),
        in_specs=[pl.BlockSpec((n, kb), lambda k: (0, k)),
                  pl.BlockSpec((kb, two_hw), lambda k: (k, 0)),
                  pl.BlockSpec((1, two_hw), lambda k: (0, 0)),
                  pl.BlockSpec((n, hw), lambda k: (0, 0))],
        out_specs=[pl.BlockSpec((n, two_hw), lambda k: (0, 0)),
                   pl.BlockSpec((n, hw), lambda k: (0, 0))],
        scratch_shapes=[pltpu.VMEM((n, two_hw), jnp.float32)],
        compiler_params=pltpu.CompilerParams(
            dimension_semantics=("arbitrary",),
            vmem_limit_bytes=VMEM_LIMIT),
    )(hidden, w_heads, b_heads, eps_pad)


# ------------------------------- JAX glue -----------------------------------

def im2col_nhwc(x, kpad, k=4, stride=2, pad=1):
    """x (N,H,W,C) bf16 -> K-padded patches (N*Ho*Wo, kpad) bf16, columns in
    (kh, kw, C) order.  One fused pass: no separate pad / cast host passes.
    TODO(synk): extract patches inside the conv kernel (halo'd row windows on
    the padded NHWC input) to avoid materializing the k*k-amplified array."""
    n, h, w, c = x.shape
    xp = jnp.pad(x, ((0, 0), (pad, pad), (pad, pad), (0, 0)))
    ho = (h + 2 * pad - k) // stride + 1
    wo = (w + 2 * pad - k) // stride + 1
    cols = []
    for i in range(k):
        for j in range(k):
            cols.append(xp[:, i:i + stride * (ho - 1) + 1:stride,
                           j:j + stride * (wo - 1) + 1:stride, :])
    p = jnp.concatenate(cols, axis=-1)                  # (N, Ho, Wo, k*k*C)
    p = p.reshape(n * ho * wo, k * k * c)
    if kpad > k * k * c:
        p = jnp.pad(p, ((0, 0), (0, kpad - k * k * c)))
    return p, ho, wo


def init_params(key, nc, nef, nz, out_size):
    """Synthetic parameters matching the PyTorch module shapes, pre-transformed
    for the Pallas kernels; also returns torch-layout copies for the reference."""
    chans = [nc, nef, nef * 2, nef * 4, nef * 8]
    params = {"conv": []}
    raw = {"conv_w": []}
    for li in range(4):
        cin, cout = chans[li], chans[li + 1]
        key, k1 = jax.random.split(key)
        w_oihw = 0.05 * jax.random.normal(k1, (cout, cin, 4, 4), jnp.float32)
        raw["conv_w"].append(w_oihw)
        # Conv bias omitted: exactly cancelled by the batch-stat BN mean subtraction.
        kreal = cin * 16
        kp = _round_up(kreal, LANE)
        cp = _round_up(cout, LANE)
        w = w_oihw.transpose(2, 3, 1, 0).reshape(kreal, cout)    # (kh*kw*Cin, Cout)
        w = jnp.pad(w, ((0, kp - kreal), (0, cp - cout))).astype(jnp.bfloat16)
        params["conv"].append({
            "w": w,
            "gamma": jnp.ones((1, cout), jnp.float32),   # BatchNorm2d defaults
            "beta": jnp.zeros((1, cout), jnp.float32),
        })

    c, hh, ww = nef * 8, out_size, out_size
    feat = c * hh * ww
    featp = _round_up(feat, LANE)
    hw = _round_up(nz, LANE)                 # per-head lane width (vreg-aligned)
    key, k1, k2, k3, k4 = jax.random.split(key, 5)
    wm = 0.05 * jax.random.normal(k1, (nz, feat), jnp.float32)   # torch Linear (out,in)
    bmean = 0.01 * jax.random.normal(k2, (nz,), jnp.float32)
    wl = 0.05 * jax.random.normal(k3, (nz, feat), jnp.float32)
    blog = 0.01 * jax.random.normal(k4, (nz,), jnp.float32)
    raw.update(wm=wm, bm=bmean, wl=wl, bl=blog)

    # PyTorch head-weight rows are NCHW-flatten ordered; permute them to NHWC
    # order so the channel-last hidden feeds the heads with no runtime transpose.
    hi, wi, ci = jnp.meshgrid(jnp.arange(hh), jnp.arange(ww), jnp.arange(c),
                              indexing="ij")
    perm = (ci * (hh * ww) + hi * ww + wi).reshape(-1)   # nhwc idx -> nchw idx
    wm_n = wm.T[perm]                                    # (feat, nz)
    wl_n = wl.T[perm]

    w_heads = jnp.zeros((featp, 2 * hw), jnp.float32)
    w_heads = w_heads.at[:feat, :nz].set(wm_n)
    w_heads = w_heads.at[:feat, hw:hw + nz].set(wl_n)
    b_heads = jnp.zeros((1, 2 * hw), jnp.float32)
    b_heads = b_heads.at[0, :nz].set(bmean)
    b_heads = b_heads.at[0, hw:hw + nz].set(blog)
    params["w_heads"] = w_heads.astype(jnp.bfloat16)
    params["b_heads"] = b_heads
    return params, raw


@jax.jit
def encoder_forward(x, params, eps):
    # NCHW -> NHWC and cast to bf16 exactly once.
    h = jnp.transpose(x, (0, 2, 3, 1)).astype(jnp.bfloat16)
    for layer in params["conv"]:
        kp, cp = layer["w"].shape
        cout = layer["gamma"].shape[1]
        patches, ho, wo = im2col_nhwc(h, kp)
        # gamma/beta zero-padded past Cout => padded output lanes stay exactly 0.
        gamma = jnp.pad(layer["gamma"], ((0, 0), (0, cp - cout)))
        beta = jnp.pad(layer["beta"], ((0, 0), (0, cp - cout)))
        act = conv_bn_lrelu(patches, layer["w"], gamma, beta)
        m = h.shape[0] * ho * wo
        h = act[:m, :cout].reshape(h.shape[0], ho, wo, cout)     # stays NHWC bf16

    n = h.shape[0]
    hidden = h.reshape(n, -1)                  # NHWC flatten (head rows permuted)
    featp = params["w_heads"].shape[0]
    if featp > hidden.shape[1]:
        hidden = jnp.pad(hidden, ((0, 0), (0, featp - hidden.shape[1])))
    hw = params["w_heads"].shape[1] // 2
    nz = eps.shape[1]
    eps_pad = jnp.pad(eps, ((0, 0), (0, hw - nz)))
    ml, z_full = heads_and_sample(hidden, params["w_heads"], params["b_heads"],
                                  eps_pad)
    mean = ml[:, :nz]
    logvar = ml[:, hw:hw + nz]
    z = z_full[:, :nz]
    return z, mean, logvar


def reference_forward(x, raw, eps):
    """Pure-JAX f32 forward matching the PyTorch module (validation only)."""
    h = x
    for w_oihw in raw["conv_w"]:
        y = jax.lax.conv_general_dilated(
            h, w_oihw, window_strides=(2, 2), padding=((1, 1), (1, 1)),
            dimension_numbers=("NCHW", "OIHW", "NCHW"))
        mu = jnp.mean(y, axis=(0, 2, 3), keepdims=True)
        var = jnp.mean(jnp.square(y - mu), axis=(0, 2, 3), keepdims=True)
        yn = (y - mu) * jax.lax.rsqrt(var + BN_EPS)        # gamma=1, beta=0
        h = jnp.where(yn >= 0.0, yn, LRELU_SLOPE * yn)
    hid = h.reshape(h.shape[0], -1)                        # NCHW flatten (torch)
    mean = hid @ raw["wm"].T + raw["bm"]
    logvar = hid @ raw["wl"].T + raw["bl"]
    z = eps * jnp.exp(0.5 * logvar) + mean
    return z, mean, logvar


# --------------------------------- main --------------------------------------

if __name__ == "__main__":
    # Small config: image_size=32 -> out_size = 32 // 16 = 2
    batch, nc, nef, nz, image_size = 2, 3, 8, 16, 32
    out_size = image_size // 16

    key = jax.random.PRNGKey(0)
    k_x, k_p, k_eps = jax.random.split(key, 3)

    x = jax.random.normal(k_x, (batch, nc, image_size, image_size), jnp.float32)
    params, raw = init_params(k_p, nc, nef, nz, out_size)
    # torch normal_() noise replaced by deterministic jax PRNG noise.
    eps = jax.random.normal(k_eps, (batch, nz), jnp.float32)

    z, mean, logvar = encoder_forward(x, params, eps)
    jax.block_until_ready((z, mean, logvar))

    assert z.shape == (batch, nz) and mean.shape == (batch, nz) \
        and logvar.shape == (batch, nz)

    # Loose check vs a pure-JAX f32 reference (kernel path uses bf16 operands
    # and a bf16 conv intermediate).
    z_r, mean_r, lv_r = reference_forward(x, raw, eps)
    for a, b, name in ((z, z_r, "z"), (mean, mean_r, "mean"),
                       (logvar, lv_r, "logvar")):
        err = float(jnp.max(jnp.abs(a - b)))
        assert err < 0.25, f"{name} mismatch vs reference: max abs err {err}"

    print("KERNEL_OK")
</pallas_src>

<mosaic_0001>
module attributes {stable_mosaic.version = 11 : i64} {
  func.func @_conv_mm_stats_kernel(%arg0: i32, %arg1: i32, %arg2: memref<256x128xbf16, #tpu.memory_space<vmem>>, %arg3: memref<128x128xbf16, #tpu.memory_space<vmem>>, %arg4: memref<256x128xbf16, #tpu.memory_space<vmem>>, %arg5: memref<1x1x128xf32, #tpu.memory_space<vmem>>, %arg6: memref<1x1x128xf32, #tpu.memory_space<vmem>>) attributes {dimension_semantics = [#tpu.dimension_semantics<parallel>, #tpu.dimension_semantics<arbitrary>], iteration_bounds = array<i64: 2, 1>, scalar_prefetch = 0 : i64, scratch_operands = 0 : i64, tpu.core_type = #tpu.core_type<tc>, window_params = [{transform_indices = @transform_0, window_bounds = array<i64: 256, 128>}, {pipeline_mode = #tpu.pipeline_mode<synchronous>, transform_indices = @transform_1, window_bounds = array<i64: 128, 128>}, {transform_indices = @transform_2, window_bounds = array<i64: 256, 128>}, {transform_indices = @transform_3, window_bounds = array<i64: 1, 1, 128>}, {transform_indices = @transform_4, window_bounds = array<i64: 1, 1, 128>}]} {
    %c0_i32 = arith.constant 0 : i32
    %0 = arith.cmpi eq, %arg1, %c0_i32 : i32
    %1 = arith.extui %0 : i1 to i32
    %c0_i32_0 = arith.constant 0 : i32
    %2 = arith.cmpi ne, %1, %c0_i32_0 : i32
    scf.if %2 {
      %cst_20 = arith.constant 0.000000e+00 : f32
      %25 = vector.broadcast %cst_20 : f32 to vector<1x128xf32>
      %c0_21 = arith.constant 0 : index
      %c0_22 = arith.constant 0 : index
      %c0_23 = arith.constant 0 : index
      %26 = vector.load %arg5[%c0_21, %c0_22, %c0_23] : memref<1x1x128xf32, #tpu.memory_space<vmem>>, vector<1x1x128xf32>
      %27 = vector.shape_cast %26 : vector<1x1x128xf32> to vector<1x128xf32>
      %28 = vector.shape_cast %25 : vector<1x128xf32> to vector<1x1x128xf32>
      tpu.vector_store %arg5[%c0_21, %c0_22, %c0_23], %28 {strides = array<i32>} : memref<1x1x128xf32, #tpu.memory_space<vmem>>, vector<1x1x128xf32>,
      %cst_24 = arith.constant 0.000000e+00 : f32
      %29 = vector.broadcast %cst_24 : f32 to vector<1x128xf32>
      %c0_25 = arith.constant 0 : index
      %c0_26 = arith.constant 0 : index
      %c0_27 = arith.constant 0 : index
      %30 = vector.load %arg6[%c0_25, %c0_26, %c0_27] : memref<1x1x128xf32, #tpu.memory_space<vmem>>, vector<1x1x128xf32>
      %31 = vector.shape_cast %30 : vector<1x1x128xf32> to vector<1x128xf32>
      %32 = vector.shape_cast %29 : vector<1x128xf32> to vector<1x1x128xf32>
      tpu.vector_store %arg6[%c0_25, %c0_26, %c0_27], %32 {strides = array<i32>} : memref<1x1x128xf32, #tpu.memory_space<vmem>>, vector<1x1x128xf32>,
    } else {
    }
    %c0 = arith.constant 0 : index
    %c0_1 = arith.constant 0 : index
    %3 = vector.load %arg2[%c0, %c0_1] : memref<256x128xbf16, #tpu.memory_space<vmem>>, vector<256x128xbf16>
    %c0_2 = arith.constant 0 : index
    %c0_3 = arith.constant 0 : index
    %4 = vector.load %arg3[%c0_2, %c0_3] : memref<128x128xbf16, #tpu.memory_space<vmem>>, vector<128x128xbf16>
    %cst = arith.constant dense<0.000000e+00> : vector<256x128xf32>
    %5 = tpu.matmul %3, %4, %cst {dimension_numbers = #tpu.dot_dimension_numbers<[1], [0], [0], [1], [0, 0, 1, 1], [], []>} : vector<256x128xbf16>, vector<128x128xbf16>, vector<256x128xf32> -> vector<256x128xf32>
    %6 = arith.truncf %5 : vector<256x128xf32> to vector<256x128xbf16>
    %c0_4 = arith.constant 0 : index
    %c0_5 = arith.constant 0 : index
    %7 = vector.load %arg4[%c0_4, %c0_5] : memref<256x128xbf16, #tpu.memory_space<vmem>>, vector<256x128xbf16>
    tpu.vector_store %arg4[%c0_4, %c0_5], %6 {strides = array<i32>} : memref<256x128xbf16, #tpu.memory_space<vmem>>, vector<256x128xbf16>,
    %c0_6 = arith.constant 0 : index
    %c0_7 = arith.constant 0 : index
    %c0_8 = arith.constant 0 : index
    %8 = vector.load %arg5[%c0_6, %c0_7, %c0_8] : memref<1x1x128xf32, #tpu.memory_space<vmem>>, vector<1x1x128xf32>
    %9 = vector.shape_cast %8 : vector<1x1x128xf32> to vector<1x128xf32>
    %cst_9 = arith.constant dense<0.000000e+00> : vector<128xf32>
    %10 = vector.multi_reduction <add>, %5, %cst_9 [0] : vector<256x128xf32> to vector<128xf32>
    %11 = vector.shape_cast %10 : vector<128xf32> to vector<1x128xf32>
    %12 = arith.addf %9, %11 : vector<1x128xf32>
    %c0_10 = arith.constant 0 : index
    %c0_11 = arith.constant 0 : index
    %c0_12 = arith.constant 0 : index
    %13 = vector.load %arg5[%c0_10, %c0_11, %c0_12] : memref<1x1x128xf32, #tpu.memory_space<vmem>>, vector<1x1x128xf32>
    %14 = vector.shape_cast %13 : vector<1x1x128xf32> to vector<1x128xf32>
    %15 = vector.shape_cast %12 : vector<1x128xf32> to vector<1x1x128xf32>
    tpu.vector_store %arg5[%c0_10, %c0_11, %c0_12], %15 {strides = array<i32>} : memref<1x1x128xf32, #tpu.memory_space<vmem>>, vector<1x1x128xf32>,
    %c0_13 = arith.constant 0 : index
    %c0_14 = arith.constant 0 : index
    %c0_15 = arith.constant 0 : index
    %16 = vector.load %arg6[%c0_13, %c0_14, %c0_15] : memref<1x1x128xf32, #tpu.memory_space<vmem>>, vector<1x1x128xf32>
    %17 = vector.shape_cast %16 : vector<1x1x128xf32> to vector<1x128xf32>
    %18 = arith.mulf %5, %5 : vector<256x128xf32>
    %cst_16 = arith.constant dense<0.000000e+00> : vector<128xf32>
    %19 = vector.multi_reduction <add>, %18, %cst_16 [0] : vector<256x128xf32> to vector<128xf32>
    %20 = vector.shape_cast %19 : vector<128xf32> to vector<1x128xf32>
    %21 = arith.addf %17, %20 : vector<1x128xf32>
    %c0_17 = arith.constant 0 : index
    %c0_18 = arith.constant 0 : index
    %c0_19 = arith.constant 0 : index
    %22 = vector.load %arg6[%c0_17, %c0_18, %c0_19] : memref<1x1x128xf32, #tpu.memory_space<vmem>>, vector<1x1x128xf32>
    %23 = vector.shape_cast %22 : vector<1x1x128xf32> to vector<1x128xf32>
    %24 = vector.shape_cast %21 : vector<1x128xf32> to vector<1x1x128xf32>
    tpu.vector_store %arg6[%c0_17, %c0_18, %c0_19], %24 {strides = array<i32>} : memref<1x1x128xf32, #tpu.memory_space<vmem>>, vector<1x1x128xf32>,
    return
  }
  func.func @transform_0(%arg0: i32, %arg1: i32) -> (i32, i32) {
    %c1_i32 = arith.constant 1 : i32
    %0 = arith.muli %arg0, %c1_i32 : i32
    %1 = arith.addi %0, %arg1 : i32
    %c0_i32 = arith.constant 0 : i32
    %c0_i32_0 = arith.constant 0 : i32
    return %1, %c0_i32 : i32, i32
  }
  func.func @transform_1(%arg0: i32, %arg1: i32) -> (i32, i32) {
    %c0_i32 = arith.constant 0 : i32
    %c0_i32_0 = arith.constant 0 : i32
    %c0_i32_1 = arith.constant 0 : i32
    return %c0_i32, %c0_i32_0 : i32, i32
  }
  func.func @transform_2(%arg0: i32, %arg1: i32) -> (i32, i32) {
    %c1_i32 = arith.constant 1 : i32
    %0 = arith.muli %arg0, %c1_i32 : i32
    %1 = arith.addi %0, %arg1 : i32
    %c0_i32 = arith.constant 0 : i32
    %c0_i32_0 = arith.constant 0 : i32
    return %1, %c0_i32 : i32, i32
  }
  func.func @transform_3(%arg0: i32, %arg1: i32) -> (i32, i32, i32) {
    %c0_i32 = arith.constant 0 : i32
    %c0_i32_0 = arith.constant 0 : i32
    %c0_i32_1 = arith.constant 0 : i32
    return %arg0, %c0_i32, %c0_i32_0 : i32, i32, i32
  }
  func.func @transform_4(%arg0: i32, %arg1: i32) -> (i32, i32, i32) {
    %c0_i32 = arith.constant 0 : i32
    %c0_i32_0 = arith.constant 0 : i32
    %c0_i32_1 = arith.constant 0 : i32
    return %arg0, %c0_i32, %c0_i32_0 : i32, i32, i32
  }
}

module attributes {stable_mosaic.version = 11 : i64} {
  func.func @_bn_lrelu_kernel(%arg0: i32, %arg1: memref<256x128xbf16, #tpu.memory_space<vmem>>, %arg2: memref<2x1x128xf32, #tpu.memory_space<vmem>>, %arg3: memref<2x1x128xf32, #tpu.memory_space<vmem>>, %arg4: memref<1x128xf32, #tpu.memory_space<vmem>>, %arg5: memref<1x128xf32, #tpu.memory_space<vmem>>, %arg6: memref<256x128xbf16, #tpu.memory_space<vmem>>) attributes {dimension_semantics = [#tpu.dimension_semantics<parallel>], iteration_bounds = array<i64: 2>, scalar_prefetch = 0 : i64, scratch_operands = 0 : i64, tpu.core_type = #tpu.core_type<tc>, window_params = [{transform_indices = @transform_0, window_bounds = array<i64: 256, 128>}, {pipeline_mode = #tpu.pipeline_mode<synchronous>, transform_indices = @transform_1, window_bounds = array<i64: 2, 1, 128>}, {pipeline_mode = #tpu.pipeline_mode<synchronous>, transform_indices = @transform_2, window_bounds = array<i64: 2, 1, 128>}, {pipeline_mode = #tpu.pipeline_mode<synchronous>, transform_indices = @transform_3, window_bounds = array<i64: 1, 128>}, {pipeline_mode = #tpu.pipeline_mode<synchronous>, transform_indices = @transform_4, window_bounds = array<i64: 1, 128>}, {transform_indices = @transform_5, window_bounds = array<i64: 256, 128>}]} {
    %c0 = arith.constant 0 : index
    %c0_0 = arith.constant 0 : index
    %c0_1 = arith.constant 0 : index
    %0 = vector.load %arg2[%c0, %c0_0, %c0_1] : memref<2x1x128xf32, #tpu.memory_space<vmem>>, vector<2x1x128xf32>
    %cst = arith.constant dense<0.000000e+00> : vector<1x128xf32>
    %1 = vector.multi_reduction <add>, %0, %cst [0] : vector<2x1x128xf32> to vector<1x128xf32>
    %cst_2 = arith.constant 0.001953125 : f32
    %2 = vector.broadcast %cst_2 : f32 to vector<1x128xf32>
    %3 = arith.mulf %1, %2 : vector<1x128xf32>
    %c0_3 = arith.constant 0 : index
    %c0_4 = arith.constant 0 : index
    %c0_5 = arith.constant 0 : index
    %4 = vector.load %arg3[%c0_3, %c0_4, %c0_5] : memref<2x1x128xf32, #tpu.memory_space<vmem>>, vector<2x1x128xf32>
    %cst_6 = arith.constant dense<0.000000e+00> : vector<1x128xf32>
    %5 = vector.multi_reduction <add>, %4, %cst_6 [0] : vector<2x1x128xf32> to vector<1x128xf32>
    %cst_7 = arith.constant 0.001953125 : f32
    %6 = vector.broadcast %cst_7 : f32 to vector<1x128xf32>
    %7 = arith.mulf %5, %6 : vector<1x128xf32>
    %8 = arith.mulf %3, %3 : vector<1x128xf32>
    %9 = arith.subf %7, %8 : vector<1x128xf32>
    %c0_8 = arith.constant 0 : index
    %c0_9 = arith.constant 0 : index
    %10 = vector.load %arg4[%c0_8, %c0_9] : memref<1x128xf32, #tpu.memory_space<vmem>>, vector<1x128xf32>
    %cst_10 = arith.constant 9.99999974E-6 : f32
    %11 = vector.broadcast %cst_10 : f32 to vector<1x128xf32>
    %12 = arith.addf %9, %11 : vector<1x128xf32>
    %13 = math.rsqrt %12 : vector<1x128xf32>
    %14 = arith.mulf %10, %13 : vector<1x128xf32>
    %c0_11 = arith.constant 0 : index
    %c0_12 = arith.constant 0 : index
    %15 = vector.load %arg5[%c0_11, %c0_12] : memref<1x128xf32, #tpu.memory_space<vmem>>, vector<1x128xf32>
    %16 = arith.mulf %3, %14 : vector<1x128xf32>
    %17 = arith.subf %15, %16 : vector<1x128xf32>
    %c0_13 = arith.constant 0 : index
    %c0_14 = arith.constant 0 : index
    %18 = vector.load %arg1[%c0_13, %c0_14] : memref<256x128xbf16, #tpu.memory_space<vmem>>, vector<256x128xbf16>
    %19 = arith.extf %18 : vector<256x128xbf16> to vector<256x128xf32>
    %20 = vector.broadcast %14 : vector<1x128xf32> to vector<256x128xf32>
    %21 = arith.mulf %19, %20 : vector<256x128xf32>
    %22 = vector.broadcast %17 : vector<1x128xf32> to vector<256x128xf32>
    %23 = arith.addf %21, %22 : vector<256x128xf32>
    %cst_15 = arith.constant 0.000000e+00 : f32
    %24 = vector.broadcast %cst_15 : f32 to vector<256x128xf32>
    %25 = arith.cmpf oge, %23, %24 : vector<256x128xf32>
    %cst_16 = arith.constant 2.000000e-01 : f32
    %26 = vector.broadcast %cst_16 : f32 to vector<256x128xf32>
    %27 = arith.mulf %26, %23 : vector<256x128xf32>
    %28 = arith.select %25, %23, %27 : vector<256x128xi1>, vector<256x128xf32>
    %29 = arith.truncf %28 : vector<256x128xf32> to vector<256x128xbf16>
    %c0_17 = arith.constant 0 : index
    %c0_18 = arith.constant 0 : index
    %30 = vector.load %arg6[%c0_17, %c0_18] : memref<256x128xbf16, #tpu.memory_space<vmem>>, vector<256x128xbf16>
    tpu.vector_store %arg6[%c0_17, %c0_18], %29 {strides = array<i32>} : memref<256x128xbf16, #tpu.memory_space<vmem>>, vector<256x128xbf16>,
    return
  }
  func.func @transform_0(%arg0: i32) -> (i32, i32) {
    %c0_i32 = arith.constant 0 : i32
    %c0_i32_0 = arith.constant 0 : i32
    return %arg0, %c0_i32 : i32, i32
  }
  func.func @transform_1(%arg0: i32) -> (i32, i32, i32) {
    %c0_i32 = arith.constant 0 : i32
    %c0_i32_0 = arith.constant 0 : i32
    %c0_i32_1 = arith.constant 0 : i32
    %c0_i32_2 = arith.constant 0 : i32
    return %c0_i32, %c0_i32_0, %c0_i32_1 : i32, i32, i32
  }
  func.func @transform_2(%arg0: i32) -> (i32, i32, i32) {
    %c0_i32 = arith.constant 0 : i32
    %c0_i32_0 = arith.constant 0 : i32
    %c0_i32_1 = arith.constant 0 : i32
    %c0_i32_2 = arith.constant 0 : i32
    return %c0_i32, %c0_i32_0, %c0_i32_1 : i32, i32, i32
  }
  func.func @transform_3(%arg0: i32) -> (i32, i32) {
    %c0_i32 = arith.constant 0 : i32
    %c0_i32_0 = arith.constant 0 : i32
    %c0_i32_1 = arith.constant 0 : i32
    return %c0_i32, %c0_i32_0 : i32, i32
  }
  func.func @transform_4(%arg0: i32) -> (i32, i32) {
    %c0_i32 = arith.constant 0 : i32
    %c0_i32_0 = arith.constant 0 : i32
    %c0_i32_1 = arith.constant 0 : i32
    return %c0_i32, %c0_i32_0 : i32, i32
  }
  func.func @transform_5(%arg0: i32) -> (i32, i32) {
    %c0_i32 = arith.constant 0 : i32
    %c0_i32_0 = arith.constant 0 : i32
    return %arg0, %c0_i32 : i32, i32
  }
}

module attributes {stable_mosaic.version = 11 : i64} {
  func.func @_bn_lrelu_kernel(%arg0: i32, %arg1: memref<64x128xbf16, #tpu.memory_space<vmem>>, %arg2: memref<2x1x128xf32, #tpu.memory_space<vmem>>, %arg3: memref<2x1x128xf32, #tpu.memory_space<vmem>>, %arg4: memref<1x128xf32, #tpu.memory_space<vmem>>, %arg5: memref<1x128xf32, #tpu.memory_space<vmem>>, %arg6: memref<64x128xbf16, #tpu.memory_space<vmem>>) attributes {dimension_semantics = [#tpu.dimension_semantics<parallel>], iteration_bounds = array<i64: 2>, scalar_prefetch = 0 : i64, scratch_operands = 0 : i64, tpu.core_type = #tpu.core_type<tc>, window_params = [{transform_indices = @transform_0, window_bounds = array<i64: 64, 128>}, {pipeline_mode = #tpu.pipeline_mode<synchronous>, transform_indices = @transform_1, window_bounds = array<i64: 2, 1, 128>}, {pipeline_mode = #tpu.pipeline_mode<synchronous>, transform_indices = @transform_2, window_bounds = array<i64: 2, 1, 128>}, {pipeline_mode = #tpu.pipeline_mode<synchronous>, transform_indices = @transform_3, window_bounds = array<i64: 1, 128>}, {pipeline_mode = #tpu.pipeline_mode<synchronous>, transform_indices = @transform_4, window_bounds = array<i64: 1, 128>}, {transform_indices = @transform_5, window_bounds = array<i64: 64, 128>}]} {
    %c0 = arith.constant 0 : index
    %c0_0 = arith.constant 0 : index
    %c0_1 = arith.constant 0 : index
    %0 = vector.load %arg2[%c0, %c0_0, %c0_1] : memref<2x1x128xf32, #tpu.memory_space<vmem>>, vector<2x1x128xf32>
    %cst = arith.constant dense<0.000000e+00> : vector<1x128xf32>
    %1 = vector.multi_reduction <add>, %0, %cst [0] : vector<2x1x128xf32> to vector<1x128xf32>
    %cst_2 = arith.constant 7.812500e-03 : f32
    %2 = vector.broadcast %cst_2 : f32 to vector<1x128xf32>
    %3 = arith.mulf %1, %2 : vector<1x128xf32>
    %c0_3 = arith.constant 0 : index
    %c0_4 = arith.constant 0 : index
    %c0_5 = arith.constant 0 : index
    %4 = vector.load %arg3[%c0_3, %c0_4, %c0_5] : memref<2x1x128xf32, #tpu.memory_space<vmem>>, vector<2x1x128xf32>
    %cst_6 = arith.constant dense<0.000000e+00> : vector<1x128xf32>
    %5 = vector.multi_reduction <add>, %4, %cst_6 [0] : vector<2x1x128xf32> to vector<1x128xf32>
    %cst_7 = arith.constant 7.812500e-03 : f32
    %6 = vector.broadcast %cst_7 : f32 to vector<1x128xf32>
    %7 = arith.mulf %5, %6 : vector<1x128xf32>
    %8 = arith.mulf %3, %3 : vector<1x128xf32>
    %9 = arith.subf %7, %8 : vector<1x128xf32>
    %c0_8 = arith.constant 0 : index
    %c0_9 = arith.constant 0 : index
    %10 = vector.load %arg4[%c0_8, %c0_9] : memref<1x128xf32, #tpu.memory_space<vmem>>, vector<1x128xf32>
    %cst_10 = arith.constant 9.99999974E-6 : f32
    %11 = vector.broadcast %cst_10 : f32 to vector<1x128xf32>
    %12 = arith.addf %9, %11 : vector<1x128xf32>
    %13 = math.rsqrt %12 : vector<1x128xf32>
    %14 = arith.mulf %10, %13 : vector<1x128xf32>
    %c0_11 = arith.constant 0 : index
    %c0_12 = arith.constant 0 : index
    %15 = vector.load %arg5[%c0_11, %c0_12] : memref<1x128xf32, #tpu.memory_space<vmem>>, vector<1x128xf32>
    %16 = arith.mulf %3, %14 : vector<1x128xf32>
    %17 = arith.subf %15, %16 : vector<1x128xf32>
    %c0_13 = arith.constant 0 : index
    %c0_14 = arith.constant 0 : index
    %18 = vector.load %arg1[%c0_13, %c0_14] : memref<64x128xbf16, #tpu.memory_space<vmem>>, vector<64x128xbf16>
    %19 = arith.extf %18 : vector<64x128xbf16> to vector<64x128xf32>
    %20 = vector.broadcast %14 : vector<1x128xf32> to vector<64x128xf32>
    %21 = arith.mulf %19, %20 : vector<64x128xf32>
    %22 = vector.broadcast %17 : vector<1x128xf32> to vector<64x128xf32>
    %23 = arith.addf %21, %22 : vector<64x128xf32>
    %cst_15 = arith.constant 0.000000e+00 : f32
    %24 = vector.broadcast %cst_15 : f32 to vector<64x128xf32>
    %25 = arith.cmpf oge, %23, %24 : vector<64x128xf32>
    %cst_16 = arith.constant 2.000000e-01 : f32
    %26 = vector.broadcast %cst_16 : f32 to vector<64x128xf32>
    %27 = arith.mulf %26, %23 : vector<64x128xf32>
    %28 = arith.select %25, %23, %27 : vector<64x128xi1>, vector<64x128xf32>
    %29 = arith.truncf %28 : vector<64x128xf32> to vector<64x128xbf16>
    %c0_17 = arith.constant 0 : index
    %c0_18 = arith.constant 0 : index
    %30 = vector.load %arg6[%c0_17, %c0_18] : memref<64x128xbf16, #tpu.memory_space<vmem>>, vector<64x128xbf16>
    tpu.vector_store %arg6[%c0_17, %c0_18], %29 {strides = array<i32>} : memref<64x128xbf16, #tpu.memory_space<vmem>>, vector<64x128xbf16>,
    return
  }
  func.func @transform_0(%arg0: i32) -> (i32, i32) {
    %c0_i32 = arith.constant 0 : i32
    %c0_i32_0 = arith.constant 0 : i32
    return %arg0, %c0_i32 : i32, i32
  }
  func.func @transform_1(%arg0: i32) -> (i32, i32, i32) {
    %c0_i32 = arith.constant 0 : i32
    %c0_i32_0 = arith.constant 0 : i32
    %c0_i32_1 = arith.constant 0 : i32
    %c0_i32_2 = arith.constant 0 : i32
    return %c0_i32, %c0_i32_0, %c0_i32_1 : i32, i32, i32
  }
  func.func @transform_2(%arg0: i32) -> (i32, i32, i32) {
    %c0_i32 = arith.constant 0 : i32
    %c0_i32_0 = arith.constant 0 : i32
    %c0_i32_1 = arith.constant 0 : i32
    %c0_i32_2 = arith.constant 0 : i32
    return %c0_i32, %c0_i32_0, %c0_i32_1 : i32, i32, i32
  }
  func.func @transform_3(%arg0: i32) -> (i32, i32) {
    %c0_i32 = arith.constant 0 : i32
    %c0_i32_0 = arith.constant 0 : i32
    %c0_i32_1 = arith.constant 0 : i32
    return %c0_i32, %c0_i32_0 : i32, i32
  }
  func.func @transform_4(%arg0: i32) -> (i32, i32) {
    %c0_i32 = arith.constant 0 : i32
    %c0_i32_0 = arith.constant 0 : i32
    %c0_i32_1 = arith.constant 0 : i32
    return %c0_i32, %c0_i32_0 : i32, i32
  }
  func.func @transform_5(%arg0: i32) -> (i32, i32) {
    %c0_i32 = arith.constant 0 : i32
    %c0_i32_0 = arith.constant 0 : i32
    return %arg0, %c0_i32 : i32, i32
  }
}

module attributes {stable_mosaic.version = 11 : i64} {
  func.func @_conv_mm_stats_kernel(%arg0: i32, %arg1: i32, %arg2: memref<64x128xbf16, #tpu.memory_space<vmem>>, %arg3: memref<128x128xbf16, #tpu.memory_space<vmem>>, %arg4: memref<64x128xbf16, #tpu.memory_space<vmem>>, %arg5: memref<1x1x128xf32, #tpu.memory_space<vmem>>, %arg6: memref<1x1x128xf32, #tpu.memory_space<vmem>>) attributes {dimension_semantics = [#tpu.dimension_semantics<parallel>, #tpu.dimension_semantics<arbitrary>], iteration_bounds = array<i64: 2, 1>, scalar_prefetch = 0 : i64, scratch_operands = 0 : i64, tpu.core_type = #tpu.core_type<tc>, window_params = [{transform_indices = @transform_0, window_bounds = array<i64: 64, 128>}, {pipeline_mode = #tpu.pipeline_mode<synchronous>, transform_indices = @transform_1, window_bounds = array<i64: 128, 128>}, {transform_indices = @transform_2, window_bounds = array<i64: 64, 128>}, {transform_indices = @transform_3, window_bounds = array<i64: 1, 1, 128>}, {transform_indices = @transform_4, window_bounds = array<i64: 1, 1, 128>}]} {
    %c0_i32 = arith.constant 0 : i32
    %0 = arith.cmpi eq, %arg1, %c0_i32 : i32
    %1 = arith.extui %0 : i1 to i32
    %c0_i32_0 = arith.constant 0 : i32
    %2 = arith.cmpi ne, %1, %c0_i32_0 : i32
    scf.if %2 {
      %cst_20 = arith.constant 0.000000e+00 : f32
      %25 = vector.broadcast %cst_20 : f32 to vector<1x128xf32>
      %c0_21 = arith.constant 0 : index
      %c0_22 = arith.constant 0 : index
      %c0_23 = arith.constant 0 : index
      %26 = vector.load %arg5[%c0_21, %c0_22, %c0_23] : memref<1x1x128xf32, #tpu.memory_space<vmem>>, vector<1x1x128xf32>
      %27 = vector.shape_cast %26 : vector<1x1x128xf32> to vector<1x128xf32>
      %28 = vector.shape_cast %25 : vector<1x128xf32> to vector<1x1x128xf32>
      tpu.vector_store %arg5[%c0_21, %c0_22, %c0_23], %28 {strides = array<i32>} : memref<1x1x128xf32, #tpu.memory_space<vmem>>, vector<1x1x128xf32>,
      %cst_24 = arith.constant 0.000000e+00 : f32
      %29 = vector.broadcast %cst_24 : f32 to vector<1x128xf32>
      %c0_25 = arith.constant 0 : index
      %c0_26 = arith.constant 0 : index
      %c0_27 = arith.constant 0 : index
      %30 = vector.load %arg6[%c0_25, %c0_26, %c0_27] : memref<1x1x128xf32, #tpu.memory_space<vmem>>, vector<1x1x128xf32>
      %31 = vector.shape_cast %30 : vector<1x1x128xf32> to vector<1x128xf32>
      %32 = vector.shape_cast %29 : vector<1x128xf32> to vector<1x1x128xf32>
      tpu.vector_store %arg6[%c0_25, %c0_26, %c0_27], %32 {strides = array<i32>} : memref<1x1x128xf32, #tpu.memory_space<vmem>>, vector<1x1x128xf32>,
    } else {
    }
    %c0 = arith.constant 0 : index
    %c0_1 = arith.constant 0 : index
    %3 = vector.load %arg2[%c0, %c0_1] : memref<64x128xbf16, #tpu.memory_space<vmem>>, vector<64x128xbf16>
    %c0_2 = arith.constant 0 : index
    %c0_3 = arith.constant 0 : index
    %4 = vector.load %arg3[%c0_2, %c0_3] : memref<128x128xbf16, #tpu.memory_space<vmem>>, vector<128x128xbf16>
    %cst = arith.constant dense<0.000000e+00> : vector<64x128xf32>
    %5 = tpu.matmul %3, %4, %cst {dimension_numbers = #tpu.dot_dimension_numbers<[1], [0], [0], [1], [0, 0, 1, 1], [], []>} : vector<64x128xbf16>, vector<128x128xbf16>, vector<64x128xf32> -> vector<64x128xf32>
    %6 = arith.truncf %5 : vector<64x128xf32> to vector<64x128xbf16>
    %c0_4 = arith.constant 0 : index
    %c0_5 = arith.constant 0 : index
    %7 = vector.load %arg4[%c0_4, %c0_5] : memref<64x128xbf16, #tpu.memory_space<vmem>>, vector<64x128xbf16>
    tpu.vector_store %arg4[%c0_4, %c0_5], %6 {strides = array<i32>} : memref<64x128xbf16, #tpu.memory_space<vmem>>, vector<64x128xbf16>,
    %c0_6 = arith.constant 0 : index
    %c0_7 = arith.constant 0 : index
    %c0_8 = arith.constant 0 : index
    %8 = vector.load %arg5[%c0_6, %c0_7, %c0_8] : memref<1x1x128xf32, #tpu.memory_space<vmem>>, vector<1x1x128xf32>
    %9 = vector.shape_cast %8 : vector<1x1x128xf32> to vector<1x128xf32>
    %cst_9 = arith.constant dense<0.000000e+00> : vector<128xf32>
    %10 = vector.multi_reduction <add>, %5, %cst_9 [0] : vector<64x128xf32> to vector<128xf32>
    %11 = vector.shape_cast %10 : vector<128xf32> to vector<1x128xf32>
    %12 = arith.addf %9, %11 : vector<1x128xf32>
    %c0_10 = arith.constant 0 : index
    %c0_11 = arith.constant 0 : index
    %c0_12 = arith.constant 0 : index
    %13 = vector.load %arg5[%c0_10, %c0_11, %c0_12] : memref<1x1x128xf32, #tpu.memory_space<vmem>>, vector<1x1x128xf32>
    %14 = vector.shape_cast %13 : vector<1x1x128xf32> to vector<1x128xf32>
    %15 = vector.shape_cast %12 : vector<1x128xf32> to vector<1x1x128xf32>
    tpu.vector_store %arg5[%c0_10, %c0_11, %c0_12], %15 {strides = array<i32>} : memref<1x1x128xf32, #tpu.memory_space<vmem>>, vector<1x1x128xf32>,
    %c0_13 = arith.constant 0 : index
    %c0_14 = arith.constant 0 : index
    %c0_15 = arith.constant 0 : index
    %16 = vector.load %arg6[%c0_13, %c0_14, %c0_15] : memref<1x1x128xf32, #tpu.memory_space<vmem>>, vector<1x1x128xf32>
    %17 = vector.shape_cast %16 : vector<1x1x128xf32> to vector<1x128xf32>
    %18 = arith.mulf %5, %5 : vector<64x128xf32>
    %cst_16 = arith.constant dense<0.000000e+00> : vector<128xf32>
    %19 = vector.multi_reduction <add>, %18, %cst_16 [0] : vector<64x128xf32> to vector<128xf32>
    %20 = vector.shape_cast %19 : vector<128xf32> to vector<1x128xf32>
    %21 = arith.addf %17, %20 : vector<1x128xf32>
    %c0_17 = arith.constant 0 : index
    %c0_18 = arith.constant 0 : index
    %c0_19 = arith.constant 0 : index
    %22 = vector.load %arg6[%c0_17, %c0_18, %c0_19] : memref<1x1x128xf32, #tpu.memory_space<vmem>>, vector<1x1x128xf32>
    %23 = vector.shape_cast %22 : vector<1x1x128xf32> to vector<1x128xf32>
    %24 = vector.shape_cast %21 : vector<1x128xf32> to vector<1x1x128xf32>
    tpu.vector_store %arg6[%c0_17, %c0_18, %c0_19], %24 {strides = array<i32>} : memref<1x1x128xf32, #tpu.memory_space<vmem>>, vector<1x1x128xf32>,
    return
  }
  func.func @transform_0(%arg0: i32, %arg1: i32) -> (i32, i32) {
    %c1_i32 = arith.constant 1 : i32
    %0 = arith.muli %arg0, %c1_i32 : i32
    %1 = arith.addi %0, %arg1 : i32
    %c0_i32 = arith.constant 0 : i32
    %c0_i32_0 = arith.constant 0 : i32
    return %1, %c0_i32 : i32, i32
  }
  func.func @transform_1(%arg0: i32, %arg1: i32) -> (i32, i32) {
    %c0_i32 = arith.constant 0 : i32
    %c0_i32_0 = arith.constant 0 : i32
    %c0_i32_1 = arith.constant 0 : i32
    return %c0_i32, %c0_i32_0 : i32, i32
  }
  func.func @transform_2(%arg0: i32, %arg1: i32) -> (i32, i32) {
    %c1_i32 = arith.constant 1 : i32
    %0 = arith.muli %arg0, %c1_i32 : i32
    %1 = arith.addi %0, %arg1 : i32
    %c0_i32 = arith.constant 0 : i32
    %c0_i32_0 = arith.constant 0 : i32
    return %1, %c0_i32 : i32, i32
  }
  func.func @transform_3(%arg0: i32, %arg1: i32) -> (i32, i32, i32) {
    %c0_i32 = arith.constant 0 : i32
    %c0_i32_0 = arith.constant 0 : i32
    %c0_i32_1 = arith.constant 0 : i32
    return %arg0, %c0_i32, %c0_i32_0 : i32, i32, i32
  }
  func.func @transform_4(%arg0: i32, %arg1: i32) -> (i32, i32, i32) {
    %c0_i32 = arith.constant 0 : i32
    %c0_i32_0 = arith.constant 0 : i32
    %c0_i32_1 = arith.constant 0 : i32
    return %arg0, %c0_i32, %c0_i32_0 : i32, i32, i32
  }
}

module attributes {stable_mosaic.version = 11 : i64} {
  func.func @_conv_mm_stats_kernel(%arg0: i32, %arg1: i32, %arg2: memref<16x256xbf16, #tpu.memory_space<vmem>>, %arg3: memref<256x128xbf16, #tpu.memory_space<vmem>>, %arg4: memref<16x128xbf16, #tpu.memory_space<vmem>>, %arg5: memref<1x1x128xf32, #tpu.memory_space<vmem>>, %arg6: memref<1x1x128xf32, #tpu.memory_space<vmem>>) attributes {dimension_semantics = [#tpu.dimension_semantics<parallel>, #tpu.dimension_semantics<arbitrary>], iteration_bounds = array<i64: 2, 1>, scalar_prefetch = 0 : i64, scratch_operands = 0 : i64, tpu.core_type = #tpu.core_type<tc>, window_params = [{transform_indices = @transform_0, window_bounds = array<i64: 16, 256>}, {pipeline_mode = #tpu.pipeline_mode<synchronous>, transform_indices = @transform_1, window_bounds = array<i64: 256, 128>}, {transform_indices = @transform_2, window_bounds = array<i64: 16, 128>}, {transform_indices = @transform_3, window_bounds = array<i64: 1, 1, 128>}, {transform_indices = @transform_4, window_bounds = array<i64: 1, 1, 128>}]} {
    %c0_i32 = arith.constant 0 : i32
    %0 = arith.cmpi eq, %arg1, %c0_i32 : i32
    %1 = arith.extui %0 : i1 to i32
    %c0_i32_0 = arith.constant 0 : i32
    %2 = arith.cmpi ne, %1, %c0_i32_0 : i32
    scf.if %2 {
      %cst_20 = arith.constant 0.000000e+00 : f32
      %25 = vector.broadcast %cst_20 : f32 to vector<1x128xf32>
      %c0_21 = arith.constant 0 : index
      %c0_22 = arith.constant 0 : index
      %c0_23 = arith.constant 0 : index
      %26 = vector.load %arg5[%c0_21, %c0_22, %c0_23] : memref<1x1x128xf32, #tpu.memory_space<vmem>>, vector<1x1x128xf32>
      %27 = vector.shape_cast %26 : vector<1x1x128xf32> to vector<1x128xf32>
      %28 = vector.shape_cast %25 : vector<1x128xf32> to vector<1x1x128xf32>
      tpu.vector_store %arg5[%c0_21, %c0_22, %c0_23], %28 {strides = array<i32>} : memref<1x1x128xf32, #tpu.memory_space<vmem>>, vector<1x1x128xf32>,
      %cst_24 = arith.constant 0.000000e+00 : f32
      %29 = vector.broadcast %cst_24 : f32 to vector<1x128xf32>
      %c0_25 = arith.constant 0 : index
      %c0_26 = arith.constant 0 : index
      %c0_27 = arith.constant 0 : index
      %30 = vector.load %arg6[%c0_25, %c0_26, %c0_27] : memref<1x1x128xf32, #tpu.memory_space<vmem>>, vector<1x1x128xf32>
      %31 = vector.shape_cast %30 : vector<1x1x128xf32> to vector<1x128xf32>
      %32 = vector.shape_cast %29 : vector<1x128xf32> to vector<1x1x128xf32>
      tpu.vector_store %arg6[%c0_25, %c0_26, %c0_27], %32 {strides = array<i32>} : memref<1x1x128xf32, #tpu.memory_space<vmem>>, vector<1x1x128xf32>,
    } else {
    }
    %c0 = arith.constant 0 : index
    %c0_1 = arith.constant 0 : index
    %3 = vector.load %arg2[%c0, %c0_1] : memref<16x256xbf16, #tpu.memory_space<vmem>>, vector<16x256xbf16>
    %c0_2 = arith.constant 0 : index
    %c0_3 = arith.constant 0 : index
    %4 = vector.load %arg3[%c0_2, %c0_3] : memref<256x128xbf16, #tpu.memory_space<vmem>>, vector<256x128xbf16>
    %cst = arith.constant dense<0.000000e+00> : vector<16x128xf32>
    %5 = tpu.matmul %3, %4, %cst {dimension_numbers = #tpu.dot_dimension_numbers<[1], [0], [0], [1], [0, 0, 1, 1], [], []>} : vector<16x256xbf16>, vector<256x128xbf16>, vector<16x128xf32> -> vector<16x128xf32>
    %6 = arith.truncf %5 : vector<16x128xf32> to vector<16x128xbf16>
    %c0_4 = arith.constant 0 : index
    %c0_5 = arith.constant 0 : index
    %7 = vector.load %arg4[%c0_4, %c0_5] : memref<16x128xbf16, #tpu.memory_space<vmem>>, vector<16x128xbf16>
    tpu.vector_store %arg4[%c0_4, %c0_5], %6 {strides = array<i32>} : memref<16x128xbf16, #tpu.memory_space<vmem>>, vector<16x128xbf16>,
    %c0_6 = arith.constant 0 : index
    %c0_7 = arith.constant 0 : index
    %c0_8 = arith.constant 0 : index
    %8 = vector.load %arg5[%c0_6, %c0_7, %c0_8] : memref<1x1x128xf32, #tpu.memory_space<vmem>>, vector<1x1x128xf32>
    %9 = vector.shape_cast %8 : vector<1x1x128xf32> to vector<1x128xf32>
    %cst_9 = arith.constant dense<0.000000e+00> : vector<128xf32>
    %10 = vector.multi_reduction <add>, %5, %cst_9 [0] : vector<16x128xf32> to vector<128xf32>
    %11 = vector.shape_cast %10 : vector<128xf32> to vector<1x128xf32>
    %12 = arith.addf %9, %11 : vector<1x128xf32>
    %c0_10 = arith.constant 0 : index
    %c0_11 = arith.constant 0 : index
    %c0_12 = arith.constant 0 : index
    %13 = vector.load %arg5[%c0_10, %c0_11, %c0_12] : memref<1x1x128xf32, #tpu.memory_space<vmem>>, vector<1x1x128xf32>
    %14 = vector.shape_cast %13 : vector<1x1x128xf32> to vector<1x128xf32>
    %15 = vector.shape_cast %12 : vector<1x128xf32> to vector<1x1x128xf32>
    tpu.vector_store %arg5[%c0_10, %c0_11, %c0_12], %15 {strides = array<i32>} : memref<1x1x128xf32, #tpu.memory_space<vmem>>, vector<1x1x128xf32>,
    %c0_13 = arith.constant 0 : index
    %c0_14 = arith.constant 0 : index
    %c0_15 = arith.constant 0 : index
    %16 = vector.load %arg6[%c0_13, %c0_14, %c0_15] : memref<1x1x128xf32, #tpu.memory_space<vmem>>, vector<1x1x128xf32>
    %17 = vector.shape_cast %16 : vector<1x1x128xf32> to vector<1x128xf32>
    %18 = arith.mulf %5, %5 : vector<16x128xf32>
    %cst_16 = arith.constant dense<0.000000e+00> : vector<128xf32>
    %19 = vector.multi_reduction <add>, %18, %cst_16 [0] : vector<16x128xf32> to vector<128xf32>
    %20 = vector.shape_cast %19 : vector<128xf32> to vector<1x128xf32>
    %21 = arith.addf %17, %20 : vector<1x128xf32>
    %c0_17 = arith.constant 0 : index
    %c0_18 = arith.constant 0 : index
    %c0_19 = arith.constant 0 : index
    %22 = vector.load %arg6[%c0_17, %c0_18, %c0_19] : memref<1x1x128xf32, #tpu.memory_space<vmem>>, vector<1x1x128xf32>
    %23 = vector.shape_cast %22 : vector<1x1x128xf32> to vector<1x128xf32>
    %24 = vector.shape_cast %21 : vector<1x128xf32> to vector<1x1x128xf32>
    tpu.vector_store %arg6[%c0_17, %c0_18, %c0_19], %24 {strides = array<i32>} : memref<1x1x128xf32, #tpu.memory_space<vmem>>, vector<1x1x128xf32>,
    return
  }
  func.func @transform_0(%arg0: i32, %arg1: i32) -> (i32, i32) {
    %c1_i32 = arith.constant 1 : i32
    %0 = arith.muli %arg0, %c1_i32 : i32
    %1 = arith.addi %0, %arg1 : i32
    %c0_i32 = arith.constant 0 : i32
    %c0_i32_0 = arith.constant 0 : i32
    return %1, %c0_i32 : i32, i32
  }
  func.func @transform_1(%arg0: i32, %arg1: i32) -> (i32, i32) {
    %c0_i32 = arith.constant 0 : i32
    %c0_i32_0 = arith.constant 0 : i32
    %c0_i32_1 = arith.constant 0 : i32
    return %c0_i32, %c0_i32_0 : i32, i32
  }
  func.func @transform_2(%arg0: i32, %arg1: i32) -> (i32, i32) {
    %c1_i32 = arith.constant 1 : i32
    %0 = arith.muli %arg0, %c1_i32 : i32
    %1 = arith.addi %0, %arg1 : i32
    %c0_i32 = arith.constant 0 : i32
    %c0_i32_0 = arith.constant 0 : i32
    return %1, %c0_i32 : i32, i32
  }
  func.func @transform_3(%arg0: i32, %arg1: i32) -> (i32, i32, i32) {
    %c0_i32 = arith.constant 0 : i32
    %c0_i32_0 = arith.constant 0 : i32
    %c0_i32_1 = arith.constant 0 : i32
    return %arg0, %c0_i32, %c0_i32_0 : i32, i32, i32
  }
  func.func @transform_4(%arg0: i32, %arg1: i32) -> (i32, i32, i32) {
    %c0_i32 = arith.constant 0 : i32
    %c0_i32_0 = arith.constant 0 : i32
    %c0_i32_1 = arith.constant 0 : i32
    return %arg0, %c0_i32, %c0_i32_0 : i32, i32, i32
  }
}

module attributes {stable_mosaic.version = 11 : i64} {
  func.func @_bn_lrelu_kernel(%arg0: i32, %arg1: memref<16x128xbf16, #tpu.memory_space<vmem>>, %arg2: memref<2x1x128xf32, #tpu.memory_space<vmem>>, %arg3: memref<2x1x128xf32, #tpu.memory_space<vmem>>, %arg4: memref<1x128xf32, #tpu.memory_space<vmem>>, %arg5: memref<1x128xf32, #tpu.memory_space<vmem>>, %arg6: memref<16x128xbf16, #tpu.memory_space<vmem>>) attributes {dimension_semantics = [#tpu.dimension_semantics<parallel>], iteration_bounds = array<i64: 2>, scalar_prefetch = 0 : i64, scratch_operands = 0 : i64, tpu.core_type = #tpu.core_type<tc>, window_params = [{transform_indices = @transform_0, window_bounds = array<i64: 16, 128>}, {pipeline_mode = #tpu.pipeline_mode<synchronous>, transform_indices = @transform_1, window_bounds = array<i64: 2, 1, 128>}, {pipeline_mode = #tpu.pipeline_mode<synchronous>, transform_indices = @transform_2, window_bounds = array<i64: 2, 1, 128>}, {pipeline_mode = #tpu.pipeline_mode<synchronous>, transform_indices = @transform_3, window_bounds = array<i64: 1, 128>}, {pipeline_mode = #tpu.pipeline_mode<synchronous>, transform_indices = @transform_4, window_bounds = array<i64: 1, 128>}, {transform_indices = @transform_5, window_bounds = array<i64: 16, 128>}]} {
    %c0 = arith.constant 0 : index
    %c0_0 = arith.constant 0 : index
    %c0_1 = arith.constant 0 : index
    %0 = vector.load %arg2[%c0, %c0_0, %c0_1] : memref<2x1x128xf32, #tpu.memory_space<vmem>>, vector<2x1x128xf32>
    %cst = arith.constant dense<0.000000e+00> : vector<1x128xf32>
    %1 = vector.multi_reduction <add>, %0, %cst [0] : vector<2x1x128xf32> to vector<1x128xf32>
    %cst_2 = arith.constant 3.125000e-02 : f32
    %2 = vector.broadcast %cst_2 : f32 to vector<1x128xf32>
    %3 = arith.mulf %1, %2 : vector<1x128xf32>
    %c0_3 = arith.constant 0 : index
    %c0_4 = arith.constant 0 : index
    %c0_5 = arith.constant 0 : index
    %4 = vector.load %arg3[%c0_3, %c0_4, %c0_5] : memref<2x1x128xf32, #tpu.memory_space<vmem>>, vector<2x1x128xf32>
    %cst_6 = arith.constant dense<0.000000e+00> : vector<1x128xf32>
    %5 = vector.multi_reduction <add>, %4, %cst_6 [0] : vector<2x1x128xf32> to vector<1x128xf32>
    %cst_7 = arith.constant 3.125000e-02 : f32
    %6 = vector.broadcast %cst_7 : f32 to vector<1x128xf32>
    %7 = arith.mulf %5, %6 : vector<1x128xf32>
    %8 = arith.mulf %3, %3 : vector<1x128xf32>
    %9 = arith.subf %7, %8 : vector<1x128xf32>
    %c0_8 = arith.constant 0 : index
    %c0_9 = arith.constant 0 : index
    %10 = vector.load %arg4[%c0_8, %c0_9] : memref<1x128xf32, #tpu.memory_space<vmem>>, vector<1x128xf32>
    %cst_10 = arith.constant 9.99999974E-6 : f32
    %11 = vector.broadcast %cst_10 : f32 to vector<1x128xf32>
    %12 = arith.addf %9, %11 : vector<1x128xf32>
    %13 = math.rsqrt %12 : vector<1x128xf32>
    %14 = arith.mulf %10, %13 : vector<1x128xf32>
    %c0_11 = arith.constant 0 : index
    %c0_12 = arith.constant 0 : index
    %15 = vector.load %arg5[%c0_11, %c0_12] : memref<1x128xf32, #tpu.memory_space<vmem>>, vector<1x128xf32>
    %16 = arith.mulf %3, %14 : vector<1x128xf32>
    %17 = arith.subf %15, %16 : vector<1x128xf32>
    %c0_13 = arith.constant 0 : index
    %c0_14 = arith.constant 0 : index
    %18 = vector.load %arg1[%c0_13, %c0_14] : memref<16x128xbf16, #tpu.memory_space<vmem>>, vector<16x128xbf16>
    %19 = arith.extf %18 : vector<16x128xbf16> to vector<16x128xf32>
    %20 = vector.broadcast %14 : vector<1x128xf32> to vector<16x128xf32>
    %21 = arith.mulf %19, %20 : vector<16x128xf32>
    %22 = vector.broadcast %17 : vector<1x128xf32> to vector<16x128xf32>
    %23 = arith.addf %21, %22 : vector<16x128xf32>
    %cst_15 = arith.constant 0.000000e+00 : f32
    %24 = vector.broadcast %cst_15 : f32 to vector<16x128xf32>
    %25 = arith.cmpf oge, %23, %24 : vector<16x128xf32>
    %cst_16 = arith.constant 2.000000e-01 : f32
    %26 = vector.broadcast %cst_16 : f32 to vector<16x128xf32>
    %27 = arith.mulf %26, %23 : vector<16x128xf32>
    %28 = arith.select %25, %23, %27 : vector<16x128xi1>, vector<16x128xf32>
    %29 = arith.truncf %28 : vector<16x128xf32> to vector<16x128xbf16>
    %c0_17 = arith.constant 0 : index
    %c0_18 = arith.constant 0 : index
    %30 = vector.load %arg6[%c0_17, %c0_18] : memref<16x128xbf16, #tpu.memory_space<vmem>>, vector<16x128xbf16>
    tpu.vector_store %arg6[%c0_17, %c0_18], %29 {strides = array<i32>} : memref<16x128xbf16, #tpu.memory_space<vmem>>, vector<16x128xbf16>,
    return
  }
  func.func @transform_0(%arg0: i32) -> (i32, i32) {
    %c0_i32 = arith.constant 0 : i32
    %c0_i32_0 = arith.constant 0 : i32
    return %arg0, %c0_i32 : i32, i32
  }
  func.func @transform_1(%arg0: i32) -> (i32, i32, i32) {
    %c0_i32 = arith.constant 0 : i32
    %c0_i32_0 = arith.constant 0 : i32
    %c0_i32_1 = arith.constant 0 : i32
    %c0_i32_2 = arith.constant 0 : i32
    return %c0_i32, %c0_i32_0, %c0_i32_1 : i32, i32, i32
  }
  func.func @transform_2(%arg0: i32) -> (i32, i32, i32) {
    %c0_i32 = arith.constant 0 : i32
    %c0_i32_0 = arith.constant 0 : i32
    %c0_i32_1 = arith.constant 0 : i32
    %c0_i32_2 = arith.constant 0 : i32
    return %c0_i32, %c0_i32_0, %c0_i32_1 : i32, i32, i32
  }
  func.func @transform_3(%arg0: i32) -> (i32, i32) {
    %c0_i32 = arith.constant 0 : i32
    %c0_i32_0 = arith.constant 0 : i32
    %c0_i32_1 = arith.constant 0 : i32
    return %c0_i32, %c0_i32_0 : i32, i32
  }
  func.func @transform_4(%arg0: i32) -> (i32, i32) {
    %c0_i32 = arith.constant 0 : i32
    %c0_i32_0 = arith.constant 0 : i32
    %c0_i32_1 = arith.constant 0 : i32
    return %c0_i32, %c0_i32_0 : i32, i32
  }
  func.func @transform_5(%arg0: i32) -> (i32, i32) {
    %c0_i32 = arith.constant 0 : i32
    %c0_i32_0 = arith.constant 0 : i32
    return %arg0, %c0_i32 : i32, i32
  }
}

module attributes {stable_mosaic.version = 11 : i64} {
  func.func @_bn_lrelu_kernel(%arg0: i32, %arg1: memref<16x128xbf16, #tpu.memory_space<vmem>>, %arg2: memref<2x1x128xf32, #tpu.memory_space<vmem>>, %arg3: memref<2x1x128xf32, #tpu.memory_space<vmem>>, %arg4: memref<1x128xf32, #tpu.memory_space<vmem>>, %arg5: memref<1x128xf32, #tpu.memory_space<vmem>>, %arg6: memref<16x128xbf16, #tpu.memory_space<vmem>>) attributes {dimension_semantics = [#tpu.dimension_semantics<parallel>], iteration_bounds = array<i64: 2>, scalar_prefetch = 0 : i64, scratch_operands = 0 : i64, tpu.core_type = #tpu.core_type<tc>, window_params = [{transform_indices = @transform_0, window_bounds = array<i64: 16, 128>}, {pipeline_mode = #tpu.pipeline_mode<synchronous>, transform_indices = @transform_1, window_bounds = array<i64: 2, 1, 128>}, {pipeline_mode = #tpu.pipeline_mode<synchronous>, transform_indices = @transform_2, window_bounds = array<i64: 2, 1, 128>}, {pipeline_mode = #tpu.pipeline_mode<synchronous>, transform_indices = @transform_3, window_bounds = array<i64: 1, 128>}, {pipeline_mode = #tpu.pipeline_mode<synchronous>, transform_indices = @transform_4, window_bounds = array<i64: 1, 128>}, {transform_indices = @transform_5, window_bounds = array<i64: 16, 128>}]} {
    %c0 = arith.constant 0 : index
    %c0_0 = arith.constant 0 : index
    %c0_1 = arith.constant 0 : index
    %0 = vector.load %arg2[%c0, %c0_0, %c0_1] : memref<2x1x128xf32, #tpu.memory_space<vmem>>, vector<2x1x128xf32>
    %cst = arith.constant dense<0.000000e+00> : vector<1x128xf32>
    %1 = vector.multi_reduction <add>, %0, %cst [0] : vector<2x1x128xf32> to vector<1x128xf32>
    %cst_2 = arith.constant 1.250000e-01 : f32
    %2 = vector.broadcast %cst_2 : f32 to vector<1x128xf32>
    %3 = arith.mulf %1, %2 : vector<1x128xf32>
    %c0_3 = arith.constant 0 : index
    %c0_4 = arith.constant 0 : index
    %c0_5 = arith.constant 0 : index
    %4 = vector.load %arg3[%c0_3, %c0_4, %c0_5] : memref<2x1x128xf32, #tpu.memory_space<vmem>>, vector<2x1x128xf32>
    %cst_6 = arith.constant dense<0.000000e+00> : vector<1x128xf32>
    %5 = vector.multi_reduction <add>, %4, %cst_6 [0] : vector<2x1x128xf32> to vector<1x128xf32>
    %cst_7 = arith.constant 1.250000e-01 : f32
    %6 = vector.broadcast %cst_7 : f32 to vector<1x128xf32>
    %7 = arith.mulf %5, %6 : vector<1x128xf32>
    %8 = arith.mulf %3, %3 : vector<1x128xf32>
    %9 = arith.subf %7, %8 : vector<1x128xf32>
    %c0_8 = arith.constant 0 : index
    %c0_9 = arith.constant 0 : index
    %10 = vector.load %arg4[%c0_8, %c0_9] : memref<1x128xf32, #tpu.memory_space<vmem>>, vector<1x128xf32>
    %cst_10 = arith.constant 9.99999974E-6 : f32
    %11 = vector.broadcast %cst_10 : f32 to vector<1x128xf32>
    %12 = arith.addf %9, %11 : vector<1x128xf32>
    %13 = math.rsqrt %12 : vector<1x128xf32>
    %14 = arith.mulf %10, %13 : vector<1x128xf32>
    %c0_11 = arith.constant 0 : index
    %c0_12 = arith.constant 0 : index
    %15 = vector.load %arg5[%c0_11, %c0_12] : memref<1x128xf32, #tpu.memory_space<vmem>>, vector<1x128xf32>
    %16 = arith.mulf %3, %14 : vector<1x128xf32>
    %17 = arith.subf %15, %16 : vector<1x128xf32>
    %c0_13 = arith.constant 0 : index
    %c0_14 = arith.constant 0 : index
    %18 = vector.load %arg1[%c0_13, %c0_14] : memref<16x128xbf16, #tpu.memory_space<vmem>>, vector<16x128xbf16>
    %19 = arith.extf %18 : vector<16x128xbf16> to vector<16x128xf32>
    %20 = vector.broadcast %14 : vector<1x128xf32> to vector<16x128xf32>
    %21 = arith.mulf %19, %20 : vector<16x128xf32>
    %22 = vector.broadcast %17 : vector<1x128xf32> to vector<16x128xf32>
    %23 = arith.addf %21, %22 : vector<16x128xf32>
    %cst_15 = arith.constant 0.000000e+00 : f32
    %24 = vector.broadcast %cst_15 : f32 to vector<16x128xf32>
    %25 = arith.cmpf oge, %23, %24 : vector<16x128xf32>
    %cst_16 = arith.constant 2.000000e-01 : f32
    %26 = vector.broadcast %cst_16 : f32 to vector<16x128xf32>
    %27 = arith.mulf %26, %23 : vector<16x128xf32>
    %28 = arith.select %25, %23, %27 : vector<16x128xi1>, vector<16x128xf32>
    %29 = arith.truncf %28 : vector<16x128xf32> to vector<16x128xbf16>
    %c0_17 = arith.constant 0 : index
    %c0_18 = arith.constant 0 : index
    %30 = vector.load %arg6[%c0_17, %c0_18] : memref<16x128xbf16, #tpu.memory_space<vmem>>, vector<16x128xbf16>
    tpu.vector_store %arg6[%c0_17, %c0_18], %29 {strides = array<i32>} : memref<16x128xbf16, #tpu.memory_space<vmem>>, vector<16x128xbf16>,
    return
  }
  func.func @transform_0(%arg0: i32) -> (i32, i32) {
    %c0_i32 = arith.constant 0 : i32
    %c0_i32_0 = arith.constant 0 : i32
    return %arg0, %c0_i32 : i32, i32
  }
  func.func @transform_1(%arg0: i32) -> (i32, i32, i32) {
    %c0_i32 = arith.constant 0 : i32
    %c0_i32_0 = arith.constant 0 : i32
    %c0_i32_1 = arith.constant 0 : i32
    %c0_i32_2 = arith.constant 0 : i32
    return %c0_i32, %c0_i32_0, %c0_i32_1 : i32, i32, i32
  }
  func.func @transform_2(%arg0: i32) -> (i32, i32, i32) {
    %c0_i32 = arith.constant 0 : i32
    %c0_i32_0 = arith.constant 0 : i32
    %c0_i32_1 = arith.constant 0 : i32
    %c0_i32_2 = arith.constant 0 : i32
    return %c0_i32, %c0_i32_0, %c0_i32_1 : i32, i32, i32
  }
  func.func @transform_3(%arg0: i32) -> (i32, i32) {
    %c0_i32 = arith.constant 0 : i32
    %c0_i32_0 = arith.constant 0 : i32
    %c0_i32_1 = arith.constant 0 : i32
    return %c0_i32, %c0_i32_0 : i32, i32
  }
  func.func @transform_4(%arg0: i32) -> (i32, i32) {
    %c0_i32 = arith.constant 0 : i32
    %c0_i32_0 = arith.constant 0 : i32
    %c0_i32_1 = arith.constant 0 : i32
    return %c0_i32, %c0_i32_0 : i32, i32
  }
  func.func @transform_5(%arg0: i32) -> (i32, i32) {
    %c0_i32 = arith.constant 0 : i32
    %c0_i32_0 = arith.constant 0 : i32
    return %arg0, %c0_i32 : i32, i32
  }
}

module attributes {stable_mosaic.version = 11 : i64} {
  func.func @_conv_mm_stats_kernel(%arg0: i32, %arg1: i32, %arg2: memref<16x512xbf16, #tpu.memory_space<vmem>>, %arg3: memref<512x128xbf16, #tpu.memory_space<vmem>>, %arg4: memref<16x128xbf16, #tpu.memory_space<vmem>>, %arg5: memref<1x1x128xf32, #tpu.memory_space<vmem>>, %arg6: memref<1x1x128xf32, #tpu.memory_space<vmem>>) attributes {dimension_semantics = [#tpu.dimension_semantics<parallel>, #tpu.dimension_semantics<arbitrary>], iteration_bounds = array<i64: 2, 1>, scalar_prefetch = 0 : i64, scratch_operands = 0 : i64, tpu.core_type = #tpu.core_type<tc>, window_params = [{transform_indices = @transform_0, window_bounds = array<i64: 16, 512>}, {pipeline_mode = #tpu.pipeline_mode<synchronous>, transform_indices = @transform_1, window_bounds = array<i64: 512, 128>}, {transform_indices = @transform_2, window_bounds = array<i64: 16, 128>}, {transform_indices = @transform_3, window_bounds = array<i64: 1, 1, 128>}, {transform_indices = @transform_4, window_bounds = array<i64: 1, 1, 128>}]} {
    %c0_i32 = arith.constant 0 : i32
    %0 = arith.cmpi eq, %arg1, %c0_i32 : i32
    %1 = arith.extui %0 : i1 to i32
    %c0_i32_0 = arith.constant 0 : i32
    %2 = arith.cmpi ne, %1, %c0_i32_0 : i32
    scf.if %2 {
      %cst_20 = arith.constant 0.000000e+00 : f32
      %25 = vector.broadcast %cst_20 : f32 to vector<1x128xf32>
      %c0_21 = arith.constant 0 : index
      %c0_22 = arith.constant 0 : index
      %c0_23 = arith.constant 0 : index
      %26 = vector.load %arg5[%c0_21, %c0_22, %c0_23] : memref<1x1x128xf32, #tpu.memory_space<vmem>>, vector<1x1x128xf32>
      %27 = vector.shape_cast %26 : vector<1x1x128xf32> to vector<1x128xf32>
      %28 = vector.shape_cast %25 : vector<1x128xf32> to vector<1x1x128xf32>
      tpu.vector_store %arg5[%c0_21, %c0_22, %c0_23], %28 {strides = array<i32>} : memref<1x1x128xf32, #tpu.memory_space<vmem>>, vector<1x1x128xf32>,
      %cst_24 = arith.constant 0.000000e+00 : f32
      %29 = vector.broadcast %cst_24 : f32 to vector<1x128xf32>
      %c0_25 = arith.constant 0 : index
      %c0_26 = arith.constant 0 : index
      %c0_27 = arith.constant 0 : index
      %30 = vector.load %arg6[%c0_25, %c0_26, %c0_27] : memref<1x1x128xf32, #tpu.memory_space<vmem>>, vector<1x1x128xf32>
      %31 = vector.shape_cast %30 : vector<1x1x128xf32> to vector<1x128xf32>
      %32 = vector.shape_cast %29 : vector<1x128xf32> to vector<1x1x128xf32>
      tpu.vector_store %arg6[%c0_25, %c0_26, %c0_27], %32 {strides = array<i32>} : memref<1x1x128xf32, #tpu.memory_space<vmem>>, vector<1x1x128xf32>,
    } else {
    }
    %c0 = arith.constant 0 : index
    %c0_1 = arith.constant 0 : index
    %3 = vector.load %arg2[%c0, %c0_1] : memref<16x512xbf16, #tpu.memory_space<vmem>>, vector<16x512xbf16>
    %c0_2 = arith.constant 0 : index
    %c0_3 = arith.constant 0 : index
    %4 = vector.load %arg3[%c0_2, %c0_3] : memref<512x128xbf16, #tpu.memory_space<vmem>>, vector<512x128xbf16>
    %cst = arith.constant dense<0.000000e+00> : vector<16x128xf32>
    %5 = tpu.matmul %3, %4, %cst {dimension_numbers = #tpu.dot_dimension_numbers<[1], [0], [0], [1], [0, 0, 1, 1], [], []>} : vector<16x512xbf16>, vector<512x128xbf16>, vector<16x128xf32> -> vector<16x128xf32>
    %6 = arith.truncf %5 : vector<16x128xf32> to vector<16x128xbf16>
    %c0_4 = arith.constant 0 : index
    %c0_5 = arith.constant 0 : index
    %7 = vector.load %arg4[%c0_4, %c0_5] : memref<16x128xbf16, #tpu.memory_space<vmem>>, vector<16x128xbf16>
    tpu.vector_store %arg4[%c0_4, %c0_5], %6 {strides = array<i32>} : memref<16x128xbf16, #tpu.memory_space<vmem>>, vector<16x128xbf16>,
    %c0_6 = arith.constant 0 : index
    %c0_7 = arith.constant 0 : index
    %c0_8 = arith.constant 0 : index
    %8 = vector.load %arg5[%c0_6, %c0_7, %c0_8] : memref<1x1x128xf32, #tpu.memory_space<vmem>>, vector<1x1x128xf32>
    %9 = vector.shape_cast %8 : vector<1x1x128xf32> to vector<1x128xf32>
    %cst_9 = arith.constant dense<0.000000e+00> : vector<128xf32>
    %10 = vector.multi_reduction <add>, %5, %cst_9 [0] : vector<16x128xf32> to vector<128xf32>
    %11 = vector.shape_cast %10 : vector<128xf32> to vector<1x128xf32>
    %12 = arith.addf %9, %11 : vector<1x128xf32>
    %c0_10 = arith.constant 0 : index
    %c0_11 = arith.constant 0 : index
    %c0_12 = arith.constant 0 : index
    %13 = vector.load %arg5[%c0_10, %c0_11, %c0_12] : memref<1x1x128xf32, #tpu.memory_space<vmem>>, vector<1x1x128xf32>
    %14 = vector.shape_cast %13 : vector<1x1x128xf32> to vector<1x128xf32>
    %15 = vector.shape_cast %12 : vector<1x128xf32> to vector<1x1x128xf32>
    tpu.vector_store %arg5[%c0_10, %c0_11, %c0_12], %15 {strides = array<i32>} : memref<1x1x128xf32, #tpu.memory_space<vmem>>, vector<1x1x128xf32>,
    %c0_13 = arith.constant 0 : index
    %c0_14 = arith.constant 0 : index
    %c0_15 = arith.constant 0 : index
    %16 = vector.load %arg6[%c0_13, %c0_14, %c0_15] : memref<1x1x128xf32, #tpu.memory_space<vmem>>, vector<1x1x128xf32>
    %17 = vector.shape_cast %16 : vector<1x1x128xf32> to vector<1x128xf32>
    %18 = arith.mulf %5, %5 : vector<16x128xf32>
    %cst_16 = arith.constant dense<0.000000e+00> : vector<128xf32>
    %19 = vector.multi_reduction <add>, %18, %cst_16 [0] : vector<16x128xf32> to vector<128xf32>
    %20 = vector.shape_cast %19 : vector<128xf32> to vector<1x128xf32>
    %21 = arith.addf %17, %20 : vector<1x128xf32>
    %c0_17 = arith.constant 0 : index
    %c0_18 = arith.constant 0 : index
    %c0_19 = arith.constant 0 : index
    %22 = vector.load %arg6[%c0_17, %c0_18, %c0_19] : memref<1x1x128xf32, #tpu.memory_space<vmem>>, vector<1x1x128xf32>
    %23 = vector.shape_cast %22 : vector<1x1x128xf32> to vector<1x128xf32>
    %24 = vector.shape_cast %21 : vector<1x128xf32> to vector<1x1x128xf32>
    tpu.vector_store %arg6[%c0_17, %c0_18, %c0_19], %24 {strides = array<i32>} : memref<1x1x128xf32, #tpu.memory_space<vmem>>, vector<1x1x128xf32>,
    return
  }
  func.func @transform_0(%arg0: i32, %arg1: i32) -> (i32, i32) {
    %c1_i32 = arith.constant 1 : i32
    %0 = arith.muli %arg0, %c1_i32 : i32
    %1 = arith.addi %0, %arg1 : i32
    %c0_i32 = arith.constant 0 : i32
    %c0_i32_0 = arith.constant 0 : i32
    return %1, %c0_i32 : i32, i32
  }
  func.func @transform_1(%arg0: i32, %arg1: i32) -> (i32, i32) {
    %c0_i32 = arith.constant 0 : i32
    %c0_i32_0 = arith.constant 0 : i32
    %c0_i32_1 = arith.constant 0 : i32
    return %c0_i32, %c0_i32_0 : i32, i32
  }
  func.func @transform_2(%arg0: i32, %arg1: i32) -> (i32, i32) {
    %c1_i32 = arith.constant 1 : i32
    %0 = arith.muli %arg0, %c1_i32 : i32
    %1 = arith.addi %0, %arg1 : i32
    %c0_i32 = arith.constant 0 : i32
    %c0_i32_0 = arith.constant 0 : i32
    return %1, %c0_i32 : i32, i32
  }
  func.func @transform_3(%arg0: i32, %arg1: i32) -> (i32, i32, i32) {
    %c0_i32 = arith.constant 0 : i32
    %c0_i32_0 = arith.constant 0 : i32
    %c0_i32_1 = arith.constant 0 : i32
    return %arg0, %c0_i32, %c0_i32_0 : i32, i32, i32
  }
  func.func @transform_4(%arg0: i32, %arg1: i32) -> (i32, i32, i32) {
    %c0_i32 = arith.constant 0 : i32
    %c0_i32_0 = arith.constant 0 : i32
    %c0_i32_1 = arith.constant 0 : i32
    return %arg0, %c0_i32, %c0_i32_0 : i32, i32, i32
  }
}

module attributes {stable_mosaic.version = 11 : i64} {
  func.func @_heads_sampler_kernel(%arg0: i32, %arg1: memref<2x256xbf16, #tpu.memory_space<vmem>>, %arg2: memref<256x256xbf16, #tpu.memory_space<vmem>>, %arg3: memref<1x256xf32, #tpu.memory_space<vmem>>, %arg4: memref<2x128xf32, #tpu.memory_space<vmem>>, %arg5: memref<2x256xf32, #tpu.memory_space<vmem>>, %arg6: memref<2x128xf32, #tpu.memory_space<vmem>>, %arg7: memref<2x256xf32, #tpu.memory_space<vmem>>) attributes {dimension_semantics = [#tpu.dimension_semantics<arbitrary>], iteration_bounds = array<i64: 1>, scalar_prefetch = 0 : i64, scratch_operands = 1 : i64, tpu.core_type = #tpu.core_type<tc>, window_params = [{transform_indices = @transform_0, window_bounds = array<i64: 2, 256>}, {transform_indices = @transform_1, window_bounds = array<i64: 256, 256>}, {pipeline_mode = #tpu.pipeline_mode<synchronous>, transform_indices = @transform_2, window_bounds = array<i64: 1, 256>}, {pipeline_mode = #tpu.pipeline_mode<synchronous>, transform_indices = @transform_3, window_bounds = array<i64: 2, 128>}, {pipeline_mode = #tpu.pipeline_mode<synchronous>, transform_indices = @transform_4, window_bounds = array<i64: 2, 256>}, {pipeline_mode = #tpu.pipeline_mode<synchronous>, transform_indices = @transform_5, window_bounds = array<i64: 2, 128>}]} {
    %c0_i32 = arith.constant 0 : i32
    %0 = arith.cmpi eq, %arg0, %c0_i32 : i32
    %1 = arith.extui %0 : i1 to i32
    %c0_i32_0 = arith.constant 0 : i32
    %2 = arith.cmpi ne, %1, %c0_i32_0 : i32
    scf.if %2 {
      %cst_10 = arith.constant 0.000000e+00 : f32
      %12 = vector.broadcast %cst_10 : f32 to vector<2x256xf32>
      %c0_11 = arith.constant 0 : index
      %c0_12 = arith.constant 0 : index
      %13 = vector.load %arg7[%c0_11, %c0_12] : memref<2x256xf32, #tpu.memory_space<vmem>>, vector<2x256xf32>
      tpu.vector_store %arg7[%c0_11, %c0_12], %12 {strides = array<i32>} : memref<2x256xf32, #tpu.memory_space<vmem>>, vector<2x256xf32>,
    } else {
    }
    %c0 = arith.constant 0 : index
    %c0_1 = arith.constant 0 : index
    %3 = vector.load %arg7[%c0, %c0_1] : memref<2x256xf32, #tpu.memory_space<vmem>>, vector<2x256xf32>
    %c0_2 = arith.constant 0 : index
    %c0_3 = arith.constant 0 : index
    %4 = vector.load %arg1[%c0_2, %c0_3] : memref<2x256xbf16, #tpu.memory_space<vmem>>, vector<2x256xbf16>
    %c0_4 = arith.constant 0 : index
    %c0_5 = arith.constant 0 : index
    %5 = vector.load %arg2[%c0_4, %c0_5] : memref<256x256xbf16, #tpu.memory_space<vmem>>, vector<256x256xbf16>
    %cst = arith.constant dense<0.000000e+00> : vector<2x256xf32>
    %6 = tpu.matmul %4, %5, %cst {dimension_numbers = #tpu.dot_dimension_numbers<[1], [0], [0], [1], [0, 0, 1, 1], [], []>} : vector<2x256xbf16>, vector<256x256xbf16>, vector<2x256xf32> -> vector<2x256xf32>
    %7 = arith.addf %3, %6 : vector<2x256xf32>
    %c0_6 = arith.constant 0 : index
    %c0_7 = arith.constant 0 : index
    %8 = vector.load %arg7[%c0_6, %c0_7] : memref<2x256xf32, #tpu.memory_space<vmem>>, vector<2x256xf32>
    tpu.vector_store %arg7[%c0_6, %c0_7], %7 {strides = array<i32>} : memref<2x256xf32, #tpu.memory_space<vmem>>, vector<2x256xf32>,
    %c0_i32_8 = arith.constant 0 : i32
    %9 = arith.cmpi eq, %arg0, %c0_i32_8 : i32
    %10 = arith.extui %9 : i1 to i32
    %c0_i32_9 = arith.constant 0 : i32
    %11 = arith.cmpi ne, %10, %c0_i32_9 : i32
    scf.if %11 {
      %c0_10 = arith.constant 0 : index
      %c0_11 = arith.constant 0 : index
      %12 = vector.load %arg7[%c0_10, %c0_11] : memref<2x256xf32, #tpu.memory_space<vmem>>, vector<2x256xf32>
      %c0_12 = arith.constant 0 : index
      %c0_13 = arith.constant 0 : index
      %13 = vector.load %arg3[%c0_12, %c0_13] : memref<1x256xf32, #tpu.memory_space<vmem>>, vector<1x256xf32>
      %14 = vector.broadcast %13 : vector<1x256xf32> to vector<2x256xf32>
      %15 = arith.addf %12, %14 : vector<2x256xf32>
      %c0_14 = arith.constant 0 : index
      %c0_15 = arith.constant 0 : index
      %16 = vector.load %arg5[%c0_14, %c0_15] : memref<2x256xf32, #tpu.memory_space<vmem>>, vector<2x256xf32>
      tpu.vector_store %arg5[%c0_14, %c0_15], %15 {strides = array<i32>} : memref<2x256xf32, #tpu.memory_space<vmem>>, vector<2x256xf32>,
      %c0_16 = arith.constant 0 : index
      %c0_17 = arith.constant 0 : index
      %17 = vector.load %arg4[%c0_16, %c0_17] : memref<2x128xf32, #tpu.memory_space<vmem>>, vector<2x128xf32>
      %18 = vector.extract_strided_slice %15 {offsets = [0, 128], sizes = [2, 128], strides = [1, 1]} : vector<2x256xf32> to vector<2x128xf32>
      %cst_18 = arith.constant 5.000000e-01 : f32
      %19 = vector.broadcast %cst_18 : f32 to vector<2x128xf32>
      %20 = arith.mulf %19, %18 : vector<2x128xf32>
      %21 = math.exp %20 : vector<2x128xf32>
      %22 = arith.mulf %17, %21 : vector<2x128xf32>
      %23 = vector.extract_strided_slice %15 {offsets = [0, 0], sizes = [2, 128], strides = [1, 1]} : vector<2x256xf32> to vector<2x128xf32>
      %24 = arith.addf %22, %23 : vector<2x128xf32>
      %c0_19 = arith.constant 0 : index
      %c0_20 = arith.constant 0 : index
      %25 = vector.load %arg6[%c0_19, %c0_20] : memref<2x128xf32, #tpu.memory_space<vmem>>, vector<2x128xf32>
      tpu.vector_store %arg6[%c0_19, %c0_20], %24 {strides = array<i32>} : memref<2x128xf32, #tpu.memory_space<vmem>>, vector<2x128xf32>,
    } else {
    }
    return
  }
  func.func @transform_0(%arg0: i32) -> (i32, i32) {
    %c0_i32 = arith.constant 0 : i32
    %c0_i32_0 = arith.constant 0 : i32
    return %c0_i32, %arg0 : i32, i32
  }
  func.func @transform_1(%arg0: i32) -> (i32, i32) {
    %c0_i32 = arith.constant 0 : i32
    %c0_i32_0 = arith.constant 0 : i32
    return %arg0, %c0_i32 : i32, i32
  }
  func.func @transform_2(%arg0: i32) -> (i32, i32) {
    %c0_i32 = arith.constant 0 : i32
    %c0_i32_0 = arith.constant 0 : i32
    %c0_i32_1 = arith.constant 0 : i32
    return %c0_i32, %c0_i32_0 : i32, i32
  }
  func.func @transform_3(%arg0: i32) -> (i32, i32) {
    %c0_i32 = arith.constant 0 : i32
    %c0_i32_0 = arith.constant 0 : i32
    %c0_i32_1 = arith.constant 0 : i32
    return %c0_i32, %c0_i32_0 : i32, i32
  }
  func.func @transform_4(%arg0: i32) -> (i32, i32) {
    %c0_i32 = arith.constant 0 : i32
    %c0_i32_0 = arith.constant 0 : i32
    %c0_i32_1 = arith.constant 0 : i32
    return %c0_i32, %c0_i32_0 : i32, i32
  }
  func.func @transform_5(%arg0: i32) -> (i32, i32) {
    %c0_i32 = arith.constant 0 : i32
    %c0_i32_0 = arith.constant 0 : i32
    %c0_i32_1 = arith.constant 0 : i32
    return %c0_i32, %c0_i32_0 : i32, i32
  }
}

</mosaic_0001>

<bundles_post_ra>
// kernel: encoder_forward.9
= control target key start
LH: loop header
LB: loop body
LE: loop exit
PB: predicated region body
PF: predicated region fallthrough
CT: control target
= control target key end

     0   :  { %s1148_s15 = smov 0   ;;  %s1150_s16 = smov 0   ;;  %s1395_s0 = inlined_call_operand.vmem [shape: bf16[512,128], index: 0, kind: input, shape index: {}]   ;;  %s1396_s1 = inlined_call_operand.vmem [shape: bf16[128,128], index: 1, kind: input, shape index: {}]   ;;  %s1397_s2 = inlined_call_operand.vmem [shape: bf16[512,128], index: 2, kind: output, shape index: {0}]   ;;  %s1398_s3 = inlined_call_operand.vmem [shape: f32[2,1,128], index: 3, kind: output, shape index: {1}]   ;;  %s1399_s4 = inlined_call_operand.vmem [shape: f32[2,1,128], index: 4, kind: output, shape index: {2}]  }
   0x1   :  { %s1152_s17 = smov 0  }
   0x2 LB: > { %s27_s18 = sadd.s32 1, %s1116_s16  ;;  %p827_p0 = scmp.ge.s32.totalorder %s1120_s17, 1  ;;  %s1120_s17 = sphi %s1152_s17, %s15_s17   ;;  %s1116_s16 = sphi %s1150_s16, %s1401_s16   ;;  %s1112_s15 = sphi %s1148_s15, %s1400_s15  }
   0x3   : > { %p29_p1 = scmp.ge.s32.totalorder %s27_s18, 2  ;;  %p186_p2 = scmp.lt.s32.totalorder %s1120_s17, 3 }
   0x5   : > { %s1403_s18 = smov (%p29_p1, %s27_s18), 0  ;;  %p187_p3 = pnand %p827_p0, %p186_p2 }
   0x6   : > { %s828_s27 = sshll.u32 (!%p187_p3), %s1112_s15, 5  ;;  %p236_p5 = scmp.lt.s32.totalorder (!%p187_p3), %s1112_s15, 1 }
   0x7   : > { %190 = sbr.rel (%p187_p3) target bundleno = 293 (0x125), region = 28  ;;  %p222_p4 = scmp.lt.s32.totalorder (!%p187_p3), %s828_s27, 63 }
   0xc   : > { %v953_v0 = vld [vmem:[%s1396_s1 + $0x38] sm:$0xff]  ;;  %v952_v1 = vld [vmem:[%s1396_s1 + $0x30] sm:$0xff]  ;;  %v951_v2 = vld [vmem:[%s1396_s1 + $0x28] sm:$0xff]  ;;  %s1405_s27 = smov (!%p222_p4, %s828_s27), 63  ;;  %s1407_s15 = smov (!%p236_p5, %s1112_s15), 1 }
   0xd   : > { %440 = vmatpush.bf16.msra.mxu0 %v953_v0  ;;  %1049 = vmatpush.bf16.msra.mxu1 %v953_v0  ;;  %v950_v3 = vld [vmem:[%s1396_s1 + $0x20] sm:$0xff]  ;;  %v949_v4 = vld [vmem:[%s1396_s1 + $0x18] sm:$0xff]  ;;  %v948_v5 = vld [vmem:[%s1396_s1 + $0x10] sm:$0xff]  ;;  %s829_s8 = sshll.u32 %s1405_s27, 2  ;;  %s1328_s23 = scalar_lea.vmem %s1398_s3, %s1407_s15 }
   0xe   : > { %1050 = vmatpush.bf16.msra.mxu2 %v953_v0  ;;  %1051 = vmatpush.bf16.msra.mxu3 %v953_v0  ;;  %v947_v6 = vld [vmem:[%s1396_s1 + $0x8] sm:$0xff]  ;;  %v946_v7 = vld [vmem:[%s1396_s1] sm:$0xff]  ;;  %s1201_s13 = scalar_lea.vmem %s1395_s0, %s829_s8  ;;  %s1228_s20 = scalar_lea.vmem %s1397_s2, %s829_s8 }
   0xf   : > { %v930_v8 = vld [vmem:[%s1201_s13] sm:$0xff]  ;;  %v931_v12 = vld [vmem:[%s1201_s13 + $0x8] sm:$0xff]  ;;  %v932_v16 = vld [vmem:[%s1201_s13 + $0x10] sm:$0xff]  ;;  %s1333_s26 = scalar_lea.vmem %s1399_s4, %s1407_s15 }
  0x10   : > { %v934_v9 = vld [vmem:[%s1201_s13 + $0x20] sm:$0xff]  ;;  %v935_v13 = vld [vmem:[%s1201_s13 + $0x28] sm:$0xff]  ;;  %v936_v17 = vld [vmem:[%s1201_s13 + $0x30] sm:$0xff] }
  0x11   : > { %441 = vmatpush.bf16.msra.mxu0 %v952_v1  ;;  %1052 = vmatpush.bf16.msra.mxu1 %v952_v1  ;;  %v938_v10 = vld [vmem:[%s1201_s13 + $0x40] sm:$0xff]  ;;  %v939_v14 = vld [vmem:[%s1201_s13 + $0x48] sm:$0xff]  ;;  %v940_v18 = vld [vmem:[%s1201_s13 + $0x50] sm:$0xff] }
  0x12   : > { %1053 = vmatpush.bf16.msra.mxu2 %v952_v1  ;;  %1054 = vmatpush.bf16.msra.mxu3 %v952_v1  ;;  %v942_v11 = vld [vmem:[%s1201_s13 + $0x60] sm:$0xff]  ;;  %v943_v15 = vld [vmem:[%s1201_s13 + $0x68] sm:$0xff]  ;;  %v944_v19 = vld [vmem:[%s1201_s13 + $0x70] sm:$0xff] }
  0x13   : > { %v933_v20 = vld [vmem:[%s1201_s13 + $0x18] sm:$0xff] }
  0x14   : > { %v937_v21 = vld [vmem:[%s1201_s13 + $0x38] sm:$0xff] }
  0x15   : > { %442 = vmatpush.bf16.msra.mxu0 %v951_v2  ;;  %1055 = vmatpush.bf16.msra.mxu1 %v951_v2  ;;  %v941_v22 = vld [vmem:[%s1201_s13 + $0x58] sm:$0xff] }
  0x16   : > { %1056 = vmatpush.bf16.msra.mxu2 %v951_v2  ;;  %1057 = vmatpush.bf16.msra.mxu3 %v951_v2  ;;  %v945_v23 = vld [vmem:[%s1201_s13 + $0x78] sm:$0xff] }
  0x19   : > { %443 = vmatpush.bf16.msra.mxu0 %v950_v3  ;;  %1058 = vmatpush.bf16.msra.mxu1 %v950_v3 }
  0x1a   : > { %1059 = vmatpush.bf16.msra.mxu2 %v950_v3  ;;  %1060 = vmatpush.bf16.msra.mxu3 %v950_v3 }
  0x1d   : > { %444 = vmatpush.bf16.msra.mxu0 %v949_v4  ;;  %1061 = vmatpush.bf16.msra.mxu1 %v949_v4 }
  0x1e   : > { %1062 = vmatpush.bf16.msra.mxu2 %v949_v4  ;;  %1063 = vmatpush.bf16.msra.mxu3 %v949_v4 }
  0x21   : > { %445 = vmatpush.bf16.msra.mxu0 %v948_v5  ;;  %1064 = vmatpush.bf16.msra.mxu1 %v948_v5 }
  0x22   : > { %1065 = vmatpush.bf16.msra.mxu2 %v948_v5  ;;  %1066 = vmatpush.bf16.msra.mxu3 %v948_v5 }
  0x25   : > { %446 = vmatpush.bf16.msra.mxu0 %v947_v6  ;;  %1067 = vmatpush.bf16.msra.mxu1 %v947_v6 }
  0x26   : > { %1068 = vmatpush.bf16.msra.mxu2 %v947_v6  ;;  %1069 = vmatpush.bf16.msra.mxu3 %v947_v6 }
  0x29   : > { %447 = vmatpush.bf16.msra.mxu0 %v946_v7  ;;  %1070 = vmatpush.bf16.msra.mxu1 %v946_v7 }
  0x2a   : > { %1071 = vmatpush.bf16.msra.mxu2 %v946_v7  ;;  %1072 = vmatpush.bf16.msra.mxu3 %v946_v7 }
  0x2c   : > { %448 = vmatmul.bf16.vlgmr.msra.gmra.mxu0 %v930_v8  ;;  %468 = vmatmul.bf16.vlgmr.msra.gmra.mxu1 %v934_v9 }
  0x2d   : > { %488 = vmatmul.bf16.vlgmr.msra.gmra.mxu2 %v938_v10  ;;  %508 = vmatmul.bf16.vlgmr.msra.gmra.mxu3 %v942_v11 }
  0x3c   : > { %453 = vmatmul.bf16.gmra.mxu0 %v931_v12  ;;  %473 = vmatmul.bf16.gmra.mxu1 %v935_v13 }
  0x3d   : > { %493 = vmatmul.bf16.gmra.mxu2 %v939_v14  ;;  %513 = vmatmul.bf16.gmra.mxu3 %v943_v15 }
  0x4c   : > { %458 = vmatmul.bf16.gmra.mxu0 %v932_v16  ;;  %478 = vmatmul.bf16.gmra.mxu1 %v936_v17 }
  0x4d   : > { %498 = vmatmul.bf16.gmra.mxu2 %v940_v18  ;;  %518 = vmatmul.bf16.gmra.mxu3 %v944_v19 }
  0x5c   : > { %463 = vmatmul.bf16.gmra.mxu0 %v933_v20  ;;  %483 = vmatmul.bf16.gmra.mxu1 %v937_v21 }
  0x5d   : > { %503 = vmatmul.bf16.gmra.mxu2 %v941_v22  ;;  %523 = vmatmul.bf16.gmra.mxu3 %v945_v23 }
  0xa9   : > { %v449_v24 = vpop.f32.mrf.mxu0  ;;  %v1219_v25 = vpop.f32.mrf.mxu1 }
  0xaa   : > { %v634_v57 = vmul.f32 %v449_v24, %v449_v24 }
  0xb0   : > { %v1221_v26 = vpop.f32.mrf.mxu2  ;;  %v1234_v31 = vpop.f32.mrf.mxu3 }
  0xb1   : > { %v451_v27 = vpop.f32.mrf.mxu0  ;;  %v1230_v28 = vpop.f32.mrf.mxu1 }
  0xb2   : > { %v957_v29 = vpack.c.bf16 %v451_v27, %v449_v24  ;;  %v977_v30 = vpack.c.bf16 %v1230_v28, %v1219_v25  ;;  %v635_v56 = vmul.f32 %v451_v27, %v451_v27  ;;  %v594_v59 = vadd.f32 %v451_v27, %v449_v24 }
  0xb3   : > { %v642_v27 = vmul.f32 %v1219_v25, %v1219_v25 }
  0xb4   : > { %958 = vst [vmem:[%s1228_s20] sm:$0xff] %v957_v29   ;;  %v666_v60 = vadd.f32 %v635_v56, %v634_v57 }
  0xb5   : > { %1037 = vst [vmem:[%s1228_s20 + $0x20] sm:$0xff] %v977_v30  }
  0xb8   : > { %v1238_v32 = vpop.f32.mrf.mxu2  ;;  %v1244_v36 = vpop.f32.mrf.mxu3 }
  0xb9   : > { %v454_v33 = vpop.f32.mrf.mxu0  ;;  %v1240_v34 = vpop.f32.mrf.mxu1  ;;  %v997_v35 = vpack.c.bf16 %v1238_v32, %v1221_v26  ;;  %v1017_v37 = vpack.c.bf16 %v1244_v36, %v1234_v31 }
  0xba   : > { %v636_v58 = vmul.f32 %v454_v33, %v454_v33  ;;  %v595_v62 = vadd.f32 %v594_v59, %v454_v33 }
  0xbb   : > { %1041 = vst [vmem:[%s1228_s20 + $0x40] sm:$0xff] %v997_v35  }
  0xbc   : > { %1045 = vst [vmem:[%s1228_s20 + $0x60] sm:$0xff] %v1017_v37   ;;  %v667_v0 = vadd.f32 %v666_v60, %v636_v58 }
  0xc0   : > { %v1250_v38 = vpop.f32.mrf.mxu2  ;;  %v1256_v43 = vpop.f32.mrf.mxu3 }
  0xc1   : > { %v456_v39 = vpop.f32.mrf.mxu0  ;;  %v1252_v40 = vpop.f32.mrf.mxu1 }
  0xc2   : > { %v962_v41 = vpack.c.bf16 %v456_v39, %v454_v33  ;;  %v982_v42 = vpack.c.bf16 %v1252_v40, %v1240_v34  ;;  %v637_v61 = vmul.f32 %v456_v39, %v456_v39  ;;  %v596_v5 = vadd.f32 %v595_v62, %v456_v39 }
  0xc3   : > { %v643_v33 = vmul.f32 %v1230_v28, %v1230_v28  ;;  %v644_v39 = vmul.f32 %v1240_v34, %v1240_v34 }
  0xc4   : > { %1034 = vst [vmem:[%s1228_s20 + $0x8] sm:$0xff] %v962_v41   ;;  %v668_v7 = vadd.f32 %v667_v0, %v637_v61 }
  0xc5   : > { %1038 = vst [vmem:[%s1228_s20 + $0x28] sm:$0xff] %v982_v42  }
  0xc8   : > { %v1260_v44 = vpop.f32.mrf.mxu2  ;;  %v1266_v48 = vpop.f32.mrf.mxu3 }
  0xc9   : > { %v459_v45 = vpop.f32.mrf.mxu0  ;;  %v1262_v46 = vpop.f32.mrf.mxu1  ;;  %v1002_v47 = vpack.c.bf16 %v1260_v44, %v1250_v38  ;;  %v1022_v49 = vpack.c.bf16 %v1266_v48, %v1256_v43 }
  0xca   : > { %v638_v1 = vmul.f32 %v459_v45, %v459_v45  ;;  %v597_v10 = vadd.f32 %v596_v5, %v459_v45 }
  0xcb   : > { %1042 = vst [vmem:[%s1228_s20 + $0x48] sm:$0xff] %v1002_v47   ;;  %v645_v47 = vmul.f32 %v1252_v40, %v1252_v40 }
  0xcc   : > { %1046 = vst [vmem:[%s1228_s20 + $0x68] sm:$0xff] %v1022_v49   ;;  %v669_v11 = vadd.f32 %v668_v7, %v638_v1  ;;  %v650_v1 = vmul.f32 %v1221_v26, %v1221_v26 }
  0xd0   : > { %v1272_v50 = vpop.f32.mrf.mxu2  ;;  %v1278_v55 = vpop.f32.mrf.mxu3 }
  0xd1   : > { %v461_v51 = vpop.f32.mrf.mxu0  ;;  %v1274_v52 = vpop.f32.mrf.mxu1 }
  0xd2   : > { %v967_v53 = vpack.c.bf16 %v461_v51, %v459_v45  ;;  %v987_v54 = vpack.c.bf16 %v1274_v52, %v1262_v46  ;;  %v639_v8 = vmul.f32 %v461_v51, %v461_v51  ;;  %v598_v13 = vadd.f32 %v597_v10, %v461_v51 }
  0xd3   : > { %v647_v57 = vmul.f32 %v1274_v52, %v1274_v52 }
  0xd4   : > { %1035 = vst [vmem:[%s1228_s20 + $0x10] sm:$0xff] %v967_v53   ;;  %v670_v14 = vadd.f32 %v669_v11, %v639_v8  ;;  %v652_v8 = vmul.f32 %v1250_v38, %v1250_v38  ;;  %v653_v11 = vmul.f32 %v1260_v44, %v1260_v44 }
  0xd5   : > { %1039 = vst [vmem:[%s1228_s20 + $0x30] sm:$0xff] %v987_v54  }
  0xd8   : > { %v1282_v63 = vpop.f32.mrf.mxu2  ;;  %v1286_v6 = vpop.f32.mrf.mxu3 }
  0xd9   : > { %v464_v2 = vpop.f32.mrf.mxu0  ;;  %v484_v3 = vpop.f32.mrf.mxu1  ;;  %v1007_v4 = vpack.c.bf16 %v1282_v63, %v1272_v50  ;;  %v1027_v9 = vpack.c.bf16 %v1286_v6, %v1278_v55 }
  0xda   : > { %v640_v12 = vmul.f32 %v464_v2, %v464_v2  ;;  %v599_v15 = vadd.f32 %v598_v13, %v464_v2  ;;  %v648_v60 = vmul.f32 %v484_v3, %v484_v3  ;;  %v654_v13 = vmul.f32 %v1272_v50, %v1272_v50 }
  0xdb   : > { %1043 = vst [vmem:[%s1228_s20 + $0x50] sm:$0xff] %v1007_v4   ;;  %v651_v4 = vmul.f32 %v1238_v32, %v1238_v32 }
  0xdc   : > { %1047 = vst [vmem:[%s1228_s20 + $0x70] sm:$0xff] %v1027_v9   ;;  %v671_v17 = vadd.f32 %v670_v14, %v640_v12 }
  0xe0   : > { %v1292_v16 = vpop.f32.mrf.mxu2  ;;  %v1294_v24 = vpop.f32.mrf.mxu3 }
  0xe1   : > { %v466_v18 = vpop.f32.mrf.mxu0  ;;  %v486_v19 = vpop.f32.mrf.mxu1 }
  0xe2   : > { %v972_v20 = vpack.c.bf16 %v466_v18, %v464_v2  ;;  %v600_v21 = vadd.f32 %v599_v15, %v466_v18  ;;  %v641_v22 = vmul.f32 %v466_v18, %v466_v18  ;;  %v992_v23 = vpack.c.bf16 %v486_v19, %v484_v3 }
  0xe3   : > { %v649_v0 = vmul.f32 %v486_v19, %v486_v19 }
  0xe4   : > { %1036 = vst [vmem:[%s1228_s20 + $0x18] sm:$0xff] %v972_v20   ;;  %v601_v29 = vadd.f32 %v600_v21, %v1219_v25  ;;  %v672_v30 = vadd.f32 %v671_v17, %v641_v22  ;;  %v655_v17 = vmul.f32 %v1282_v63, %v1282_v63  ;;  %v656_v20 = vmul.f32 %v1292_v16, %v1292_v16 }
  0xe5   : > { %1040 = vst [vmem:[%s1228_s20 + $0x38] sm:$0xff] %v992_v23   ;;  %v658_v23 = vmul.f32 %v1234_v31, %v1234_v31 }
  0xe6   : > { %v602_v35 = vadd.f32 %v601_v29, %v1230_v28  ;;  %v673_v37 = vadd.f32 %v672_v30, %v642_v27  ;;  %v659_v29 = vmul.f32 %v1244_v36, %v1244_v36 }
  0xe8   : > { %v603_v41 = vadd.f32 %v602_v35, %v1240_v34  ;;  %v674_v42 = vadd.f32 %v673_v37, %v643_v33  ;;  %v506_v45 = vpop.f32.mrf.mxu2  ;;  %v1312_v28 = vpop.f32.mrf.mxu3  ;;  %v646_v34 = vmul.f32 %v1262_v46, %v1262_v46  ;;  %v660_v33 = vmul.f32 %v1256_v43, %v1256_v43 }
  0xe9   : > { %v1012_v25 = vpack.c.bf16 %v506_v45, %v1292_v16  ;;  %v1032_v53 = vpack.c.bf16 %v1312_v28, %v1294_v24  ;;  %v657_v22 = vmul.f32 %v506_v45, %v506_v45  ;;  %v661_v37 = vmul.f32 %v1266_v48, %v1266_v48 }
  0xea   : > { %v675_v49 = vadd.f32 %v674_v42, %v644_v39  ;;  %v604_v51 = vadd.f32 %v603_v41, %v1252_v40 }
  0xeb   : > { %1044 = vst [vmem:[%s1228_s20 + $0x58] sm:$0xff] %v1012_v25   ;;  %v663_v25 = vmul.f32 %v1286_v6, %v1286_v6 }
  0xec   : > { %v605_v54 = vadd.f32 %v604_v51, %v1262_v46  ;;  %v676_v56 = vadd.f32 %v675_v49, %v645_v47  ;;  %1048 = vst [vmem:[%s1228_s20 + $0x78] sm:$0xff] %v1032_v53   ;;  %v664_v51 = vmul.f32 %v1294_v24, %v1294_v24 }
  0xee   : > { %v606_v58 = vadd.f32 %v605_v54, %v1274_v52  ;;  %v677_v40 = vadd.f32 %v676_v56, %v646_v34  ;;  %v1122_v52 = vmov 0.0  }
  0xef   : > { %246 = vst [vmem:[%s1328_s23] sm:$0x1] %v1122_v52 }
  0xf0   : > { %v607_v59 = vadd.f32 %v606_v58, %v484_v3  ;;  %v678_v61 = vadd.f32 %v677_v40, %v647_v57  ;;  %247 = vst [vmem:[%s1333_s26] sm:$0x1] %v1122_v52 }
  0xf2   : > { %v679_v46 = vadd.f32 %v678_v61, %v648_v60  ;;  %v608_v62 = vadd.f32 %v607_v59, %v486_v19 }
  0xf4   : > { %v609_v2 = vadd.f32 %v608_v62, %v1221_v26  ;;  %v680_v3 = vadd.f32 %v679_v46, %v649_v0 }
  0xf6   : > { %v610_v5 = vadd.f32 %v609_v2, %v1238_v32  ;;  %v681_v7 = vadd.f32 %v680_v3, %v650_v1 }
  0xf7   : > { %v633_v0 = vld [vmem:[%s1333_s26] sm:$0x1] }
  0xf8   : > { %v611_v9 = vadd.f32 %v610_v5, %v1250_v38  ;;  %v682_v10 = vadd.f32 %v681_v7, %v651_v4 }
  0xfa   : > { %v683_v12 = vadd.f32 %v682_v10, %v652_v8  ;;  %v612_v26 = vadd.f32 %v611_v9, %v1260_v44 }
  0xfc   : > { %v613_v14 = vadd.f32 %v612_v26, %v1272_v50  ;;  %v684_v15 = vadd.f32 %v683_v12, %v653_v11 }
  0xfe   : > { %v614_v32 = vadd.f32 %v613_v14, %v1282_v63  ;;  %v685_v18 = vadd.f32 %v684_v15, %v654_v13 }
 0x100   : > { %v686_v38 = vadd.f32 %v685_v18, %v655_v17  ;;  %v615_v19 = vadd.f32 %v614_v32, %v1292_v16 }
 0x102   : > { %v687_v21 = vadd.f32 %v686_v38, %v656_v20  ;;  %v616_v44 = vadd.f32 %v615_v19, %v506_v45 }
 0x104   : > { %v617_v50 = vadd.f32 %v616_v44, %v1234_v31  ;;  %v688_v27 = vadd.f32 %v687_v21, %v657_v22  ;;  %v662_v31 = vmul.f32 %v1278_v55, %v1278_v55 }
 0x106   : > { %v618_v63 = vadd.f32 %v617_v50, %v1244_v36  ;;  %v689_v30 = vadd.f32 %v688_v27, %v658_v23 }
 0x108   : > { %v619_v16 = vadd.f32 %v618_v63, %v1256_v43  ;;  %v690_v35 = vadd.f32 %v689_v30, %v659_v29 }
 0x10a   : > { %v691_v39 = vadd.f32 %v690_v35, %v660_v33  ;;  %v620_v41 = vadd.f32 %v619_v16, %v1266_v48 }
 0x10c   : > { %v621_v42 = vadd.f32 %v620_v41, %v1278_v55  ;;  %v692_v45 = vadd.f32 %v691_v39, %v661_v37  ;;  %v665_v55 = vmul.f32 %v1312_v28, %v1312_v28 }
 0x10e   : > { %v622_v36 = vadd.f32 %v621_v42, %v1286_v6  ;;  %v693_v47 = vadd.f32 %v692_v45, %v662_v31 }
 0x110   : > { %v694_v43 = vadd.f32 %v693_v47, %v663_v25  ;;  %v623_v49 = vadd.f32 %v622_v36, %v1294_v24  ;;  %v593_v24 = vld [vmem:[%s1328_s23] sm:$0x1] }
 0x112   : > { %v695_v48 = vadd.f32 %v694_v43, %v664_v51  ;;  %v624_v53 = vadd.f32 %v623_v49, %v1312_v28 }
 0x114   : > { %v625_v34 = vrot.slane %v624_v53, 4  ;;  %v696_v54 = vadd.f32 %v695_v48, %v665_v55 }
 0x116   : > { %v626_v56 = vadd.f32 %v625_v34, %v624_v53  ;;  %v697_v6 = vrot.slane %v696_v54, 4 }
 0x118   : > { %v627_v57 = vrot.slane %v626_v56, 2  ;;  %v698_v58 = vadd.f32 %v697_v6, %v696_v54 }
 0x11a   : > { %v628_v40 = vadd.f32 %v627_v57, %v626_v56  ;;  %v699_v59 = vrot.slane %v698_v58, 2 }
 0x11c   : > { %v629_v60 = vrot.slane %v628_v40, 1  ;;  %v700_v61 = vadd.f32 %v699_v59, %v698_v58 }
 0x11e   : > { %v630_v46 = vadd.f32 %v629_v60, %v628_v40  ;;  %v701_v62 = vrot.slane %v700_v61, 1 }
 0x120   : > { %v631_v52 = vadd.f32 %v630_v46, %v593_v24  ;;  %v702_v1 = vadd.f32 %v701_v62, %v700_v61 }
 0x122   : > { %632 = vst [vmem:[%s1328_s23] sm:$0x1] %v631_v52  ;;  %v703_v28 = vadd.f32 %v702_v1, %v633_v0 }
 0x124   : > { %704 = vst [vmem:[%s1333_s26] sm:$0x1] %v703_v28 }
 0x125 PF: > { %s15_s17 = sadd.s32 1, %s1120_s17   ;;  %s1400_s15 = smov %s1116_s16 }
 0x126   : > { %p12_p6 = scmp.ge.s32.totalorder %s15_s17, 4   ;;  %s1401_s16 = smov %s1403_s18 }
 0x128   :  { %14 = sbr.rel (!%p12_p6) target bundleno = 2 (0x2), region = 86 }

// kernel: encoder_forward.10
= control target key start
LH: loop header
LB: loop body
LE: loop exit
PB: predicated region body
PF: predicated region fallthrough
CT: control target
= control target key end

     0   :  { %s842_s18 = smov 0   ;;  %s1050_s0 = inlined_call_operand.vmem [shape: bf16[512,128], index: 0, kind: input, shape index: {}]   ;;  %s1051_s1 = inlined_call_operand.vmem [shape: f32[2,1,128], index: 1, kind: input, shape index: {}]   ;;  %s1052_s2 = inlined_call_operand.vmem [shape: f32[2,1,128], index: 2, kind: input, shape index: {}]   ;;  %s1053_s3 = inlined_call_operand.vmem [shape: f32[1,128], index: 3, kind: input, shape index: {}]   ;;  %s1054_s4 = inlined_call_operand.vmem [shape: f32[1,128], index: 4, kind: input, shape index: {}]   ;;  %s1055_s5 = inlined_call_operand.vmem [shape: bf16[512,128], index: 5, kind: output, shape index: {}]  }
   0x1 LB: > { %s609_s19 = sadd.s32 4294967295, %s810_s18   ;;  %p613_p0 = scmp.ge.s32.totalorder %s810_s18, 1  ;;  %s810_s18 = sphi %s842_s18, %s15_s18  }
   0x2   : > { %p188_p1 = scmp.lt.s32.totalorder %s810_s18, 3 }
   0x4   : > { %p189_p2 = pnand %p613_p0, %p188_p1 }
   0x5   : > { %s614_s28 = sshll.u32 (!%p189_p2), %s609_s19, 5 }
   0x6   : > { %192 = sbr.rel (%p189_p2) target bundleno = 96 (0x60), region = 40  ;;  %p217_p3 = scmp.lt.s32.totalorder (!%p189_p2), %s614_s28, 63 }
   0xb   : > { %v228_v0 = vld [vmem:[%s1051_s1] sm:$0x1]  ;;  %v229_v1 = vld [vmem:[%s1051_s1 + $0x1] sm:$0x1]  ;;  %vm230_vm0 = vcmask 1040384   ;;  %s1059_s28 = smov (!%p217_p3, %s614_s28), 63 }
   0xc   : > { %v231_v2 = vsel %vm230_vm0, %v228_v0, 0.0  ;;  %v232_v3 = vsel %vm230_vm0, %v229_v1, 0.0  ;;  %v235_v4 = vld [vmem:[%s1052_s2] sm:$0x1]  ;;  %v236_v6 = vld [vmem:[%s1052_s2 + $0x1] sm:$0x1] }
   0xd   : > { %v233_v5 = vadd.f32 %v232_v3, %v231_v2  ;;  %v237_v7 = vsel %vm230_vm0, %v235_v4, 0.0  ;;  %v238_v8 = vsel %vm230_vm0, %v236_v6, 0.0  ;;  %s615_s29 = sshll.u32 %s1059_s28, 2  ;;  %v243_v34 = vld [vmem:[%s1053_s3] sm:$0x1] }
   0xe   : > { %v239_v10 = vadd.f32 %v238_v8, %v237_v7  ;;  %s870_s7 = scalar_lea.vmem %s1050_s0, %s615_s29  ;;  %v256_v57 = vld [vmem:[%s1054_s4] sm:$0x1]  ;;  %s957_s14 = scalar_lea.vmem %s1055_s5, %s615_s29 }
   0xf   : > { %v234_v9 = vmul.f32 0.001953125, %v233_v5  ;;  %v621_v18 = vld [vmem:[%s870_s7] sm:$0xff]   ;;  %v764_v20 = vld [vmem:[%s870_s7 + $0x8] sm:$0xff]   ;;  %v765_v21 = vld [vmem:[%s870_s7 + $0x10] sm:$0xff]  }
  0x10   : > { %v240_v11 = vmul.f32 0.001953125, %v239_v10  ;;  %v766_v22 = vld [vmem:[%s870_s7 + $0x18] sm:$0xff]   ;;  %v622_v24 = vunpack.c.l.bf16 %v621_v18  ;;  %v767_v25 = vld [vmem:[%s870_s7 + $0x20] sm:$0xff]   ;;  %v768_v26 = vld [vmem:[%s870_s7 + $0x28] sm:$0xff]   ;;  %v623_v28 = vunpack.c.h.bf16 %v621_v18  ;;  %v626_v29 = vunpack.c.l.bf16 %v764_v20 }
  0x11   : > { %v241_v12 = vmul.f32 %v234_v9, %v234_v9  ;;  %v627_v30 = vunpack.c.h.bf16 %v764_v20  ;;  %v630_v31 = vunpack.c.l.bf16 %v765_v21  ;;  %v769_v32 = vld [vmem:[%s870_s7 + $0x30] sm:$0xff]   ;;  %v884_v33 = vld [vmem:[%s870_s7 + $0x38] sm:$0xff]   ;;  %v631_v36 = vunpack.c.h.bf16 %v765_v21  ;;  %v890_v39 = vld [vmem:[%s870_s7 + $0x40] sm:$0xff]  }
  0x12   : > { %v634_v37 = vunpack.c.l.bf16 %v766_v22  ;;  %v635_v38 = vunpack.c.h.bf16 %v766_v22  ;;  %v638_v40 = vunpack.c.l.bf16 %v767_v25  ;;  %v639_v41 = vunpack.c.h.bf16 %v767_v25  ;;  %v893_v44 = vld [vmem:[%s870_s7 + $0x48] sm:$0xff]   ;;  %v896_v45 = vld [vmem:[%s870_s7 + $0x50] sm:$0xff]   ;;  %v902_v50 = vld [vmem:[%s870_s7 + $0x58] sm:$0xff]  }
  0x13   : > { %v242_v13 = vsub.f32 %v240_v11, %v241_v12  ;;  %v642_v42 = vunpack.c.l.bf16 %v768_v26  ;;  %v643_v43 = vunpack.c.h.bf16 %v768_v26  ;;  %v646_v47 = vunpack.c.l.bf16 %v769_v32  ;;  %v908_v55 = vld [vmem:[%s870_s7 + $0x60] sm:$0xff]   ;;  %v911_v56 = vld [vmem:[%s870_s7 + $0x68] sm:$0xff]  }
  0x14   : > { %v647_v48 = vunpack.c.h.bf16 %v769_v32  ;;  %v650_v49 = vunpack.c.l.bf16 %v884_v33  ;;  %v651_v52 = vunpack.c.h.bf16 %v884_v33  ;;  %v654_v53 = vunpack.c.l.bf16 %v890_v39 }
  0x15   : > { %v244_v14 = vadd.f32 1e-05, %v242_v13  ;;  %v655_v54 = vunpack.c.h.bf16 %v890_v39  ;;  %v658_v58 = vunpack.c.l.bf16 %v893_v44  ;;  %v659_v59 = vunpack.c.h.bf16 %v893_v44 }
  0x16   : > { %v662_v60 = vunpack.c.l.bf16 %v896_v45  ;;  %v663_v61 = vunpack.c.h.bf16 %v896_v45  ;;  %v666_v0 = vunpack.c.l.bf16 %v902_v50  ;;  %v667_v1 = vunpack.c.h.bf16 %v902_v50 }
  0x17   : > { %802 = vrsqrt.f32 %v244_v14  ;;  %vm251_vm1 = vweird.f32 %v244_v14  ;;  %v670_v2 = vunpack.c.l.bf16 %v908_v55  ;;  %v671_v3 = vunpack.c.h.bf16 %v908_v55 }
  0x18   : > { %v674_v4 = vunpack.c.l.bf16 %v911_v56  ;;  %v675_v5 = vunpack.c.h.bf16 %v911_v56 }
  0x1d   : > { %v803_v15 = vpop.eup %802 }
  0x1e   : > { %v246_v16 = vmul.f32 %v803_v15, %v244_v14  ;;  %vm252_vm2 = vweird.f32 %v803_v15 }
  0x1f   : > { %vm878_vm3 = vmor %vm251_vm1, %vm252_vm2 }
  0x20   : > { %v247_v17 = vmul.f32 %v803_v15, %v246_v16 }
  0x22   : > { %v248_v19 = vmul.f32 0.5, %v247_v17 }
  0x24   : > { %v249_v23 = vsub.f32 1.5, %v248_v19 }
  0x26   : > { %v250_v35 = vmul.f32 %v803_v15, %v249_v23 }
  0x28   : > { %v254_v46 = vsel %vm878_vm3, %v803_v15, %v250_v35 }
  0x29   : > { %v255_v51 = vmul.f32 %v254_v46, %v243_v34 }
  0x2b   : > { %v257_v62 = vmul.f32 %v255_v51, %v234_v9  ;;  %v920_v63 = vperm.slane %v255_v51, 0 }
  0x2d   : > { %v258_v6 = vsub.f32 %v256_v57, %v257_v62  ;;  %v326_v7 = vmul.f32 %v622_v24, %v920_v63  ;;  %v327_v8 = vmul.f32 %v623_v28, %v920_v63  ;;  %v328_v9 = vmul.f32 %v626_v29, %v920_v63 }
  0x2e   : > { %v329_v10 = vmul.f32 %v627_v30, %v920_v63  ;;  %v330_v11 = vmul.f32 %v630_v31, %v920_v63  ;;  %v331_v12 = vmul.f32 %v631_v36, %v920_v63  ;;  %v332_v13 = vmul.f32 %v634_v37, %v920_v63 }
  0x2f   : > { %v935_v14 = vperm.slane %v258_v6, 0  ;;  %v333_v15 = vmul.f32 %v635_v38, %v920_v63  ;;  %v334_v16 = vmul.f32 %v638_v40, %v920_v63  ;;  %v335_v17 = vmul.f32 %v639_v41, %v920_v63 }
  0x30   : > { %v336_v18 = vmul.f32 %v642_v42, %v920_v63  ;;  %v337_v19 = vmul.f32 %v643_v43, %v920_v63  ;;  %v338_v20 = vmul.f32 %v646_v47, %v920_v63  ;;  %v339_v21 = vmul.f32 %v647_v48, %v920_v63 }
  0x31   : > { %v361_v22 = vadd.f32 %v935_v14, %v326_v7  ;;  %v362_v23 = vadd.f32 %v935_v14, %v327_v8  ;;  %v363_v24 = vadd.f32 %v935_v14, %v328_v9  ;;  %v364_v25 = vadd.f32 %v935_v14, %v329_v10 }
  0x32   : > { %v365_v26 = vadd.f32 %v935_v14, %v330_v11  ;;  %v366_v27 = vadd.f32 %v935_v14, %v331_v12  ;;  %v367_v28 = vadd.f32 %v935_v14, %v332_v13  ;;  %v368_v29 = vadd.f32 %v935_v14, %v333_v15 }
  0x33   : > { %vm393_vm4 = vcmp.ge.f32.partialorder %v361_v22, 0.0  ;;  %vm394_vm5 = vcmp.ge.f32.partialorder %v362_v23, 0.0  ;;  %v425_v30 = vmul.f32 0.2, %v361_v22  ;;  %v426_v31 = vmul.f32 0.2, %v362_v23 }
  0x34   : > { %vm395_vm6 = vcmp.ge.f32.partialorder %v363_v24, 0.0  ;;  %vm396_vm7 = vcmp.ge.f32.partialorder %v364_v25, 0.0  ;;  %v427_v32 = vmul.f32 0.2, %v363_v24  ;;  %v428_v34 = vmul.f32 0.2, %v364_v25 }
  0x35   : > { %v457_v35 = vsel %vm393_vm4, %v361_v22, %v425_v30  ;;  %v458_v36 = vsel %vm394_vm5, %v362_v23, %v426_v31  ;;  %vm397_vm8 = vcmp.ge.f32.partialorder %v365_v26, 0.0  ;;  %vm398_vm9 = vcmp.ge.f32.partialorder %v366_v27, 0.0 }
  0x36   : > { %v687_v37 = vpack.c.bf16 %v458_v36, %v457_v35  ;;  %v459_v38 = vsel %vm395_vm6, %v363_v24, %v427_v32  ;;  %v460_v40 = vsel %vm396_vm7, %v364_v25, %v428_v34  ;;  %v429_v41 = vmul.f32 0.2, %v365_v26 }
  0x37   : > { %v692_v42 = vpack.c.bf16 %v460_v40, %v459_v38  ;;  %v430_v43 = vmul.f32 0.2, %v366_v27  ;;  %vm399_vm10 = vcmp.ge.f32.partialorder %v367_v28, 0.0  ;;  %vm400_vm11 = vcmp.ge.f32.partialorder %v368_v29, 0.0 }
  0x38   : > { %688 = vst [vmem:[%s957_s14] sm:$0xff] %v687_v37   ;;  %v461_v46 = vsel %vm397_vm8, %v365_v26, %v429_v41  ;;  %v431_v47 = vmul.f32 0.2, %v367_v28  ;;  %v432_v48 = vmul.f32 0.2, %v368_v29  ;;  %v369_v51 = vadd.f32 %v935_v14, %v334_v16 }
  0x39   : > { %779 = vst [vmem:[%s957_s14 + $0x8] sm:$0xff] %v692_v42   ;;  %v462_v57 = vsel %vm398_vm9, %v366_v27, %v430_v43  ;;  %v370_v62 = vadd.f32 %v935_v14, %v335_v17  ;;  %v371_v6 = vadd.f32 %v935_v14, %v336_v18  ;;  %v372_v7 = vadd.f32 %v935_v14, %v337_v19 }
  0x3a   : > { %v697_v8 = vpack.c.bf16 %v462_v57, %v461_v46  ;;  %v463_v9 = vsel %vm399_vm10, %v367_v28, %v431_v47  ;;  %v464_v10 = vsel %vm400_vm11, %v368_v29, %v432_v48  ;;  %vm401_vm12 = vcmp.ge.f32.partialorder %v369_v51, 0.0 }
  0x3b   : > { %v702_v11 = vpack.c.bf16 %v464_v10, %v463_v9  ;;  %vm402_vm13 = vcmp.ge.f32.partialorder %v370_v62, 0.0  ;;  %v433_v12 = vmul.f32 0.2, %v369_v51  ;;  %v434_v13 = vmul.f32 0.2, %v370_v62 }
  0x3c   : > { %780 = vst [vmem:[%s957_s14 + $0x10] sm:$0xff] %v697_v8   ;;  %vm403_vm14 = vcmp.ge.f32.partialorder %v371_v6, 0.0  ;;  %vm404_vm15 = vcmp.ge.f32.partialorder %v372_v7, 0.0  ;;  %v435_v15 = vmul.f32 0.2, %v371_v6  ;;  %v373_v16 = vadd.f32 %v935_v14, %v338_v20 }
  0x3d   : > { %781 = vst [vmem:[%s957_s14 + $0x18] sm:$0xff] %v702_v11   ;;  %v465_v17 = vsel %vm401_vm12, %v369_v51, %v433_v12  ;;  %v466_v18 = vsel %vm402_vm13, %v370_v62, %v434_v13  ;;  %v436_v22 = vmul.f32 0.2, %v372_v7  ;;  %v374_v19 = vadd.f32 %v935_v14, %v339_v21 }
  0x3e   : > { %v707_v23 = vpack.c.bf16 %v466_v18, %v465_v17  ;;  %v467_v24 = vsel %vm403_vm14, %v371_v6, %v435_v15  ;;  %vm405_vm0 = vcmp.ge.f32.partialorder %v373_v16, 0.0  ;;  %v437_v25 = vmul.f32 0.2, %v373_v16 }
  0x3f   : > { %v468_v26 = vsel %vm404_vm15, %v372_v7, %v436_v22  ;;  %vm406_vm1 = vcmp.ge.f32.partialorder %v374_v19, 0.0  ;;  %v438_v27 = vmul.f32 0.2, %v374_v19  ;;  %v340_v28 = vmul.f32 %v650_v49, %v920_v63 }
  0x40   : > { %782 = vst [vmem:[%s957_s14 + $0x20] sm:$0xff] %v707_v23   ;;  %v712_v20 = vpack.c.bf16 %v468_v26, %v467_v24  ;;  %v469_v29 = vsel %vm405_vm0, %v373_v16, %v437_v25  ;;  %v341_v21 = vmul.f32 %v651_v52, %v920_v63  ;;  %v342_v30 = vmul.f32 %v654_v53, %v920_v63  ;;  %v777_v16 = vld [vmem:[%s870_s7 + $0x70] sm:$0xff]   ;;  %v778_v26 = vld [vmem:[%s870_s7 + $0x78] sm:$0xff]  }
  0x41   : > { %v470_v31 = vsel %vm406_vm1, %v374_v19, %v438_v27  ;;  %v375_v32 = vadd.f32 %v935_v14, %v340_v28  ;;  %v343_v34 = vmul.f32 %v655_v54, %v920_v63  ;;  %v344_v49 = vmul.f32 %v658_v58, %v920_v63 }
  0x42   : > { %783 = vst [vmem:[%s957_s14 + $0x28] sm:$0xff] %v712_v20   ;;  %v717_v35 = vpack.c.bf16 %v470_v31, %v469_v29  ;;  %v376_v33 = vadd.f32 %v935_v14, %v341_v21  ;;  %v377_v52 = vadd.f32 %v935_v14, %v342_v30  ;;  %v345_v53 = vmul.f32 %v659_v59, %v920_v63 }
  0x43   : > { %vm407_vm2 = vcmp.ge.f32.partialorder %v375_v32, 0.0  ;;  %v439_v36 = vmul.f32 0.2, %v375_v32  ;;  %v378_v37 = vadd.f32 %v935_v14, %v343_v34  ;;  %v379_v39 = vadd.f32 %v935_v14, %v344_v49 }
  0x44   : > { %784 = vst [vmem:[%s957_s14 + $0x30] sm:$0xff] %v717_v35   ;;  %vm408_vm3 = vcmp.ge.f32.partialorder %v376_v33, 0.0  ;;  %v440_v54 = vmul.f32 0.2, %v376_v33  ;;  %vm409_vm4 = vcmp.ge.f32.partialorder %v377_v52, 0.0  ;;  %v380_v58 = vadd.f32 %v935_v14, %v345_v53 }
  0x45   : > { %v471_v38 = vsel %vm407_vm2, %v375_v32, %v439_v36  ;;  %vm410_vm5 = vcmp.ge.f32.partialorder %v378_v37, 0.0  ;;  %v441_v40 = vmul.f32 0.2, %v377_v52  ;;  %v442_v41 = vmul.f32 0.2, %v378_v37 }
  0x46   : > { %v472_v42 = vsel %vm408_vm3, %v376_v33, %v440_v54  ;;  %vm411_vm6 = vcmp.ge.f32.partialorder %v379_v39, 0.0  ;;  %vm412_vm7 = vcmp.ge.f32.partialorder %v380_v58, 0.0  ;;  %v443_v44 = vmul.f32 0.2, %v379_v39 }
  0x47   : > { %v722_v59 = vpack.c.bf16 %v472_v42, %v471_v38  ;;  %v473_v43 = vsel %vm409_vm4, %v377_v52, %v441_v40  ;;  %v474_v46 = vsel %vm410_vm5, %v378_v37, %v442_v41  ;;  %v444_v47 = vmul.f32 0.2, %v380_v58 }
  0x48   : > { %v727_v48 = vpack.c.bf16 %v474_v46, %v473_v43  ;;  %v475_v51 = vsel %vm411_vm6, %v379_v39, %v443_v44  ;;  %v346_v57 = vmul.f32 %v662_v60, %v920_v63  ;;  %v347_v62 = vmul.f32 %v663_v61, %v920_v63 }
  0x49   : > { %785 = vst [vmem:[%s957_s14 + $0x38] sm:$0xff] %v722_v59   ;;  %v476_v6 = vsel %vm412_vm7, %v380_v58, %v444_v47  ;;  %v348_v7 = vmul.f32 %v666_v0, %v920_v63  ;;  %v349_v8 = vmul.f32 %v667_v1, %v920_v63  ;;  %v350_v9 = vmul.f32 %v670_v2, %v920_v63 }
  0x4a   : > { %786 = vst [vmem:[%s957_s14 + $0x40] sm:$0xff] %v727_v48   ;;  %v732_v60 = vpack.c.bf16 %v476_v6, %v475_v51  ;;  %v381_v45 = vadd.f32 %v935_v14, %v346_v57  ;;  %v382_v61 = vadd.f32 %v935_v14, %v347_v62  ;;  %v351_v10 = vmul.f32 %v671_v3, %v920_v63 }
  0x4b   : > { %v383_v0 = vadd.f32 %v935_v14, %v348_v7  ;;  %v384_v11 = vadd.f32 %v935_v14, %v349_v8  ;;  %v385_v50 = vadd.f32 %v935_v14, %v350_v9  ;;  %v352_v1 = vmul.f32 %v674_v4, %v920_v63 }
  0x4c   : > { %787 = vst [vmem:[%s957_s14 + $0x48] sm:$0xff] %v732_v60   ;;  %vm413_vm8 = vcmp.ge.f32.partialorder %v381_v45, 0.0  ;;  %vm414_vm9 = vcmp.ge.f32.partialorder %v382_v61, 0.0  ;;  %v445_v2 = vmul.f32 0.2, %v381_v45  ;;  %v386_v12 = vadd.f32 %v935_v14, %v351_v10 }
  0x4d   : > { %v446_v13 = vmul.f32 0.2, %v382_v61  ;;  %vm415_vm10 = vcmp.ge.f32.partialorder %v383_v0, 0.0  ;;  %vm416_vm11 = vcmp.ge.f32.partialorder %v384_v11, 0.0  ;;  %v447_v55 = vmul.f32 0.2, %v383_v0 }
  0x4e   : > { %v477_v3 = vsel %vm413_vm8, %v381_v45, %v445_v2  ;;  %v448_v15 = vmul.f32 0.2, %v384_v11  ;;  %vm417_vm12 = vcmp.ge.f32.partialorder %v385_v50, 0.0  ;;  %vm418_vm13 = vcmp.ge.f32.partialorder %v386_v12, 0.0 }
  0x4f   : > { %v478_v17 = vsel %vm414_vm9, %v382_v61, %v446_v13  ;;  %v479_v18 = vsel %vm415_vm10, %v383_v0, %v447_v55  ;;  %v449_v4 = vmul.f32 0.2, %v385_v50  ;;  %v450_v22 = vmul.f32 0.2, %v386_v12 }
  0x50   : > { %v737_v19 = vpack.c.bf16 %v478_v17, %v477_v3  ;;  %v480_v23 = vsel %vm416_vm11, %v384_v11, %v448_v15  ;;  %v353_v24 = vmul.f32 %v675_v5, %v920_v63  ;;  %v387_v25 = vadd.f32 %v935_v14, %v352_v1 }
  0x51   : > { %v742_v27 = vpack.c.bf16 %v480_v23, %v479_v18  ;;  %v481_v28 = vsel %vm417_vm12, %v385_v50, %v449_v4  ;;  %v482_v20 = vsel %vm418_vm13, %v386_v12, %v450_v22  ;;  %v678_v29 = vunpack.c.l.bf16 %v777_v16 }
  0x52   : > { %788 = vst [vmem:[%s957_s14 + $0x50] sm:$0xff] %v737_v19   ;;  %v747_v21 = vpack.c.bf16 %v482_v20, %v481_v28  ;;  %v388_v30 = vadd.f32 %v935_v14, %v353_v24  ;;  %vm419_vm14 = vcmp.ge.f32.partialorder %v387_v25, 0.0  ;;  %v451_v31 = vmul.f32 0.2, %v387_v25 }
  0x53   : > { %789 = vst [vmem:[%s957_s14 + $0x58] sm:$0xff] %v742_v27   ;;  %v679_v32 = vunpack.c.h.bf16 %v777_v16  ;;  %v354_v34 = vmul.f32 %v678_v29, %v920_v63  ;;  %v682_v56 = vunpack.c.l.bf16 %v778_v26  ;;  %v683_v5 = vunpack.c.h.bf16 %v778_v26 }
  0x54   : > { %790 = vst [vmem:[%s957_s14 + $0x60] sm:$0xff] %v747_v21   ;;  %vm420_vm15 = vcmp.ge.f32.partialorder %v388_v30, 0.0  ;;  %v452_v49 = vmul.f32 0.2, %v388_v30  ;;  %v483_v35 = vsel %vm419_vm14, %v387_v25, %v451_v31 }
  0x55   : > { %v355_v33 = vmul.f32 %v679_v32, %v920_v63  ;;  %v389_v52 = vadd.f32 %v935_v14, %v354_v34  ;;  %v356_v53 = vmul.f32 %v682_v56, %v920_v63  ;;  %v357_v36 = vmul.f32 %v683_v5, %v920_v63 }
  0x56   : > { %v484_v37 = vsel %vm420_vm15, %v388_v30, %v452_v49 }
  0x57   : > { %v752_v39 = vpack.c.bf16 %v484_v37, %v483_v35  ;;  %v390_v54 = vadd.f32 %v935_v14, %v355_v33  ;;  %vm421_vm0 = vcmp.ge.f32.partialorder %v389_v52, 0.0  ;;  %v453_v58 = vmul.f32 0.2, %v389_v52 }
  0x58   : > { %v391_v38 = vadd.f32 %v935_v14, %v356_v53  ;;  %v392_v40 = vadd.f32 %v935_v14, %v357_v36 }
  0x59   : > { %791 = vst [vmem:[%s957_s14 + $0x68] sm:$0xff] %v752_v39   ;;  %vm422_vm1 = vcmp.ge.f32.partialorder %v390_v54, 0.0  ;;  %v454_v41 = vmul.f32 0.2, %v390_v54  ;;  %v485_v42 = vsel %vm421_vm0, %v389_v52, %v453_v58 }
  0x5a   : > { %vm423_vm2 = vcmp.ge.f32.partialorder %v391_v38, 0.0  ;;  %vm424_vm3 = vcmp.ge.f32.partialorder %v392_v40, 0.0  ;;  %v455_v44 = vmul.f32 0.2, %v391_v38  ;;  %v456_v63 = vmul.f32 0.2, %v392_v40 }
  0x5b   : > { %v486_v59 = vsel %vm422_vm1, %v390_v54, %v454_v41 }
  0x5c   : > { %v757_v43 = vpack.c.bf16 %v486_v59, %v485_v42  ;;  %v487_v46 = vsel %vm423_vm2, %v391_v38, %v455_v44  ;;  %v488_v47 = vsel %vm424_vm3, %v392_v40, %v456_v63 }
  0x5d   : > { %v762_v48 = vpack.c.bf16 %v488_v47, %v487_v46 }
  0x5e   : > { %792 = vst [vmem:[%s957_s14 + $0x70] sm:$0xff] %v757_v43  }
  0x5f   : > { %793 = vst [vmem:[%s957_s14 + $0x78] sm:$0xff] %v762_v48  }
  0x60 PF: > { %s15_s18 = sadd.s32 1, %s810_s18  }
  0x61   : > { %p12_p4 = scmp.ge.s32.totalorder %s15_s18, 4  }
  0x63   :  { %14 = sbr.rel (!%p12_p4) target bundleno = 1 (0x1), region = 70 }

// kernel: encoder_forward.12
= control target key start
LH: loop header
LB: loop body
LE: loop exit
PB: predicated region body
PF: predicated region fallthrough
CT: control target
= control target key end

     0   :  { %s494_s18 = smov 0   ;;  %s536_s0 = inlined_call_operand.vmem [shape: bf16[128,128], index: 0, kind: input, shape index: {}]   ;;  %s537_s1 = inlined_call_operand.vmem [shape: f32[2,1,128], index: 1, kind: input, shape index: {}]   ;;  %s538_s2 = inlined_call_operand.vmem [shape: f32[2,1,128], index: 2, kind: input, shape index: {}]   ;;  %s539_s3 = inlined_call_operand.vmem [shape: f32[1,128], index: 3, kind: input, shape index: {}]   ;;  %s540_s4 = inlined_call_operand.vmem [shape: f32[1,128], index: 4, kind: input, shape index: {}]   ;;  %s541_s5 = inlined_call_operand.vmem [shape: bf16[128,128], index: 5, kind: output, shape index: {}]  }
   0x1 LB: > { %s393_s19 = sadd.s32 4294967295, %s462_s18   ;;  %p397_p0 = scmp.ge.s32.totalorder %s462_s18, 1  ;;  %s462_s18 = sphi %s494_s18, %s15_s18  }
   0x2   : > { %p188_p1 = scmp.lt.s32.totalorder %s462_s18, 3 }
   0x4   : > { %p189_p2 = pnand %p397_p0, %p188_p1 }
   0x5   : > { %s398_s28 = sshll.u32 (!%p189_p2), %s393_s19, 3 }
   0x6   : > { %192 = sbr.rel (%p189_p2) target bundleno = 62 (0x3e), region = 40  ;;  %p217_p3 = scmp.lt.s32.totalorder (!%p189_p2), %s398_s28, 15 }
   0xb   : > { %v228_v0 = vld [vmem:[%s537_s1] sm:$0x1]  ;;  %v229_v1 = vld [vmem:[%s537_s1 + $0x1] sm:$0x1]  ;;  %vm230_vm0 = vcmask 1040384   ;;  %s543_s28 = smov (!%p217_p3, %s398_s28), 15 }
   0xc   : > { %v231_v2 = vsel %vm230_vm0, %v228_v0, 0.0  ;;  %v232_v3 = vsel %vm230_vm0, %v229_v1, 0.0  ;;  %v235_v4 = vld [vmem:[%s538_s2] sm:$0x1]  ;;  %v236_v6 = vld [vmem:[%s538_s2 + $0x1] sm:$0x1] }
   0xd   : > { %v233_v5 = vadd.f32 %v232_v3, %v231_v2  ;;  %v237_v7 = vsel %vm230_vm0, %v235_v4, 0.0  ;;  %v238_v8 = vsel %vm230_vm0, %v236_v6, 0.0  ;;  %s399_s29 = sshll.u32 %s543_s28, 2  ;;  %v243_v20 = vld [vmem:[%s539_s3] sm:$0x1] }
   0xe   : > { %v239_v10 = vadd.f32 %v238_v8, %v237_v7  ;;  %s220_s7 = scalar_lea.vmem %s536_s0, %s399_s29  ;;  %v256_v31 = vld [vmem:[%s540_s4] sm:$0x1]  ;;  %s226_s14 = scalar_lea.vmem %s541_s5, %s399_s29 }
   0xf   : > { %v234_v9 = vmul.f32 0.0078125, %v233_v5  ;;  %v405_v22 = vld [vmem:[%s220_s7] sm:$0xff]   ;;  %v440_v23 = vld [vmem:[%s220_s7 + $0x8] sm:$0xff]   ;;  %v441_v24 = vld [vmem:[%s220_s7 + $0x10] sm:$0xff]  }
  0x10   : > { %v240_v11 = vmul.f32 0.0078125, %v239_v10  ;;  %v442_v25 = vld [vmem:[%s220_s7 + $0x18] sm:$0xff]   ;;  %v406_v28 = vunpack.c.l.bf16 %v405_v22  ;;  %v407_v29 = vunpack.c.h.bf16 %v405_v22  ;;  %v410_v30 = vunpack.c.l.bf16 %v440_v23 }
  0x11   : > { %v241_v12 = vmul.f32 %v234_v9, %v234_v9  ;;  %v411_v32 = vunpack.c.h.bf16 %v440_v23  ;;  %v414_v33 = vunpack.c.l.bf16 %v441_v24  ;;  %v415_v34 = vunpack.c.h.bf16 %v441_v24 }
  0x12   : > { %v418_v35 = vunpack.c.l.bf16 %v442_v25  ;;  %v419_v37 = vunpack.c.h.bf16 %v442_v25 }
  0x13   : > { %v242_v13 = vsub.f32 %v240_v11, %v241_v12 }
  0x15   : > { %v244_v14 = vadd.f32 1e-05, %v242_v13 }
  0x17   : > { %454 = vrsqrt.f32 %v244_v14  ;;  %vm251_vm1 = vweird.f32 %v244_v14 }
  0x1d   : > { %v455_v15 = vpop.eup %454 }
  0x1e   : > { %v246_v16 = vmul.f32 %v455_v15, %v244_v14  ;;  %vm252_vm2 = vweird.f32 %v455_v15 }
  0x1f   : > { %vm253_vm3 = vmor %vm251_vm1, %vm252_vm2 }
  0x20   : > { %v247_v17 = vmul.f32 %v455_v15, %v246_v16 }
  0x22   : > { %v248_v18 = vmul.f32 0.5, %v247_v17 }
  0x24   : > { %v249_v19 = vsub.f32 1.5, %v248_v18 }
  0x26   : > { %v250_v21 = vmul.f32 %v455_v15, %v249_v19 }
  0x28   : > { %v254_v26 = vsel %vm253_vm3, %v455_v15, %v250_v21 }
  0x29   : > { %v255_v27 = vmul.f32 %v254_v26, %v243_v20 }
  0x2b   : > { %v257_v36 = vmul.f32 %v255_v27, %v234_v9  ;;  %v276_v38 = vperm.slane %v255_v27, 0 }
  0x2d   : > { %v258_v39 = vsub.f32 %v256_v31, %v257_v36  ;;  %v278_v40 = vmul.f32 %v406_v28, %v276_v38  ;;  %v279_v41 = vmul.f32 %v407_v29, %v276_v38  ;;  %v280_v42 = vmul.f32 %v410_v30, %v276_v38 }
  0x2e   : > { %v281_v43 = vmul.f32 %v411_v32, %v276_v38  ;;  %v282_v44 = vmul.f32 %v414_v33, %v276_v38  ;;  %v283_v45 = vmul.f32 %v415_v34, %v276_v38  ;;  %v284_v46 = vmul.f32 %v418_v35, %v276_v38 }
  0x2f   : > { %v287_v47 = vperm.slane %v258_v39, 0  ;;  %v285_v48 = vmul.f32 %v419_v37, %v276_v38 }
  0x31   : > { %v289_v49 = vadd.f32 %v287_v47, %v278_v40  ;;  %v290_v50 = vadd.f32 %v287_v47, %v279_v41  ;;  %v291_v51 = vadd.f32 %v287_v47, %v280_v42  ;;  %v292_v52 = vadd.f32 %v287_v47, %v281_v43 }
  0x32   : > { %v293_v53 = vadd.f32 %v287_v47, %v282_v44  ;;  %v294_v54 = vadd.f32 %v287_v47, %v283_v45  ;;  %v295_v55 = vadd.f32 %v287_v47, %v284_v46  ;;  %v296_v56 = vadd.f32 %v287_v47, %v285_v48 }
  0x33   : > { %vm297_vm4 = vcmp.ge.f32.partialorder %v289_v49, 0.0  ;;  %vm298_vm5 = vcmp.ge.f32.partialorder %v290_v50, 0.0  ;;  %v305_v57 = vmul.f32 0.2, %v289_v49  ;;  %v306_v58 = vmul.f32 0.2, %v290_v50 }
  0x34   : > { %vm299_vm6 = vcmp.ge.f32.partialorder %v291_v51, 0.0  ;;  %vm300_vm7 = vcmp.ge.f32.partialorder %v292_v52, 0.0  ;;  %v307_v59 = vmul.f32 0.2, %v291_v51  ;;  %v308_v60 = vmul.f32 0.2, %v292_v52 }
  0x35   : > { %v313_v61 = vsel %vm297_vm4, %v289_v49, %v305_v57  ;;  %v314_v62 = vsel %vm298_vm5, %v290_v50, %v306_v58  ;;  %vm301_vm8 = vcmp.ge.f32.partialorder %v293_v53, 0.0  ;;  %vm302_vm9 = vcmp.ge.f32.partialorder %v294_v54, 0.0 }
  0x36   : > { %v423_v63 = vpack.c.bf16 %v314_v62, %v313_v61  ;;  %v315_v0 = vsel %vm299_vm6, %v291_v51, %v307_v59  ;;  %v316_v1 = vsel %vm300_vm7, %v292_v52, %v308_v60  ;;  %v309_v2 = vmul.f32 0.2, %v293_v53 }
  0x37   : > { %v428_v3 = vpack.c.bf16 %v316_v1, %v315_v0  ;;  %v310_v4 = vmul.f32 0.2, %v294_v54  ;;  %vm303_vm10 = vcmp.ge.f32.partialorder %v295_v55, 0.0  ;;  %vm304_vm11 = vcmp.ge.f32.partialorder %v296_v56, 0.0 }
  0x38   : > { %424 = vst [vmem:[%s226_s14] sm:$0xff] %v423_v63   ;;  %v317_v5 = vsel %vm301_vm8, %v293_v53, %v309_v2  ;;  %v311_v6 = vmul.f32 0.2, %v295_v55  ;;  %v312_v7 = vmul.f32 0.2, %v296_v56 }
  0x39   : > { %443 = vst [vmem:[%s226_s14 + $0x8] sm:$0xff] %v428_v3   ;;  %v318_v8 = vsel %vm302_vm9, %v294_v54, %v310_v4 }
  0x3a   : > { %v433_v9 = vpack.c.bf16 %v318_v8, %v317_v5  ;;  %v319_v10 = vsel %vm303_vm10, %v295_v55, %v311_v6  ;;  %v320_v11 = vsel %vm304_vm11, %v296_v56, %v312_v7 }
  0x3b   : > { %v438_v12 = vpack.c.bf16 %v320_v11, %v319_v10 }
  0x3c   : > { %444 = vst [vmem:[%s226_s14 + $0x10] sm:$0xff] %v433_v9  }
  0x3d   : > { %445 = vst [vmem:[%s226_s14 + $0x18] sm:$0xff] %v438_v12  }
  0x3e PF: > { %s15_s18 = sadd.s32 1, %s462_s18  }
  0x3f   : > { %p12_p4 = scmp.ge.s32.totalorder %s15_s18, 4  }
  0x41   :  { %14 = sbr.rel (!%p12_p4) target bundleno = 1 (0x1), region = 70 }

// kernel: encoder_forward.11
= control target key start
LH: loop header
LB: loop body
LE: loop exit
PB: predicated region body
PF: predicated region fallthrough
CT: control target
= control target key end

     0   :  { %s740_s15 = smov 0   ;;  %s742_s16 = smov 0   ;;  %s825_s0 = inlined_call_operand.vmem [shape: bf16[128,128], index: 0, kind: input, shape index: {}]   ;;  %s826_s1 = inlined_call_operand.vmem [shape: bf16[128,128], index: 1, kind: input, shape index: {}]   ;;  %s827_s2 = inlined_call_operand.vmem [shape: bf16[128,128], index: 2, kind: output, shape index: {0}]   ;;  %s828_s3 = inlined_call_operand.vmem [shape: f32[2,1,128], index: 3, kind: output, shape index: {1}]   ;;  %s829_s4 = inlined_call_operand.vmem [shape: f32[2,1,128], index: 4, kind: output, shape index: {2}]  }
   0x1   :  { %s744_s17 = smov 0  }
   0x2 LB: > { %s27_s18 = sadd.s32 1, %s708_s16  ;;  %p551_p0 = scmp.ge.s32.totalorder %s712_s17, 1  ;;  %s712_s17 = sphi %s744_s17, %s15_s17   ;;  %s708_s16 = sphi %s742_s16, %s831_s16   ;;  %s704_s15 = sphi %s740_s15, %s830_s15  }
   0x3   : > { %p29_p1 = scmp.ge.s32.totalorder %s27_s18, 2  ;;  %p186_p2 = scmp.lt.s32.totalorder %s712_s17, 3 }
   0x5   : > { %s833_s18 = smov (%p29_p1, %s27_s18), 0  ;;  %p187_p3 = pnand %p551_p0, %p186_p2 }
   0x6   : > { %s552_s27 = sshll.u32 (!%p187_p3), %s704_s15, 3  ;;  %p236_p5 = scmp.lt.s32.totalorder (!%p187_p3), %s704_s15, 1 }
   0x7   : > { %190 = sbr.rel (%p187_p3) target bundleno = 209 (0xd1), region = 28  ;;  %p222_p4 = scmp.lt.s32.totalorder (!%p187_p3), %s552_s27, 15 }
   0xc   : > { %v617_v0 = vld [vmem:[%s826_s1 + $0x38] sm:$0xff]  ;;  %v616_v1 = vld [vmem:[%s826_s1 + $0x30] sm:$0xff]  ;;  %v615_v2 = vld [vmem:[%s826_s1 + $0x28] sm:$0xff]  ;;  %s835_s27 = smov (!%p222_p4, %s552_s27), 15  ;;  %s837_s15 = smov (!%p236_p5, %s704_s15), 1  ;;  %v714_v12 = vmov 0.0  }
   0xd   : > { %344 = vmatpush.bf16.msra.mxu0 %v617_v0  ;;  %641 = vmatpush.bf16.msra.mxu1 %v617_v0  ;;  %v614_v3 = vld [vmem:[%s826_s1 + $0x20] sm:$0xff]  ;;  %v613_v4 = vld [vmem:[%s826_s1 + $0x18] sm:$0xff]  ;;  %v612_v5 = vld [vmem:[%s826_s1 + $0x10] sm:$0xff]  ;;  %s553_s8 = sshll.u32 %s835_s27, 2  ;;  %s798_s20 = scalar_lea.vmem %s828_s3, %s837_s15 }
   0xe   : > { %642 = vmatpush.bf16.msra.mxu2 %v617_v0  ;;  %643 = vmatpush.bf16.msra.mxu3 %v617_v0  ;;  %v611_v6 = vld [vmem:[%s826_s1 + $0x8] sm:$0xff]  ;;  %v610_v7 = vld [vmem:[%s826_s1] sm:$0xff]  ;;  %s225_s13 = scalar_lea.vmem %s825_s0, %s553_s8  ;;  %s803_s23 = scalar_lea.vmem %s829_s4, %s837_s15  ;;  %246 = vst [vmem:[%s798_s20] sm:$0x1] %v714_v12 }
   0xf   : > { %v606_v8 = vld [vmem:[%s225_s13] sm:$0xff]  ;;  %v607_v9 = vld [vmem:[%s225_s13 + $0x8] sm:$0xff]  ;;  %v608_v10 = vld [vmem:[%s225_s13 + $0x10] sm:$0xff]  ;;  %247 = vst [vmem:[%s803_s23] sm:$0x1] %v714_v12  ;;  %s233_s26 = scalar_lea.vmem %s827_s2, %s553_s8 }
  0x10   : > { %v609_v11 = vld [vmem:[%s225_s13 + $0x18] sm:$0xff] }
  0x11   : > { %345 = vmatpush.bf16.msra.mxu0 %v616_v1  ;;  %644 = vmatpush.bf16.msra.mxu1 %v616_v1 }
  0x12   : > { %645 = vmatpush.bf16.msra.mxu2 %v616_v1  ;;  %646 = vmatpush.bf16.msra.mxu3 %v616_v1 }
  0x15   : > { %346 = vmatpush.bf16.msra.mxu0 %v615_v2  ;;  %647 = vmatpush.bf16.msra.mxu1 %v615_v2  ;;  %v389_v56 = vld [vmem:[%s798_s20] sm:$0x1] }
  0x16   : > { %648 = vmatpush.bf16.msra.mxu2 %v615_v2  ;;  %649 = vmatpush.bf16.msra.mxu3 %v615_v2  ;;  %v405_v59 = vld [vmem:[%s803_s23] sm:$0x1] }
  0x19   : > { %347 = vmatpush.bf16.msra.mxu0 %v614_v3  ;;  %650 = vmatpush.bf16.msra.mxu1 %v614_v3 }
  0x1a   : > { %651 = vmatpush.bf16.msra.mxu2 %v614_v3  ;;  %652 = vmatpush.bf16.msra.mxu3 %v614_v3 }
  0x1d   : > { %348 = vmatpush.bf16.msra.mxu0 %v613_v4  ;;  %653 = vmatpush.bf16.msra.mxu1 %v613_v4 }
  0x1e   : > { %654 = vmatpush.bf16.msra.mxu2 %v613_v4  ;;  %655 = vmatpush.bf16.msra.mxu3 %v613_v4 }
  0x21   : > { %349 = vmatpush.bf16.msra.mxu0 %v612_v5  ;;  %656 = vmatpush.bf16.msra.mxu1 %v612_v5 }
  0x22   : > { %657 = vmatpush.bf16.msra.mxu2 %v612_v5  ;;  %658 = vmatpush.bf16.msra.mxu3 %v612_v5 }
  0x25   : > { %350 = vmatpush.bf16.msra.mxu0 %v611_v6  ;;  %659 = vmatpush.bf16.msra.mxu1 %v611_v6 }
  0x26   : > { %660 = vmatpush.bf16.msra.mxu2 %v611_v6  ;;  %661 = vmatpush.bf16.msra.mxu3 %v611_v6 }
  0x29   : > { %351 = vmatpush.bf16.msra.mxu0 %v610_v7  ;;  %662 = vmatpush.bf16.msra.mxu1 %v610_v7 }
  0x2a   : > { %663 = vmatpush.bf16.msra.mxu2 %v610_v7  ;;  %664 = vmatpush.bf16.msra.mxu3 %v610_v7 }
  0x2c   : > { %352 = vmatmul.bf16.vlgmr.msra.gmra.mxu0 %v606_v8  ;;  %357 = vmatmul.bf16.vlgmr.msra.gmra.mxu1 %v607_v9 }
  0x2d   : > { %362 = vmatmul.bf16.vlgmr.msra.gmra.mxu2 %v608_v10  ;;  %367 = vmatmul.bf16.vlgmr.msra.gmra.mxu3 %v609_v11 }
  0xa9   : > { %v353_v13 = vpop.f32.mrf.mxu0  ;;  %v358_v14 = vpop.f32.mrf.mxu1 }
  0xaa   : > { %v406_v17 = vmul.f32 %v353_v13, %v353_v13  ;;  %v408_v24 = vmul.f32 %v358_v14, %v358_v14 }
  0xb0   : > { %v363_v15 = vpop.f32.mrf.mxu2  ;;  %v368_v16 = vpop.f32.mrf.mxu3 }
  0xb1   : > { %v355_v18 = vpop.f32.mrf.mxu0  ;;  %v360_v19 = vpop.f32.mrf.mxu1  ;;  %v410_v30 = vmul.f32 %v363_v15, %v363_v15  ;;  %v412_v40 = vmul.f32 %v368_v16, %v368_v16 }
  0xb2   : > { %v621_v20 = vpack.c.bf16 %v355_v18, %v353_v13  ;;  %v390_v21 = vadd.f32 %v355_v18, %v353_v13  ;;  %v407_v22 = vmul.f32 %v355_v18, %v355_v18  ;;  %v626_v23 = vpack.c.bf16 %v360_v19, %v358_v14 }
  0xb3   : > { %v409_v28 = vmul.f32 %v360_v19, %v360_v19 }
  0xb4   : > { %622 = vst [vmem:[%s233_s26] sm:$0xff] %v621_v20   ;;  %v414_v25 = vadd.f32 %v407_v22, %v406_v17  ;;  %v391_v26 = vadd.f32 %v390_v21, %v358_v14 }
  0xb5   : > { %638 = vst [vmem:[%s233_s26 + $0x8] sm:$0xff] %v626_v23  }
  0xb6   : > { %v392_v27 = vadd.f32 %v391_v26, %v360_v19  ;;  %v415_v29 = vadd.f32 %v414_v25, %v408_v24 }
  0xb8   : > { %v416_v31 = vadd.f32 %v415_v29, %v409_v28  ;;  %v365_v32 = vpop.f32.mrf.mxu2  ;;  %v393_v33 = vadd.f32 %v392_v27, %v363_v15  ;;  %v370_v34 = vpop.f32.mrf.mxu3 }
  0xb9   : > { %v631_v35 = vpack.c.bf16 %v365_v32, %v363_v15  ;;  %v636_v36 = vpack.c.bf16 %v370_v34, %v368_v16  ;;  %v411_v38 = vmul.f32 %v365_v32, %v365_v32  ;;  %v413_v44 = vmul.f32 %v370_v34, %v370_v34 }
  0xba   : > { %v394_v37 = vadd.f32 %v393_v33, %v365_v32  ;;  %v417_v39 = vadd.f32 %v416_v31, %v410_v30 }
  0xbb   : > { %639 = vst [vmem:[%s233_s26 + $0x10] sm:$0xff] %v631_v35  }
  0xbc   : > { %v418_v41 = vadd.f32 %v417_v39, %v411_v38  ;;  %640 = vst [vmem:[%s233_s26 + $0x18] sm:$0xff] %v636_v36   ;;  %v395_v42 = vadd.f32 %v394_v37, %v368_v16 }
  0xbe   : > { %v396_v43 = vadd.f32 %v395_v42, %v370_v34  ;;  %v419_v45 = vadd.f32 %v418_v41, %v412_v40 }
  0xc0   : > { %v397_v46 = vrot.slane %v396_v43, 4  ;;  %v420_v47 = vadd.f32 %v419_v45, %v413_v44 }
  0xc2   : > { %v398_v48 = vadd.f32 %v397_v46, %v396_v43  ;;  %v421_v49 = vrot.slane %v420_v47, 4 }
  0xc4   : > { %v399_v50 = vrot.slane %v398_v48, 2  ;;  %v422_v51 = vadd.f32 %v421_v49, %v420_v47 }
  0xc6   : > { %v400_v52 = vadd.f32 %v399_v50, %v398_v48  ;;  %v423_v53 = vrot.slane %v422_v51, 2 }
  0xc8   : > { %v401_v54 = vrot.slane %v400_v52, 1  ;;  %v424_v55 = vadd.f32 %v423_v53, %v422_v51 }
  0xca   : > { %v402_v57 = vadd.f32 %v401_v54, %v400_v52  ;;  %v425_v58 = vrot.slane %v424_v55, 1 }
  0xcc   : > { %v403_v60 = vadd.f32 %v402_v57, %v389_v56  ;;  %v426_v61 = vadd.f32 %v425_v58, %v424_v55 }
  0xce   : > { %404 = vst [vmem:[%s798_s20] sm:$0x1] %v403_v60  ;;  %v427_v62 = vadd.f32 %v426_v61, %v405_v59 }
  0xd0   : > { %428 = vst [vmem:[%s803_s23] sm:$0x1] %v427_v62 }
  0xd1 PF: > { %s15_s17 = sadd.s32 1, %s712_s17   ;;  %s830_s15 = smov %s708_s16 }
  0xd2   : > { %p12_p6 = scmp.ge.s32.totalorder %s15_s17, 4   ;;  %s831_s16 = smov %s833_s18 }
  0xd4   :  { %14 = sbr.rel (!%p12_p6) target bundleno = 2 (0x2), region = 86 }

// kernel: encoder_forward.13
= control target key start
LH: loop header
LB: loop body
LE: loop exit
PB: predicated region body
PF: predicated region fallthrough
CT: control target
= control target key end

     0   :  { %s746_s15 = smov 0   ;;  %s748_s16 = smov 0   ;;  %s852_s0 = inlined_call_operand.vmem [shape: bf16[32,256], index: 0, kind: input, shape index: {}]   ;;  %s853_s1 = inlined_call_operand.vmem [shape: bf16[256,128], index: 1, kind: input, shape index: {}]   ;;  %s854_s2 = inlined_call_operand.vmem [shape: bf16[32,128], index: 2, kind: output, shape index: {0}]   ;;  %s855_s3 = inlined_call_operand.vmem [shape: f32[2,1,128], index: 3, kind: output, shape index: {1}]   ;;  %s856_s4 = inlined_call_operand.vmem [shape: f32[2,1,128], index: 4, kind: output, shape index: {2}]  }
   0x1   :  { %s750_s17 = smov 0  }
   0x2 LB: > { %s27_s18 = sadd.s32 1, %s714_s16  ;;  %p567_p0 = scmp.ge.s32.totalorder %s718_s17, 1  ;;  %s718_s17 = sphi %s750_s17, %s15_s17   ;;  %s714_s16 = sphi %s748_s16, %s858_s16   ;;  %s710_s15 = sphi %s746_s15, %s857_s15  }
   0x3   : > { %p29_p1 = scmp.ge.s32.totalorder %s27_s18, 2  ;;  %p187_p2 = scmp.lt.s32.totalorder %s718_s17, 3 }
   0x5   : > { %s860_s18 = smov (%p29_p1, %s27_s18), 0  ;;  %p188_p3 = pnand %p567_p0, %p187_p2 }
   0x6   : > { %s568_s5 = sshll.u32 (!%p188_p3), %s710_s15, 1  ;;  %p239_p5 = scmp.lt.s32.totalorder (!%p188_p3), %s710_s15, 1 }
   0x7   : > { %191 = sbr.rel (%p188_p3) target bundleno = 200 (0xc8), region = 28  ;;  %p224_p4 = scmp.lt.s32.totalorder (!%p188_p3), %s568_s5, 3 }
   0xc   : > { %v657_v0 = vld [vmem:[%s853_s1 + $0x38] sm:$0xff]  ;;  %v656_v2 = vld [vmem:[%s853_s1 + $0x30] sm:$0xff]  ;;  %v655_v4 = vld [vmem:[%s853_s1 + $0x28] sm:$0xff]  ;;  %s862_s5 = smov (!%p224_p4, %s568_s5), 3  ;;  %s864_s15 = smov (!%p239_p5, %s710_s15), 1  ;;  %v720_v22 = vmov 0.0  }
   0xd   : > { %v665_v1 = vld [vmem:[%s853_s1 + $0x78] sm:$0xff]  ;;  %391 = vmatpush.bf16.msra.mxu0 %v657_v0  ;;  %v664_v3 = vld [vmem:[%s853_s1 + $0x70] sm:$0xff]  ;;  %v663_v5 = vld [vmem:[%s853_s1 + $0x68] sm:$0xff]  ;;  %s647_s22 = sshll.u32 %s862_s5, 3  ;;  %s826_s11 = scalar_lea.vmem %s855_s3, %s864_s15 }
   0xe   : > { %405 = vmatpush.bf16.msra.mxu1 %v665_v1  ;;  %v654_v6 = vld [vmem:[%s853_s1 + $0x20] sm:$0xff]  ;;  %v653_v8 = vld [vmem:[%s853_s1 + $0x18] sm:$0xff]  ;;  %v652_v10 = vld [vmem:[%s853_s1 + $0x10] sm:$0xff]  ;;  %s228_s29 = scalar_lea.vmem %s852_s0, %s647_s22  ;;  %s831_s14 = scalar_lea.vmem %s856_s4, %s864_s15  ;;  %249 = vst [vmem:[%s826_s11] sm:$0x1] %v720_v22 }
   0xf   : > { %v662_v7 = vld [vmem:[%s853_s1 + $0x60] sm:$0xff]  ;;  %v661_v9 = vld [vmem:[%s853_s1 + $0x58] sm:$0xff]  ;;  %v660_v11 = vld [vmem:[%s853_s1 + $0x50] sm:$0xff]  ;;  %250 = vst [vmem:[%s831_s14] sm:$0x1] %v720_v22  ;;  %s572_s19 = sshll.u32 %s862_s5, 2 }
  0x10   : > { %v651_v12 = vld [vmem:[%s853_s1 + $0x8] sm:$0xff]  ;;  %v650_v14 = vld [vmem:[%s853_s1] sm:$0xff]  ;;  %s236_s22 = scalar_lea.vmem %s854_s2, %s572_s19 }
  0x11   : > { %392 = vmatpush.bf16.msra.mxu0 %v656_v2  ;;  %v659_v13 = vld [vmem:[%s853_s1 + $0x48] sm:$0xff]  ;;  %v658_v15 = vld [vmem:[%s853_s1 + $0x40] sm:$0xff] }
  0x12   : > { %406 = vmatpush.bf16.msra.mxu1 %v664_v3  ;;  %v575_v16 = vld [vmem:[%s228_s29] sm:$0xf]  ;;  %v649_v17 = vld [vmem:[%s228_s29 + $0x4] sm:$0xf0]  ;;  %v648_v18 = vld [vmem:[%s228_s29 + $0x4] sm:$0xf] }
  0x13   : > { %v577_v19 = vld [vmem:[%s228_s29 + $0x8] sm:$0xf0]  ;;  %v576_v20 = vor.u32 %v649_v17, %v575_v16 }
  0x14   : > { %v580_v21 = vor.u32 %v648_v18, %v577_v19 }
  0x15   : > { %393 = vmatpush.bf16.msra.mxu0 %v655_v4  ;;  %v423_v43 = vld [vmem:[%s826_s11] sm:$0x1] }
  0x16   : > { %407 = vmatpush.bf16.msra.mxu1 %v663_v5  ;;  %v433_v46 = vld [vmem:[%s831_s14] sm:$0x1] }
  0x19   : > { %394 = vmatpush.bf16.msra.mxu0 %v654_v6 }
  0x1a   : > { %408 = vmatpush.bf16.msra.mxu1 %v662_v7 }
  0x1d   : > { %395 = vmatpush.bf16.msra.mxu0 %v653_v8 }
  0x1e   : > { %409 = vmatpush.bf16.msra.mxu1 %v661_v9 }
  0x21   : > { %396 = vmatpush.bf16.msra.mxu0 %v652_v10 }
  0x22   : > { %410 = vmatpush.bf16.msra.mxu1 %v660_v11 }
  0x25   : > { %397 = vmatpush.bf16.msra.mxu0 %v651_v12 }
  0x26   : > { %411 = vmatpush.bf16.msra.mxu1 %v659_v13 }
  0x29   : > { %398 = vmatpush.bf16.msra.mxu0 %v650_v14 }
  0x2a   : > { %412 = vmatpush.bf16.msra.mxu1 %v658_v15 }
  0x2c   : > { %399 = vmatmul.bf16.vlgmr.msra.gmra.mxu0 %v576_v20 }
  0x2d   : > { %413 = vmatmul.bf16.vlgmr.msra.gmra.mxu1 %v580_v21 }
  0xa9   : > { %v400_v23 = vpop.f32.mrf.mxu0 }
  0xaa   : > { %v414_v24 = vpop.f32.mrf.mxu1 }
  0xab   : > { %v415_v25 = vadd.f32 %v414_v24, %v400_v23 }
  0xad   : > { %v434_v29 = vmul.f32 %v415_v25, %v415_v25 }
  0xb1   : > { %v402_v26 = vpop.f32.mrf.mxu0 }
  0xb2   : > { %v416_v27 = vpop.f32.mrf.mxu1 }
  0xb3   : > { %v417_v28 = vadd.f32 %v416_v27, %v402_v26 }
  0xb5   : > { %v669_v30 = vpack.c.bf16 %v417_v28, %v415_v25  ;;  %v424_v31 = vadd.f32 %v417_v28, %v415_v25  ;;  %v435_v32 = vmul.f32 %v417_v28, %v417_v28 }
  0xb7   : > { %670 = vst [vmem:[%s236_s22] sm:$0xff] %v669_v30   ;;  %v425_v33 = vrot.slane %v424_v31, 4  ;;  %v436_v34 = vadd.f32 %v435_v32, %v434_v29 }
  0xb9   : > { %v426_v35 = vadd.f32 %v425_v33, %v424_v31  ;;  %v437_v36 = vrot.slane %v436_v34, 4 }
  0xbb   : > { %v427_v37 = vrot.slane %v426_v35, 2  ;;  %v438_v38 = vadd.f32 %v437_v36, %v436_v34 }
  0xbd   : > { %v428_v39 = vadd.f32 %v427_v37, %v426_v35  ;;  %v439_v40 = vrot.slane %v438_v38, 2 }
  0xbf   : > { %v429_v41 = vrot.slane %v428_v39, 1  ;;  %v440_v42 = vadd.f32 %v439_v40, %v438_v38 }
  0xc1   : > { %v430_v44 = vadd.f32 %v429_v41, %v428_v39  ;;  %v441_v45 = vrot.slane %v440_v42, 1 }
  0xc3   : > { %v431_v47 = vadd.f32 %v430_v44, %v423_v43  ;;  %v442_v48 = vadd.f32 %v441_v45, %v440_v42 }
  0xc5   : > { %432 = vst [vmem:[%s826_s11] sm:$0x1] %v431_v47  ;;  %v443_v49 = vadd.f32 %v442_v48, %v433_v46 }
  0xc7   : > { %444 = vst [vmem:[%s831_s14] sm:$0x1] %v443_v49 }
  0xc8 PF: > { %s15_s17 = sadd.s32 1, %s718_s17   ;;  %s857_s15 = smov %s714_s16 }
  0xc9   : > { %p12_p6 = scmp.ge.s32.totalorder %s15_s17, 4   ;;  %s858_s16 = smov %s860_s18 }
  0xcb   :  { %14 = sbr.rel (!%p12_p6) target bundleno = 2 (0x2), region = 86 }

// kernel: encoder_forward.14
= control target key start
LH: loop header
LB: loop body
LE: loop exit
PB: predicated region body
PF: predicated region fallthrough
CT: control target
= control target key end

     0   :  { %s407_s18 = smov 0   ;;  %s445_s0 = inlined_call_operand.vmem [shape: bf16[32,128], index: 0, kind: input, shape index: {}]   ;;  %s446_s1 = inlined_call_operand.vmem [shape: f32[2,1,128], index: 1, kind: input, shape index: {}]   ;;  %s447_s2 = inlined_call_operand.vmem [shape: f32[2,1,128], index: 2, kind: input, shape index: {}]   ;;  %s448_s3 = inlined_call_operand.vmem [shape: f32[1,128], index: 3, kind: input, shape index: {}]   ;;  %s449_s4 = inlined_call_operand.vmem [shape: f32[1,128], index: 4, kind: input, shape index: {}]   ;;  %s450_s5 = inlined_call_operand.vmem [shape: bf16[32,128], index: 5, kind: output, shape index: {}]  }
   0x1 LB: > { %s339_s19 = sadd.s32 4294967295, %s375_s18   ;;  %p343_p0 = scmp.ge.s32.totalorder %s375_s18, 1  ;;  %s375_s18 = sphi %s407_s18, %s15_s18  }
   0x2   : > { %p188_p1 = scmp.lt.s32.totalorder %s375_s18, 3 }
   0x4   : > { %p189_p2 = pnand %p343_p0, %p188_p1 }
   0x5   : > { %s344_s28 = sshll.u32 (!%p189_p2), %s339_s19, 1 }
   0x6   : > { %192 = sbr.rel (%p189_p2) target bundleno = 57 (0x39), region = 40  ;;  %p217_p3 = scmp.lt.s32.totalorder (!%p189_p2), %s344_s28, 3 }
   0xb   : > { %v228_v0 = vld [vmem:[%s446_s1] sm:$0x1]  ;;  %v229_v1 = vld [vmem:[%s446_s1 + $0x1] sm:$0x1]  ;;  %vm230_vm0 = vcmask 1040384   ;;  %s452_s28 = smov (!%p217_p3, %s344_s28), 3 }
   0xc   : > { %v231_v2 = vsel %vm230_vm0, %v228_v0, 0.0  ;;  %v232_v3 = vsel %vm230_vm0, %v229_v1, 0.0  ;;  %v235_v4 = vld [vmem:[%s447_s2] sm:$0x1]  ;;  %v236_v6 = vld [vmem:[%s447_s2 + $0x1] sm:$0x1] }
   0xd   : > { %v233_v5 = vadd.f32 %v232_v3, %v231_v2  ;;  %v237_v7 = vsel %vm230_vm0, %v235_v4, 0.0  ;;  %v238_v8 = vsel %vm230_vm0, %v236_v6, 0.0  ;;  %s345_s29 = sshll.u32 %s452_s28, 2  ;;  %v243_v20 = vld [vmem:[%s448_s3] sm:$0x1] }
   0xe   : > { %v239_v10 = vadd.f32 %v238_v8, %v237_v7  ;;  %s220_s7 = scalar_lea.vmem %s445_s0, %s345_s29  ;;  %v256_v27 = vld [vmem:[%s449_s4] sm:$0x1]  ;;  %s226_s14 = scalar_lea.vmem %s450_s5, %s345_s29 }
   0xf   : > { %v234_v9 = vmul.f32 0.03125, %v233_v5  ;;  %v351_v22 = vld [vmem:[%s220_s7] sm:$0xff]  }
  0x10   : > { %v240_v11 = vmul.f32 0.03125, %v239_v10  ;;  %v352_v25 = vunpack.c.l.bf16 %v351_v22  ;;  %v353_v26 = vunpack.c.h.bf16 %v351_v22 }
  0x11   : > { %v241_v12 = vmul.f32 %v234_v9, %v234_v9 }
  0x13   : > { %v242_v13 = vsub.f32 %v240_v11, %v241_v12 }
  0x15   : > { %v244_v14 = vadd.f32 1e-05, %v242_v13 }
  0x17   : > { %367 = vrsqrt.f32 %v244_v14  ;;  %vm251_vm1 = vweird.f32 %v244_v14 }
  0x1d   : > { %v368_v15 = vpop.eup %367 }
  0x1e   : > { %v246_v16 = vmul.f32 %v368_v15, %v244_v14  ;;  %vm252_vm2 = vweird.f32 %v368_v15 }
  0x1f   : > { %vm253_vm3 = vmor %vm251_vm1, %vm252_vm2 }
  0x20   : > { %v247_v17 = vmul.f32 %v368_v15, %v246_v16 }
  0x22   : > { %v248_v18 = vmul.f32 0.5, %v247_v17 }
  0x24   : > { %v249_v19 = vsub.f32 1.5, %v248_v18 }
  0x26   : > { %v250_v21 = vmul.f32 %v368_v15, %v249_v19 }
  0x28   : > { %v254_v23 = vsel %vm253_vm3, %v368_v15, %v250_v21 }
  0x29   : > { %v255_v24 = vmul.f32 %v254_v23, %v243_v20 }
  0x2b   : > { %v257_v28 = vmul.f32 %v255_v24, %v234_v9  ;;  %v264_v29 = vperm.slane %v255_v24, 0 }
  0x2d   : > { %v258_v30 = vsub.f32 %v256_v27, %v257_v28  ;;  %v266_v31 = vmul.f32 %v352_v25, %v264_v29  ;;  %v267_v32 = vmul.f32 %v353_v26, %v264_v29 }
  0x2f   : > { %v269_v33 = vperm.slane %v258_v30, 0 }
  0x31   : > { %v271_v34 = vadd.f32 %v269_v33, %v266_v31  ;;  %v272_v35 = vadd.f32 %v269_v33, %v267_v32 }
  0x33   : > { %vm273_vm4 = vcmp.ge.f32.partialorder %v271_v34, 0.0  ;;  %vm274_vm5 = vcmp.ge.f32.partialorder %v272_v35, 0.0  ;;  %v275_v36 = vmul.f32 0.2, %v271_v34  ;;  %v276_v37 = vmul.f32 0.2, %v272_v35 }
  0x35   : > { %v277_v38 = vsel %vm273_vm4, %v271_v34, %v275_v36  ;;  %v278_v39 = vsel %vm274_vm5, %v272_v35, %v276_v37 }
  0x36   : > { %v357_v40 = vpack.c.bf16 %v278_v39, %v277_v38 }
  0x38   : > { %358 = vst [vmem:[%s226_s14] sm:$0xff] %v357_v40  }
  0x39 PF: > { %s15_s18 = sadd.s32 1, %s375_s18  }
  0x3a   : > { %p12_p4 = scmp.ge.s32.totalorder %s15_s18, 4  }
  0x3c   :  { %14 = sbr.rel (!%p12_p4) target bundleno = 1 (0x1), region = 70 }

// kernel: encoder_forward.16
= control target key start
LH: loop header
LB: loop body
LE: loop exit
PB: predicated region body
PF: predicated region fallthrough
CT: control target
= control target key end

     0   :  { %s407_s18 = smov 0   ;;  %s445_s0 = inlined_call_operand.vmem [shape: bf16[32,128], index: 0, kind: input, shape index: {}]   ;;  %s446_s1 = inlined_call_operand.vmem [shape: f32[2,1,128], index: 1, kind: input, shape index: {}]   ;;  %s447_s2 = inlined_call_operand.vmem [shape: f32[2,1,128], index: 2, kind: input, shape index: {}]   ;;  %s448_s3 = inlined_call_operand.vmem [shape: f32[1,128], index: 3, kind: input, shape index: {}]   ;;  %s449_s4 = inlined_call_operand.vmem [shape: f32[1,128], index: 4, kind: input, shape index: {}]   ;;  %s450_s5 = inlined_call_operand.vmem [shape: bf16[32,128], index: 5, kind: output, shape index: {}]  }
   0x1 LB: > { %s339_s19 = sadd.s32 4294967295, %s375_s18   ;;  %p343_p0 = scmp.ge.s32.totalorder %s375_s18, 1  ;;  %s375_s18 = sphi %s407_s18, %s15_s18  }
   0x2   : > { %p188_p1 = scmp.lt.s32.totalorder %s375_s18, 3 }
   0x4   : > { %p189_p2 = pnand %p343_p0, %p188_p1 }
   0x5   : > { %s344_s28 = sshll.u32 (!%p189_p2), %s339_s19, 1 }
   0x6   : > { %192 = sbr.rel (%p189_p2) target bundleno = 57 (0x39), region = 40  ;;  %p217_p3 = scmp.lt.s32.totalorder (!%p189_p2), %s344_s28, 3 }
   0xb   : > { %v228_v0 = vld [vmem:[%s446_s1] sm:$0x1]  ;;  %v229_v1 = vld [vmem:[%s446_s1 + $0x1] sm:$0x1]  ;;  %vm230_vm0 = vcmask 1040384   ;;  %s452_s28 = smov (!%p217_p3, %s344_s28), 3 }
   0xc   : > { %v231_v2 = vsel %vm230_vm0, %v228_v0, 0.0  ;;  %v232_v3 = vsel %vm230_vm0, %v229_v1, 0.0  ;;  %v235_v4 = vld [vmem:[%s447_s2] sm:$0x1]  ;;  %v236_v6 = vld [vmem:[%s447_s2 + $0x1] sm:$0x1] }
   0xd   : > { %v233_v5 = vadd.f32 %v232_v3, %v231_v2  ;;  %v237_v7 = vsel %vm230_vm0, %v235_v4, 0.0  ;;  %v238_v8 = vsel %vm230_vm0, %v236_v6, 0.0  ;;  %s345_s29 = sshll.u32 %s452_s28, 2  ;;  %v243_v20 = vld [vmem:[%s448_s3] sm:$0x1] }
   0xe   : > { %v239_v10 = vadd.f32 %v238_v8, %v237_v7  ;;  %s220_s7 = scalar_lea.vmem %s445_s0, %s345_s29  ;;  %v256_v27 = vld [vmem:[%s449_s4] sm:$0x1]  ;;  %s226_s14 = scalar_lea.vmem %s450_s5, %s345_s29 }
   0xf   : > { %v234_v9 = vmul.f32 0.125, %v233_v5  ;;  %v351_v22 = vld [vmem:[%s220_s7] sm:$0xff]  }
  0x10   : > { %v240_v11 = vmul.f32 0.125, %v239_v10  ;;  %v352_v25 = vunpack.c.l.bf16 %v351_v22  ;;  %v353_v26 = vunpack.c.h.bf16 %v351_v22 }
  0x11   : > { %v241_v12 = vmul.f32 %v234_v9, %v234_v9 }
  0x13   : > { %v242_v13 = vsub.f32 %v240_v11, %v241_v12 }
  0x15   : > { %v244_v14 = vadd.f32 1e-05, %v242_v13 }
  0x17   : > { %367 = vrsqrt.f32 %v244_v14  ;;  %vm251_vm1 = vweird.f32 %v244_v14 }
  0x1d   : > { %v368_v15 = vpop.eup %367 }
  0x1e   : > { %v246_v16 = vmul.f32 %v368_v15, %v244_v14  ;;  %vm252_vm2 = vweird.f32 %v368_v15 }
  0x1f   : > { %vm253_vm3 = vmor %vm251_vm1, %vm252_vm2 }
  0x20   : > { %v247_v17 = vmul.f32 %v368_v15, %v246_v16 }
  0x22   : > { %v248_v18 = vmul.f32 0.5, %v247_v17 }
  0x24   : > { %v249_v19 = vsub.f32 1.5, %v248_v18 }
  0x26   : > { %v250_v21 = vmul.f32 %v368_v15, %v249_v19 }
  0x28   : > { %v254_v23 = vsel %vm253_vm3, %v368_v15, %v250_v21 }
  0x29   : > { %v255_v24 = vmul.f32 %v254_v23, %v243_v20 }
  0x2b   : > { %v257_v28 = vmul.f32 %v255_v24, %v234_v9  ;;  %v264_v29 = vperm.slane %v255_v24, 0 }
  0x2d   : > { %v258_v30 = vsub.f32 %v256_v27, %v257_v28  ;;  %v266_v31 = vmul.f32 %v352_v25, %v264_v29  ;;  %v267_v32 = vmul.f32 %v353_v26, %v264_v29 }
  0x2f   : > { %v269_v33 = vperm.slane %v258_v30, 0 }
  0x31   : > { %v271_v34 = vadd.f32 %v269_v33, %v266_v31  ;;  %v272_v35 = vadd.f32 %v269_v33, %v267_v32 }
  0x33   : > { %vm273_vm4 = vcmp.ge.f32.partialorder %v271_v34, 0.0  ;;  %vm274_vm5 = vcmp.ge.f32.partialorder %v272_v35, 0.0  ;;  %v275_v36 = vmul.f32 0.2, %v271_v34  ;;  %v276_v37 = vmul.f32 0.2, %v272_v35 }
  0x35   : > { %v277_v38 = vsel %vm273_vm4, %v271_v34, %v275_v36  ;;  %v278_v39 = vsel %vm274_vm5, %v272_v35, %v276_v37 }
  0x36   : > { %v357_v40 = vpack.c.bf16 %v278_v39, %v277_v38 }
  0x38   : > { %358 = vst [vmem:[%s226_s14] sm:$0xff] %v357_v40  }
  0x39 PF: > { %s15_s18 = sadd.s32 1, %s375_s18  }
  0x3a   : > { %p12_p4 = scmp.ge.s32.totalorder %s15_s18, 4  }
  0x3c   :  { %14 = sbr.rel (!%p12_p4) target bundleno = 1 (0x1), region = 70 }

// kernel: encoder_forward.15
= control target key start
LH: loop header
LB: loop body
LE: loop exit
PB: predicated region body
PF: predicated region fallthrough
CT: control target
= control target key end

     0   :  { %s1004_s15 = smov 0   ;;  %s1006_s16 = smov 0   ;;  %s1158_s0 = inlined_call_operand.vmem [shape: bf16[32,512], index: 0, kind: input, shape index: {}]   ;;  %s1159_s1 = inlined_call_operand.vmem [shape: bf16[512,128], index: 1, kind: input, shape index: {}]   ;;  %s1160_s2 = inlined_call_operand.vmem [shape: bf16[32,128], index: 2, kind: output, shape index: {0}]   ;;  %s1161_s3 = inlined_call_operand.vmem [shape: f32[2,1,128], index: 3, kind: output, shape index: {1}]   ;;  %s1162_s4 = inlined_call_operand.vmem [shape: f32[2,1,128], index: 4, kind: output, shape index: {2}]  }
   0x1   :  { %s1008_s17 = smov 0  }
   0x2 LB: > { %s27_s18 = sadd.s32 1, %s972_s16  ;;  %p735_p0 = scmp.ge.s32.totalorder %s976_s17, 1  ;;  %s976_s17 = sphi %s1008_s17, %s15_s17   ;;  %s972_s16 = sphi %s1006_s16, %s1164_s16   ;;  %s968_s15 = sphi %s1004_s15, %s1163_s15  }
   0x3   : > { %p29_p1 = scmp.ge.s32.totalorder %s27_s18, 2  ;;  %p187_p2 = scmp.lt.s32.totalorder %s976_s17, 3 }
   0x5   : > { %s1166_s18 = smov (%p29_p1, %s27_s18), 0  ;;  %p188_p3 = pnand %p735_p0, %p187_p2 }
   0x6   : > { %s736_s21 = sshll.u32 (!%p188_p3), %s968_s15, 1  ;;  %p239_p5 = scmp.lt.s32.totalorder (!%p188_p3), %s968_s15, 1 }
   0x7   : > { %191 = sbr.rel (%p188_p3) target bundleno = 209 (0xd1), region = 28  ;;  %p224_p4 = scmp.lt.s32.totalorder (!%p188_p3), %s736_s21, 3 }
   0xc   : > { %v899_v0 = vld [vmem:[%s1159_s1 + $0x38] sm:$0xff]  ;;  %v898_v4 = vld [vmem:[%s1159_s1 + $0x30] sm:$0xff]  ;;  %v897_v8 = vld [vmem:[%s1159_s1 + $0x28] sm:$0xff]  ;;  %s1168_s21 = smov (!%p224_p4, %s736_s21), 3  ;;  %s1170_s15 = smov (!%p239_p5, %s968_s15), 1  ;;  %v978_v44 = vmov 0.0  }
   0xd   : > { %v907_v1 = vld [vmem:[%s1159_s1 + $0x78] sm:$0xff]  ;;  %531 = vmatpush.bf16.msra.mxu0 %v899_v0  ;;  %v906_v5 = vld [vmem:[%s1159_s1 + $0x70] sm:$0xff]  ;;  %v905_v9 = vld [vmem:[%s1159_s1 + $0x68] sm:$0xff]  ;;  %s887_s25 = sshll.u32 %s1168_s21, 4  ;;  %s1132_s26 = scalar_lea.vmem %s1161_s3, %s1170_s15 }
   0xe   : > { %v915_v2 = vld [vmem:[%s1159_s1 + $0xb8] sm:$0xff]  ;;  %545 = vmatpush.bf16.msra.mxu1 %v907_v1  ;;  %v914_v6 = vld [vmem:[%s1159_s1 + $0xb0] sm:$0xff]  ;;  %v913_v10 = vld [vmem:[%s1159_s1 + $0xa8] sm:$0xff]  ;;  %s228_s6 = scalar_lea.vmem %s1158_s0, %s887_s25  ;;  %s1137_s29 = scalar_lea.vmem %s1162_s4, %s1170_s15  ;;  %249 = vst [vmem:[%s1132_s26] sm:$0x1] %v978_v44 }
   0xf   : > { %v923_v3 = vld [vmem:[%s1159_s1 + $0xf8] sm:$0xff]  ;;  %559 = vmatpush.bf16.msra.mxu2 %v915_v2  ;;  %v922_v7 = vld [vmem:[%s1159_s1 + $0xf0] sm:$0xff]  ;;  %v921_v11 = vld [vmem:[%s1159_s1 + $0xe8] sm:$0xff]  ;;  %250 = vst [vmem:[%s1137_s29] sm:$0x1] %v978_v44  ;;  %s740_s30 = sshll.u32 %s1168_s21, 2 }
  0x10   : > { %573 = vmatpush.bf16.msra.mxu3 %v923_v3  ;;  %v896_v12 = vld [vmem:[%s1159_s1 + $0x20] sm:$0xff]  ;;  %v895_v16 = vld [vmem:[%s1159_s1 + $0x18] sm:$0xff]  ;;  %v894_v20 = vld [vmem:[%s1159_s1 + $0x10] sm:$0xff] }
  0x11   : > { %532 = vmatpush.bf16.msra.mxu0 %v898_v4  ;;  %v904_v13 = vld [vmem:[%s1159_s1 + $0x60] sm:$0xff]  ;;  %v903_v17 = vld [vmem:[%s1159_s1 + $0x58] sm:$0xff]  ;;  %v902_v21 = vld [vmem:[%s1159_s1 + $0x50] sm:$0xff] }
  0x12   : > { %546 = vmatpush.bf16.msra.mxu1 %v906_v5  ;;  %v912_v14 = vld [vmem:[%s1159_s1 + $0xa0] sm:$0xff]  ;;  %v911_v18 = vld [vmem:[%s1159_s1 + $0x98] sm:$0xff]  ;;  %v910_v22 = vld [vmem:[%s1159_s1 + $0x90] sm:$0xff] }
  0x13   : > { %560 = vmatpush.bf16.msra.mxu2 %v914_v6  ;;  %v920_v15 = vld [vmem:[%s1159_s1 + $0xe0] sm:$0xff]  ;;  %v919_v19 = vld [vmem:[%s1159_s1 + $0xd8] sm:$0xff]  ;;  %v918_v23 = vld [vmem:[%s1159_s1 + $0xd0] sm:$0xff] }
  0x14   : > { %574 = vmatpush.bf16.msra.mxu3 %v922_v7  ;;  %v893_v24 = vld [vmem:[%s1159_s1 + $0x8] sm:$0xff]  ;;  %v892_v28 = vld [vmem:[%s1159_s1] sm:$0xff]  ;;  %v890_v33 = vld [vmem:[%s228_s6 + $0xc] sm:$0xf0] }
  0x15   : > { %533 = vmatpush.bf16.msra.mxu0 %v897_v8  ;;  %v901_v25 = vld [vmem:[%s1159_s1 + $0x48] sm:$0xff]  ;;  %v900_v29 = vld [vmem:[%s1159_s1 + $0x40] sm:$0xff]  ;;  %v745_v35 = vld [vmem:[%s228_s6 + $0x10] sm:$0xf0] }
  0x16   : > { %547 = vmatpush.bf16.msra.mxu1 %v905_v9  ;;  %v909_v26 = vld [vmem:[%s1159_s1 + $0x88] sm:$0xff]  ;;  %v908_v30 = vld [vmem:[%s1159_s1 + $0x80] sm:$0xff]  ;;  %v891_v37 = vld [vmem:[%s228_s6 + $0x14] sm:$0xf0] }
  0x17   : > { %561 = vmatpush.bf16.msra.mxu2 %v913_v10  ;;  %v917_v27 = vld [vmem:[%s1159_s1 + $0xc8] sm:$0xff]  ;;  %v916_v31 = vld [vmem:[%s1159_s1 + $0xc0] sm:$0xff]  ;;  %v753_v39 = vld [vmem:[%s228_s6 + $0x18] sm:$0xf0] }
  0x18   : > { %575 = vmatpush.bf16.msra.mxu3 %v921_v11  ;;  %v743_v32 = vld [vmem:[%s228_s6] sm:$0xf]  ;;  %v888_v34 = vld [vmem:[%s228_s6 + $0x4] sm:$0xf]  ;;  %v751_v36 = vld [vmem:[%s228_s6 + $0x8] sm:$0xf] }
  0x19   : > { %534 = vmatpush.bf16.msra.mxu0 %v896_v12  ;;  %v889_v38 = vld [vmem:[%s228_s6 + $0xc] sm:$0xf]  ;;  %v744_v40 = vor.u32 %v890_v33, %v743_v32  ;;  %v748_v41 = vor.u32 %v888_v34, %v745_v35  ;;  %v752_v42 = vor.u32 %v891_v37, %v751_v36  ;;  %s236_s6 = scalar_lea.vmem %s1160_s2, %s740_s30  ;;  %v591_v9 = vld [vmem:[%s1132_s26] sm:$0x1] }
  0x1a   : > { %548 = vmatpush.bf16.msra.mxu1 %v904_v13  ;;  %v756_v43 = vor.u32 %v889_v38, %v753_v39  ;;  %v601_v12 = vld [vmem:[%s1137_s29] sm:$0x1] }
  0x1b   : > { %562 = vmatpush.bf16.msra.mxu2 %v912_v14 }
  0x1c   : > { %576 = vmatpush.bf16.msra.mxu3 %v920_v15 }
  0x1d   : > { %535 = vmatpush.bf16.msra.mxu0 %v895_v16 }
  0x1e   : > { %549 = vmatpush.bf16.msra.mxu1 %v903_v17 }
  0x1f   : > { %563 = vmatpush.bf16.msra.mxu2 %v911_v18 }
  0x20   : > { %577 = vmatpush.bf16.msra.mxu3 %v919_v19 }
  0x21   : > { %536 = vmatpush.bf16.msra.mxu0 %v894_v20 }
  0x22   : > { %550 = vmatpush.bf16.msra.mxu1 %v902_v21 }
  0x23   : > { %564 = vmatpush.bf16.msra.mxu2 %v910_v22 }
  0x24   : > { %578 = vmatpush.bf16.msra.mxu3 %v918_v23 }
  0x25   : > { %537 = vmatpush.bf16.msra.mxu0 %v893_v24 }
  0x26   : > { %551 = vmatpush.bf16.msra.mxu1 %v901_v25 }
  0x27   : > { %565 = vmatpush.bf16.msra.mxu2 %v909_v26 }
  0x28   : > { %579 = vmatpush.bf16.msra.mxu3 %v917_v27 }
  0x29   : > { %538 = vmatpush.bf16.msra.mxu0 %v892_v28 }
  0x2a   : > { %552 = vmatpush.bf16.msra.mxu1 %v900_v29 }
  0x2b   : > { %566 = vmatpush.bf16.msra.mxu2 %v908_v30 }
  0x2c   : > { %580 = vmatpush.bf16.msra.mxu3 %v916_v31  ;;  %539 = vmatmul.bf16.vlgmr.msra.gmra.mxu0 %v744_v40 }
  0x2d   : > { %553 = vmatmul.bf16.vlgmr.msra.gmra.mxu1 %v748_v41 }
  0x2e   : > { %567 = vmatmul.bf16.vlgmr.msra.gmra.mxu2 %v752_v42 }
  0x2f   : > { %581 = vmatmul.bf16.vlgmr.msra.gmra.mxu3 %v756_v43 }
  0xa9   : > { %v540_v45 = vpop.f32.mrf.mxu0 }
  0xaa   : > { %v554_v46 = vpop.f32.mrf.mxu1 }
  0xab   : > { %v555_v49 = vadd.f32 %v554_v46, %v540_v45 }
  0xb1   : > { %v568_v47 = vpop.f32.mrf.mxu2  ;;  %v542_v50 = vpop.f32.mrf.mxu0 }
  0xb2   : > { %v582_v48 = vpop.f32.mrf.mxu3  ;;  %v556_v51 = vpop.f32.mrf.mxu1  ;;  %v569_v52 = vadd.f32 %v568_v47, %v555_v49 }
  0xb3   : > { %v557_v53 = vadd.f32 %v556_v51, %v542_v50 }
  0xb4   : > { %v583_v55 = vadd.f32 %v582_v48, %v569_v52 }
  0xb6   : > { %v602_v59 = vmul.f32 %v583_v55, %v583_v55 }
  0xb9   : > { %v570_v54 = vpop.f32.mrf.mxu2 }
  0xba   : > { %v571_v56 = vadd.f32 %v570_v54, %v557_v53  ;;  %v584_v57 = vpop.f32.mrf.mxu3 }
  0xbc   : > { %v585_v58 = vadd.f32 %v584_v57, %v571_v56 }
  0xbe   : > { %v927_v60 = vpack.c.bf16 %v585_v58, %v583_v55  ;;  %v592_v61 = vadd.f32 %v585_v58, %v583_v55  ;;  %v603_v62 = vmul.f32 %v585_v58, %v585_v58 }
  0xc0   : > { %928 = vst [vmem:[%s236_s6] sm:$0xff] %v927_v60   ;;  %v593_v63 = vrot.slane %v592_v61, 4  ;;  %v604_v0 = vadd.f32 %v603_v62, %v602_v59 }
  0xc2   : > { %v594_v1 = vadd.f32 %v593_v63, %v592_v61  ;;  %v605_v2 = vrot.slane %v604_v0, 4 }
  0xc4   : > { %v595_v3 = vrot.slane %v594_v1, 2  ;;  %v606_v4 = vadd.f32 %v605_v2, %v604_v0 }
  0xc6   : > { %v596_v5 = vadd.f32 %v595_v3, %v594_v1  ;;  %v607_v6 = vrot.slane %v606_v4, 2 }
  0xc8   : > { %v597_v7 = vrot.slane %v596_v5, 1  ;;  %v608_v8 = vadd.f32 %v607_v6, %v606_v4 }
  0xca   : > { %v598_v10 = vadd.f32 %v597_v7, %v596_v5  ;;  %v609_v11 = vrot.slane %v608_v8, 1 }
  0xcc   : > { %v599_v13 = vadd.f32 %v598_v10, %v591_v9  ;;  %v610_v14 = vadd.f32 %v609_v11, %v608_v8 }
  0xce   : > { %600 = vst [vmem:[%s1132_s26] sm:$0x1] %v599_v13  ;;  %v611_v15 = vadd.f32 %v610_v14, %v601_v12 }
  0xd0   : > { %612 = vst [vmem:[%s1137_s29] sm:$0x1] %v611_v15 }
  0xd1 PF: > { %s15_s17 = sadd.s32 1, %s976_s17   ;;  %s1163_s15 = smov %s972_s16 }
  0xd2   : > { %p12_p6 = scmp.ge.s32.totalorder %s15_s17, 4   ;;  %s1164_s16 = smov %s1166_s18 }
  0xd4   :  { %14 = sbr.rel (!%p12_p6) target bundleno = 2 (0x2), region = 86 }

// kernel: encoder_forward.17
= control target key start
LH: loop header
LB: loop body
LE: loop exit
PB: predicated region body
PF: predicated region fallthrough
CT: control target
= control target key end

     0   :  { %s757_s0 = inlined_call_operand.vmem [shape: bf16[2,256], index: 0, kind: input, shape index: {}]   ;;  %s758_s1 = inlined_call_operand.vmem [shape: bf16[256,256], index: 1, kind: input, shape index: {}]   ;;  %s759_s2 = inlined_call_operand.vmem [shape: f32[1,256], index: 2, kind: input, shape index: {}]   ;;  %s760_s3 = inlined_call_operand.vmem [shape: f32[2,128], index: 3, kind: input, shape index: {}]   ;;  %s761_s4 = inlined_call_operand.vmem [shape: f32[2,256], index: 4, kind: output, shape index: {0}]   ;;  %s762_s5 = inlined_call_operand.hbm [shape: f32[2,128], index: 5, kind: output, shape index: {1}]  }
   0x1   :  { %v386_v0 = vld [vmem:[%s758_s1 + $0x70] sm:$0xf]  ;;  %v471_v1 = vld [vmem:[%s758_s1 + $0x74] sm:$0xf0]  ;;  %v470_v5 = vld [vmem:[%s758_s1 + $0x74] sm:$0xf] }
   0x2   :  { %v450_v2 = vld [vmem:[%s758_s1 + $0xf0] sm:$0xf]  ;;  %v387_v3 = vor.u32 %v471_v1, %v386_v0  ;;  %v487_v4 = vld [vmem:[%s758_s1 + $0xf4] sm:$0xf0]  ;;  %v388_v6 = vld [vmem:[%s758_s1 + $0x78] sm:$0xf0] }
   0x3   :  { %v451_v7 = vor.u32 %v487_v4, %v450_v2  ;;  %v391_v8 = vor.u32 %v470_v5, %v388_v6  ;;  %v486_v9 = vld [vmem:[%s758_s1 + $0xf4] sm:$0xf]  ;;  %v452_v10 = vld [vmem:[%s758_s1 + $0xf8] sm:$0xf0]  ;;  %v378_v11 = vld [vmem:[%s758_s1 + $0x60] sm:$0xf] }
   0x4   :  { %225 = vmatpush.bf16.msra.mxu0 %v387_v3  ;;  %v455_v12 = vor.u32 %v486_v9, %v452_v10  ;;  %v469_v13 = vld [vmem:[%s758_s1 + $0x64] sm:$0xf0]  ;;  %v442_v14 = vld [vmem:[%s758_s1 + $0xe0] sm:$0xf]  ;;  %v468_v18 = vld [vmem:[%s758_s1 + $0x64] sm:$0xf] }
   0x5   :  { %v485_v15 = vld [vmem:[%s758_s1 + $0xe4] sm:$0xf0]  ;;  %238 = vmatpush.bf16.msra.mxu1 %v451_v7  ;;  %251 = vmatpush.bf16.msra.mxu2 %v391_v8  ;;  %v379_v16 = vor.u32 %v469_v13, %v378_v11  ;;  %v380_v19 = vld [vmem:[%s758_s1 + $0x68] sm:$0xf0]  ;;  %v484_v20 = vld [vmem:[%s758_s1 + $0xe4] sm:$0xf] }
   0x6   :  { %v443_v17 = vor.u32 %v485_v15, %v442_v14  ;;  %264 = vmatpush.bf16.msra.mxu3 %v455_v12  ;;  %v383_v21 = vor.u32 %v468_v18, %v380_v19  ;;  %v444_v22 = vld [vmem:[%s758_s1 + $0xe8] sm:$0xf0]  ;;  %v370_v23 = vld [vmem:[%s758_s1 + $0x50] sm:$0xf]  ;;  %v467_v24 = vld [vmem:[%s758_s1 + $0x54] sm:$0xf0] }
   0x7   :  { %v447_v25 = vor.u32 %v484_v20, %v444_v22  ;;  %v434_v26 = vld [vmem:[%s758_s1 + $0xd0] sm:$0xf]  ;;  %v483_v27 = vld [vmem:[%s758_s1 + $0xd4] sm:$0xf0]  ;;  %v466_v28 = vld [vmem:[%s758_s1 + $0x54] sm:$0xf]  ;;  %v371_v29 = vor.u32 %v467_v24, %v370_v23 }
   0x8   :  { %226 = vmatpush.bf16.msra.mxu0 %v379_v16  ;;  %v372_v30 = vld [vmem:[%s758_s1 + $0x58] sm:$0xf0]  ;;  %v482_v31 = vld [vmem:[%s758_s1 + $0xd4] sm:$0xf]  ;;  %v435_v33 = vor.u32 %v483_v27, %v434_v26  ;;  %v362_v35 = vld [vmem:[%s758_s1 + $0x40] sm:$0xf] }
   0x9   :  { %v436_v32 = vld [vmem:[%s758_s1 + $0xd8] sm:$0xf0]  ;;  %239 = vmatpush.bf16.msra.mxu1 %v443_v17  ;;  %252 = vmatpush.bf16.msra.mxu2 %v383_v21  ;;  %v375_v34 = vor.u32 %v466_v28, %v372_v30  ;;  %v465_v36 = vld [vmem:[%s758_s1 + $0x44] sm:$0xf0]  ;;  %v426_v37 = vld [vmem:[%s758_s1 + $0xc0] sm:$0xf] }
   0xa   :  { %265 = vmatpush.bf16.msra.mxu3 %v447_v25  ;;  %v439_v38 = vor.u32 %v482_v31, %v436_v32  ;;  %v481_v39 = vld [vmem:[%s758_s1 + $0xc4] sm:$0xf0]  ;;  %v464_v40 = vld [vmem:[%s758_s1 + $0x44] sm:$0xf]  ;;  %v364_v41 = vld [vmem:[%s758_s1 + $0x48] sm:$0xf0]  ;;  %v363_v44 = vor.u32 %v465_v36, %v362_v35 }
   0xb   :  { %v480_v42 = vld [vmem:[%s758_s1 + $0xc4] sm:$0xf]  ;;  %v428_v43 = vld [vmem:[%s758_s1 + $0xc8] sm:$0xf0]  ;;  %v427_v45 = vor.u32 %v481_v39, %v426_v37  ;;  %v367_v46 = vor.u32 %v464_v40, %v364_v41  ;;  %v354_v47 = vld [vmem:[%s758_s1 + $0x30] sm:$0xf] }
   0xc   :  { %227 = vmatpush.bf16.msra.mxu0 %v371_v29  ;;  %v463_v48 = vld [vmem:[%s758_s1 + $0x34] sm:$0xf0]  ;;  %v418_v49 = vld [vmem:[%s758_s1 + $0xb0] sm:$0xf]  ;;  %v431_v50 = vor.u32 %v480_v42, %v428_v43  ;;  %v462_v52 = vld [vmem:[%s758_s1 + $0x34] sm:$0xf] }
   0xd   :  { %240 = vmatpush.bf16.msra.mxu1 %v435_v33  ;;  %253 = vmatpush.bf16.msra.mxu2 %v375_v34  ;;  %v479_v51 = vld [vmem:[%s758_s1 + $0xb4] sm:$0xf0]  ;;  %v356_v53 = vld [vmem:[%s758_s1 + $0x38] sm:$0xf0]  ;;  %v478_v54 = vld [vmem:[%s758_s1 + $0xb4] sm:$0xf]  ;;  %v355_v56 = vor.u32 %v463_v48, %v354_v47 }
   0xe   :  { %266 = vmatpush.bf16.msra.mxu3 %v439_v38  ;;  %v420_v55 = vld [vmem:[%s758_s1 + $0xb8] sm:$0xf0]  ;;  %v419_v57 = vor.u32 %v479_v51, %v418_v49  ;;  %v359_v58 = vor.u32 %v462_v52, %v356_v53  ;;  %v346_v59 = vld [vmem:[%s758_s1 + $0x20] sm:$0xf]  ;;  %v461_v60 = vld [vmem:[%s758_s1 + $0x24] sm:$0xf0] }
   0xf   :  { %v410_v61 = vld [vmem:[%s758_s1 + $0xa0] sm:$0xf]  ;;  %v423_v62 = vor.u32 %v478_v54, %v420_v55  ;;  %v477_v63 = vld [vmem:[%s758_s1 + $0xa4] sm:$0xf0]  ;;  %v460_v0 = vld [vmem:[%s758_s1 + $0x24] sm:$0xf]  ;;  %v347_v4 = vor.u32 %v461_v60, %v346_v59 }
  0x10   :  { %228 = vmatpush.bf16.msra.mxu0 %v363_v44  ;;  %v348_v1 = vld [vmem:[%s758_s1 + $0x28] sm:$0xf0]  ;;  %v476_v2 = vld [vmem:[%s758_s1 + $0xa4] sm:$0xf]  ;;  %v338_v5 = vld [vmem:[%s758_s1 + $0x10] sm:$0xf]  ;;  %v411_v7 = vor.u32 %v477_v63, %v410_v61 }
  0x11   :  { %241 = vmatpush.bf16.msra.mxu1 %v427_v45  ;;  %254 = vmatpush.bf16.msra.mxu2 %v367_v46  ;;  %v412_v3 = vld [vmem:[%s758_s1 + $0xa8] sm:$0xf0]  ;;  %v459_v6 = vld [vmem:[%s758_s1 + $0x14] sm:$0xf0]  ;;  %v351_v8 = vor.u32 %v460_v0, %v348_v1  ;;  %v402_v9 = vld [vmem:[%s758_s1 + $0x90] sm:$0xf] }
  0x12   :  { %267 = vmatpush.bf16.msra.mxu3 %v431_v50  ;;  %v475_v10 = vld [vmem:[%s758_s1 + $0x94] sm:$0xf0]  ;;  %v458_v11 = vld [vmem:[%s758_s1 + $0x14] sm:$0xf]  ;;  %v415_v12 = vor.u32 %v476_v2, %v412_v3  ;;  %v340_v13 = vld [vmem:[%s758_s1 + $0x18] sm:$0xf0] }
  0x13   :  { %v26_v14 = vld [vmem:[%s757_s0] sm:$0x3] }
  0x14   :  { %229 = vmatpush.bf16.msra.mxu0 %v355_v56 }
  0x15   :  { %242 = vmatpush.bf16.msra.mxu1 %v419_v57  ;;  %255 = vmatpush.bf16.msra.mxu2 %v359_v58 }
  0x16   :  { %268 = vmatpush.bf16.msra.mxu3 %v423_v62 }
  0x17   :  { %11 = vsyncpa [#allocation4], 0  ;;  %v474_v15 = vld [vmem:[%s758_s1 + $0x94] sm:$0xf]  ;;  %v404_v16 = vld [vmem:[%s758_s1 + $0x98] sm:$0xf0]  ;;  %v339_v17 = vor.u32 %v459_v6, %v338_v5  ;;  %v403_v18 = vor.u32 %v475_v10, %v402_v9  ;;  %v343_v19 = vor.u32 %v458_v11, %v340_v13 }
  0x18   :  { %60 = vst [vmem:[#allocation1] ss:$9 sm:$0xff] %v26_v14  ;;  %230 = vmatpush.bf16.msra.mxu0 %v347_v4  ;;  %v330_v20 = vld [vmem:[%s758_s1] sm:$0xf]  ;;  %v457_v21 = vld [vmem:[%s758_s1 + $0x4] sm:$0xf0]  ;;  %v407_v23 = vor.u32 %v474_v15, %v404_v16 }
  0x19   :  { %243 = vmatpush.bf16.msra.mxu1 %v411_v7  ;;  %256 = vmatpush.bf16.msra.mxu2 %v351_v8  ;;  %v394_v22 = vld [vmem:[%s758_s1 + $0x80] sm:$0xf]  ;;  %v473_v24 = vld [vmem:[%s758_s1 + $0x84] sm:$0xf0]  ;;  %v456_v25 = vld [vmem:[%s758_s1 + $0x4] sm:$0xf]  ;;  %v331_v29 = vor.u32 %v457_v21, %v330_v20 }
  0x1a   :  { %269 = vmatpush.bf16.msra.mxu3 %v415_v12  ;;  %v332_v26 = vld [vmem:[%s758_s1 + $0x8] sm:$0xf0]  ;;  %v472_v27 = vld [vmem:[%s758_s1 + $0x84] sm:$0xf]  ;;  %v395_v30 = vor.u32 %v473_v24, %v394_v22  ;;  %v518_v35 = vmov 0.0   ;;  %vm280_vm0 = vcmask 1041408  }
  0x1b   :  { %v396_v28 = vld [vmem:[%s758_s1 + $0x88] sm:$0xf0]  ;;  %v335_v31 = vor.u32 %v456_v25, %v332_v26  ;;  %24 = vst [vmem:[#allocation2] sm:$0xf] %v518_v35  ;;  %v289_v44 = vld [vmem:[%s759_s2] sm:$0x3] }
  0x1c   :  { %231 = vmatpush.bf16.msra.mxu0 %v339_v17  ;;  %v399_v32 = vor.u32 %v472_v27, %v396_v28  ;;  %v292_v48 = vperm.slane %v289_v44, 1  ;;  %v291_v52 = vperm.slane %v289_v44, 0  ;;  %v298_v60 = vld [vmem:[%s760_s3] sm:$0x3]  ;;  %s519_s26 = smov [#allocation3]   ;;  %s317_s30 = sshll.u32 %s762_s5, 4  ;;  %s318_s30 = int_to_ptr.hbm [resolvable:$true] %s317_s30 }
  0x1d   :  { %244 = vmatpush.bf16.msra.mxu1 %v403_v18  ;;  %257 = vmatpush.bf16.msra.mxu2 %v343_v19  ;;  %s315_s27 = sshll.u32 %s519_s26, 4  ;;  %s316_s27 = int_to_ptr.vmem [resolvable:$true] %s315_s27 }
  0x1e   :  { %270 = vmatpush.bf16.msra.mxu3 %v407_v23  ;;  %v293_v53 = vrot.slane %v292_v48, 6 }
  0x1f   :  { %v61_v33 = vld [vmem:[#allocation1] sm:$0xff]  ;;  %v62_v34 = vld [vmem:[#allocation1 + $0x9] sm:$0xff] }
  0x20   :  { %232 = vmatpush.bf16.msra.mxu0 %v331_v29  ;;  %v294_v54 = vsel %vm280_vm0, %v291_v52, %v293_v53 }
  0x21   :  { %245 = vmatpush.bf16.msra.mxu1 %v395_v30  ;;  %258 = vmatpush.bf16.msra.mxu2 %v335_v31 }
  0x22   :  { %271 = vmatpush.bf16.msra.mxu3 %v399_v32  ;;  %v25_v45 = vld [vmem:[#allocation2] sm:$0xf] }
  0x23   :  { %233 = vmatmul.bf16.vlgmr.msra.gmra.mxu0 %v61_v33 }
  0x24   :  { %246 = vmatmul.bf16.vlgmr.msra.gmra.mxu1 %v62_v34  ;;  %259 = vmatmul.bf16.vlgmr.msra.gmra.mxu2 %v61_v33 }
  0x25   :  { %272 = vmatmul.bf16.vlgmr.msra.gmra.mxu3 %v62_v34 }
  0xa0   :  { %v234_v36 = vpop.f32.mrf.mxu0 }
  0xa1   :  { %v247_v37 = vpop.f32.mrf.mxu1 }
  0xa2   :  { %v248_v41 = vadd.f32 %v247_v37, %v234_v36 }
  0xa7   :  { %v260_v38 = vpop.f32.mrf.mxu2 }
  0xa8   :  { %v273_v39 = vpop.f32.mrf.mxu3  ;;  %v236_v40 = vpop.f32.mrf.mxu0 }
  0xa9   :  { %v274_v42 = vadd.f32 %v273_v39, %v260_v38  ;;  %v249_v43 = vpop.f32.mrf.mxu1 }
  0xab   :  { %v279_v46 = vrot.slane %v274_v42, 6 }
  0xad   :  { %v281_v47 = vsel %vm280_vm0, %v248_v41, %v279_v46 }
  0xae   :  { %v283_v49 = vadd.f32 %v281_v47, %v25_v45 }
  0xaf   :  { %v262_v50 = vpop.f32.mrf.mxu2 }
  0xb0   :  { %284 = vst [vmem:[#allocation2] sm:$0xf] %v283_v49  ;;  %v275_v51 = vpop.f32.mrf.mxu3 }
  0xb7   :  { %v288_v55 = vld [vmem:[#allocation2] sm:$0xf] }
  0xb8   :  { %v296_v56 = vadd.f32 %v294_v54, %v288_v55 }
  0xba   :  { %297 = vst [vmem:[%s761_s4] sm:$0xf] %v296_v56  ;;  %v300_v57 = vrot.slane %v296_v56, 2 }
  0xbc   :  { %v302_v58 = vmul.f32 0.5, %v300_v57 }
  0xbe   :  { %v303_v59 = vmul.f32 1.442695, %v302_v58 }
  0xc0   :  { %490 = vpow2.f32 %v303_v59 }
  0xc6   :  { %v491_v61 = vpop.eup %490 }
  0xc7   :  { %v305_v62 = vmul.f32 %v491_v61, %v298_v60 }
  0xc9   :  { %v306_v63 = vadd.f32 %v305_v62, %v296_v56 }
  0xcb   :  { %307 = vst [vmem:[#allocation3] sm:$0x3] %v306_v63 }
  0xcc   :  { %320 = dma.vmem_to_hbm [thread:$0]  %s316_s27, 32, %s318_s30, [#allocation4]  }
  0xcd   :  { %516 = dma.done.wait [#allocation4], 32  }
  0xce   :  { %517 = vsyncadd [#allocation4], 4294967264 }
  0xcf   :  { %327 = vsyncpa [#allocation4], 1 }

</bundles_post_ra>
